<compile_context>
chip_gen: v6e
topology: v6e:2x2x1
jax: 0.10.0
libtpu: 0.0.40
codegen_flags: <defaults>
</compile_context>

<pallas_src>
import math
import functools

import jax
import jax.numpy as jnp
from jax.experimental import pallas as pl
from jax.experimental.pallas import tpu as pltpu


# ----------------------------------------------------------------------------
# Pallas kernel: full TransformerEncoder stack (L layers, post-LN, relu FFN)
# on a block of NS padded sequences, with masked softmax over padded keys.
# ----------------------------------------------------------------------------
def _encoder_stack_kernel(nlayers, nheads, eps,
                          x_ref, kbias_ref,
                          wqkv_ref, bqkv_ref, wo_ref, bo_ref,
                          ln1g_ref, ln1b_ref, w1_ref, b1_ref,
                          w2_ref, b2_ref, ln2g_ref, ln2b_ref,
                          o_ref):
    NS, S, D = x_ref.shape
    hd = D // nheads
    scale = 1.0 / math.sqrt(hd)

    # Additive key mask: 0 for valid positions, -1e30 for padding. (NS, 1, S)
    kbias = kbias_ref[...].astype(jnp.float32)

    # Activations for all NS sequences, flattened so matmul M = NS*S.
    h = x_ref[...].astype(jnp.float32).reshape(NS * S, D)

    for l in range(nlayers):                          # layers fused in one kernel
        # Fused QKV projection on the flattened batch.
        qkv = jnp.dot(h, wqkv_ref[l],
                      preferred_element_type=jnp.float32) + bqkv_ref[l]
        q = qkv[:, :D].reshape(NS, S, D)
        k = qkv[:, D:2 * D].reshape(NS, S, D)
        v = qkv[:, 2 * D:].reshape(NS, S, D)

        # Multi-head attention, batched over all NS sequences per head.
        # TODO(synk): heads are still a static python loop (4-D batched
        # dot_general avoided for lowering safety at hd=8).
        head_outs = []
        for hh in range(nheads):
            sl = slice(hh * hd, (hh + 1) * hd)
            s_ = jnp.einsum('bqd,bkd->bqk', q[:, :, sl], k[:, :, sl],
                            preferred_element_type=jnp.float32) * scale
            s_ = s_ + kbias                            # mask padded keys
            s_ = s_ - jnp.max(s_, axis=-1, keepdims=True)
            p = jnp.exp(s_)
            p = p * pl.reciprocal(jnp.sum(p, axis=-1, keepdims=True), approx=True)
            head_outs.append(jnp.einsum('bqk,bkd->bqd', p, v[:, :, sl],
                                        preferred_element_type=jnp.float32))
        attn = jnp.concatenate(head_outs, axis=-1).reshape(NS * S, D)
        attn = jnp.dot(attn, wo_ref[l],
                       preferred_element_type=jnp.float32) + bo_ref[l]

        # Residual + LayerNorm 1 (norm_first=False, PyTorch default).
        y = h + attn
        mu = jnp.mean(y, axis=-1, keepdims=True)
        var = jnp.mean(jnp.square(y - mu), axis=-1, keepdims=True)
        y = (y - mu) * jax.lax.rsqrt(var + eps) * ln1g_ref[l] + ln1b_ref[l]

        # FFN: relu(y @ W1^T + b1) @ W2^T + b2, on the flattened batch.
        f = jnp.maximum(
            jnp.dot(y, w1_ref[l], preferred_element_type=jnp.float32) + b1_ref[l],
            0.0)
        f = jnp.dot(f, w2_ref[l], preferred_element_type=jnp.float32) + b2_ref[l]

        # Residual + LayerNorm 2.
        z = y + f
        mu2 = jnp.mean(z, axis=-1, keepdims=True)
        var2 = jnp.mean(jnp.square(z - mu2), axis=-1, keepdims=True)
        h = (z - mu2) * jax.lax.rsqrt(var2 + eps) * ln2g_ref[l] + ln2b_ref[l]

    o_ref[...] = h.reshape(NS, S, D).astype(o_ref.dtype)


def _round_up(x, m):
    return ((x + m - 1) // m) * m


def encode_batch(x, lengths, p, nheads, eps=1e-5, target_rows=128):
    """Run the full encoder stack on a batch of zero-padded sequences.

    x:        (N, S_max, D) zero-padded sequences.
    lengths:  python list of true lengths (static).
    Returns   (N, S_max, D); rows beyond each true length are junk (never read).
    """
    n, s_max, d = x.shape
    nlayers = p['wqkv_t'].shape[0]
    assert d % nheads == 0

    # Sequences per grid step: aim for ~target_rows rows of M per kernel step
    # without padding the batch excessively.
    ns = max(1, min(n, max(1, target_rows // s_max)))
    n_pad = _round_up(n, ns)

    # Pad batch and build the additive key-mask (0 valid, -1e30 padded).
    if n_pad > n:
        x = jnp.concatenate([x, jnp.zeros((n_pad - n, s_max, d), x.dtype)], axis=0)
    len_arr = jnp.asarray(list(lengths) + [s_max] * (n_pad - n), dtype=jnp.int32)
    valid = jnp.arange(s_max, dtype=jnp.int32)[None, :] < len_arr[:, None]
    kbias = jnp.where(valid, 0.0, -1e30).astype(jnp.float32)[:, None, :]

    weights = (p['wqkv_t'], p['bqkv'], p['wo_t'], p['bo'],
               p['ln1_g'], p['ln1_b'], p['w1_t'], p['b1'],
               p['w2_t'], p['b2'], p['ln2_g'], p['ln2_b'])

    def full_spec(a):
        nd = a.ndim
        return pl.BlockSpec(a.shape, lambda i, _n=nd: (0,) * _n)

    kernel = functools.partial(_encoder_stack_kernel, nlayers, nheads, eps)

    out = pl.pallas_call(
        kernel,
        out_shape=jax.ShapeDtypeStruct((n_pad, s_max, d), x.dtype),
        grid=(n_pad // ns,),
        in_specs=[pl.BlockSpec((ns, s_max, d), lambda i: (i, 0, 0)),
                  pl.BlockSpec((ns, 1, s_max), lambda i: (i, 0, 0))]
                 + [full_spec(w) for w in weights],
        out_specs=pl.BlockSpec((ns, s_max, d), lambda i: (i, 0, 0)),
        compiler_params=pltpu.CompilerParams(dimension_semantics=("parallel",)),
    )(x, kbias, *weights)
    return out[:n]


# ----------------------------------------------------------------------------
# Plain-JAX glue
# ----------------------------------------------------------------------------
def sinusoidal_pe(seq_len, d_model, dtype=jnp.float32):
    pos = jnp.arange(seq_len, dtype=jnp.float32)[:, None]
    i = jnp.arange(0, d_model, 2, dtype=jnp.float32)[None, :]
    angle = pos / jnp.power(10000.0, i / d_model)
    pe = jnp.zeros((seq_len, d_model), dtype)
    pe = pe.at[:, 0::2].set(jnp.sin(angle).astype(dtype))
    pe = pe.at[:, 1::2].set(jnp.cos(angle).astype(dtype))
    return pe


def init_params(key, num_layers, d_model, d_ff):
    """Per-layer weights, stacked along a leading L axis for the fused kernel."""
    acc = {k: [] for k in ('wqkv_t', 'bqkv', 'wo_t', 'bo', 'ln1_g', 'ln1_b',
                           'w1_t', 'b1', 'w2_t', 'b2', 'ln2_g', 'ln2_b')}
    for i in range(num_layers):
        keys = jax.random.split(jax.random.fold_in(key, i), 6)
        wqkv = jax.random.normal(keys[0], (3 * d_model, d_model), jnp.float32) * 0.05
        bqkv = jax.random.normal(keys[1], (3 * d_model,), jnp.float32) * 0.02
        wo = jax.random.normal(keys[2], (d_model, d_model), jnp.float32) * 0.05
        w1 = jax.random.normal(keys[3], (d_ff, d_model), jnp.float32) * 0.05
        b1 = jax.random.normal(keys[4], (d_ff,), jnp.float32) * 0.02
        w2 = jax.random.normal(keys[5], (d_model, d_ff), jnp.float32) * 0.05
        acc['wqkv_t'].append(wqkv.T)
        acc['bqkv'].append(bqkv[None, :])
        acc['wo_t'].append(wo.T)
        acc['bo'].append(jnp.zeros((1, d_model), jnp.float32))
        acc['ln1_g'].append(jnp.ones((1, d_model), jnp.float32))
        acc['ln1_b'].append(jnp.zeros((1, d_model), jnp.float32))
        acc['w1_t'].append(w1.T)
        acc['b1'].append(b1[None, :])
        acc['w2_t'].append(w2.T)
        acc['b2'].append(jnp.zeros((1, d_model), jnp.float32))
        acc['ln2_g'].append(jnp.ones((1, d_model), jnp.float32))
        acc['ln2_b'].append(jnp.zeros((1, d_model), jnp.float32))
    return {k: jnp.stack(v, axis=0) for k, v in acc.items()}


def hierarchical_encoder_forward(tokens_embeddings, spans, params, config):
    """Mirrors HierarchicalEncoder.forward (eval mode)."""
    B, S, D = tokens_embeddings.shape
    nheads = config['nof_heads']

    context_output = tokens_embeddings
    # dropout -> identity (eval); positional encoding -> additive sinusoidal.
    x = tokens_embeddings + sinusoidal_pe(S, config['positional_dim'])[None, :, :]

    # Hierarchical pass: all chunks of a level are padded + batched into ONE call.
    for subsequence_size in config['subsequence_levels']:
        starts = list(range(0, S, subsequence_size))
        chunk_lens = [min(subsequence_size, S - s0) for s0 in starts]
        s_max = _round_up(max(chunk_lens), 8)

        seqs, lens = [], []
        for b in range(B):
            for s0, ln in zip(starts, chunk_lens):
                c = x[b, s0:s0 + ln, :]
                seqs.append(jnp.pad(c, ((0, s_max - ln), (0, 0))))
                lens.append(ln)
        enc = encode_batch(jnp.stack(seqs, axis=0), lens, params, nheads)

        rows = []
        for b in range(B):
            pieces = []
            for ci, ln in enumerate(chunk_lens):
                pieces.append(enc[b * len(starts) + ci, :ln, :])
            rows.append(jnp.concatenate(pieces, axis=0))
        x = jnp.stack(rows, axis=0)

    # Span pass: all spans (across all batch elements) padded + batched into ONE call.
    flat_spans = [sp for batch_spans in spans for sp in batch_spans]
    span_lens = [s1 - s0 for (_, s0, s1) in flat_spans]
    s_max = _round_up(max(span_lens), 8)
    seqs = []
    for (b, s0, s1) in flat_spans:
        c = x[b, s0:s1, :]
        seqs.append(jnp.pad(c, ((0, s_max - (s1 - s0)), (0, 0))))
    span_enc = encode_batch(jnp.stack(seqs, axis=0), span_lens, params, nheads)

    # Span embeddings: [ctx[first], ctx[last], enc(span)[first], enc(span)[last]].
    spans_embeddings = []
    for i, (b, s0, s1) in enumerate(flat_spans):
        ctx = context_output[b, s0:s1]
        enc_i = span_enc[i]
        ln = s1 - s0
        spans_embeddings.append(jnp.concatenate(
            [ctx[0], ctx[-1], enc_i[0], enc_i[ln - 1]], axis=-1))

    # torch pad_sequence(...).transpose(0,1).unsqueeze(0): all entries share the
    # same length 4*D, so this is just a stack -> (1, num_spans, 4*D).
    return jnp.stack(spans_embeddings, axis=0)[None, :, :]


# ----------------------------------------------------------------------------
# Demo
# ----------------------------------------------------------------------------
if __name__ == "__main__":
    config = dict(
        subsequence_levels=[8, 16],
        input_dim=32,
        nof_heads=4,
        dropout=0.1,          # identity at inference
        nof_layers=2,
        positional_dim=32,
        dim_feedforward=128,  # PyTorch default would be 2048; kept small here
    )

    key = jax.random.PRNGKey(0)
    kx, kp = jax.random.split(key)

    B, S, D = 2, 16, config['input_dim']
    tokens_embeddings = jax.random.normal(kx, (B, S, D), jnp.float32)
    # spans: list (per batch) of (batch_index, start, end) tuples.
    spans = [[(0, 0, 8), (0, 4, 12)], [(1, 0, 16), (1, 8, 16)]]

    params = init_params(kp, config['nof_layers'], D, config['dim_feedforward'])

    out = hierarchical_encoder_forward(tokens_embeddings, spans, params, config)
    out = jax.block_until_ready(out)

    assert out.shape == (1, 4, 4 * D), out.shape
    assert bool(jnp.all(jnp.isfinite(out)))
    print("KERNEL_OK")
</pallas_src>

<mosaic_0001>
module attributes {stable_mosaic.version = 11 : i64} {
  func.func @_encoder_stack_kernel(%arg0: i32, %arg1: memref<4x8x32xf32, #tpu.memory_space<vmem>>, %arg2: memref<4x1x8xf32, #tpu.memory_space<vmem>>, %arg3: memref<2x32x96xf32, #tpu.memory_space<vmem>>, %arg4: memref<2x1x96xf32, #tpu.memory_space<vmem>>, %arg5: memref<2x32x32xf32, #tpu.memory_space<vmem>>, %arg6: memref<2x1x32xf32, #tpu.memory_space<vmem>>, %arg7: memref<2x1x32xf32, #tpu.memory_space<vmem>>, %arg8: memref<2x1x32xf32, #tpu.memory_space<vmem>>, %arg9: memref<2x32x128xf32, #tpu.memory_space<vmem>>, %arg10: memref<2x1x128xf32, #tpu.memory_space<vmem>>, %arg11: memref<2x128x32xf32, #tpu.memory_space<vmem>>, %arg12: memref<2x1x32xf32, #tpu.memory_space<vmem>>, %arg13: memref<2x1x32xf32, #tpu.memory_space<vmem>>, %arg14: memref<2x1x32xf32, #tpu.memory_space<vmem>>, %arg15: memref<4x8x32xf32, #tpu.memory_space<vmem>>) attributes {dimension_semantics = [#tpu.dimension_semantics<parallel>], iteration_bounds = array<i64: 1>, scalar_prefetch = 0 : i64, scratch_operands = 0 : i64, tpu.core_type = #tpu.core_type<tc>, window_params = [{transform_indices = @transform_0, window_bounds = array<i64: 4, 8, 32>}, {transform_indices = @transform_1, window_bounds = array<i64: 4, 1, 8>}, {pipeline_mode = #tpu.pipeline_mode<synchronous>, transform_indices = @transform_2, window_bounds = array<i64: 2, 32, 96>}, {pipeline_mode = #tpu.pipeline_mode<synchronous>, transform_indices = @transform_3, window_bounds = array<i64: 2, 1, 96>}, {pipeline_mode = #tpu.pipeline_mode<synchronous>, transform_indices = @transform_4, window_bounds = array<i64: 2, 32, 32>}, {pipeline_mode = #tpu.pipeline_mode<synchronous>, transform_indices = @transform_5, window_bounds = array<i64: 2, 1, 32>}, {pipeline_mode = #tpu.pipeline_mode<synchronous>, transform_indices = @transform_6, window_bounds = array<i64: 2, 1, 32>}, {pipeline_mode = #tpu.pipeline_mode<synchronous>, transform_indices = @transform_7, window_bounds = array<i64: 2, 1, 32>}, {pipeline_mode = #tpu.pipeline_mode<synchronous>, transform_indices = @transform_8, window_bounds = array<i64: 2, 32, 128>}, {pipeline_mode = #tpu.pipeline_mode<synchronous>, transform_indices = @transform_9, window_bounds = array<i64: 2, 1, 128>}, {pipeline_mode = #tpu.pipeline_mode<synchronous>, transform_indices = @transform_10, window_bounds = array<i64: 2, 128, 32>}, {pipeline_mode = #tpu.pipeline_mode<synchronous>, transform_indices = @transform_11, window_bounds = array<i64: 2, 1, 32>}, {pipeline_mode = #tpu.pipeline_mode<synchronous>, transform_indices = @transform_12, window_bounds = array<i64: 2, 1, 32>}, {pipeline_mode = #tpu.pipeline_mode<synchronous>, transform_indices = @transform_13, window_bounds = array<i64: 2, 1, 32>}, {transform_indices = @transform_14, window_bounds = array<i64: 4, 8, 32>}]} {
    %c0 = arith.constant 0 : index
    %c0_0 = arith.constant 0 : index
    %c0_1 = arith.constant 0 : index
    %0 = vector.load %arg2[%c0, %c0_0, %c0_1] : memref<4x1x8xf32, #tpu.memory_space<vmem>>, vector<4x1x8xf32>
    %c0_2 = arith.constant 0 : index
    %c0_3 = arith.constant 0 : index
    %c0_4 = arith.constant 0 : index
    %1 = vector.load %arg1[%c0_2, %c0_3, %c0_4] : memref<4x8x32xf32, #tpu.memory_space<vmem>>, vector<4x8x32xf32>
    %2 = vector.shape_cast %1 : vector<4x8x32xf32> to vector<32x32xf32>
    %c0_5 = arith.constant 0 : index
    %c0_6 = arith.constant 0 : index
    %c0_7 = arith.constant 0 : index
    %3 = vector.load %arg3[%c0_5, %c0_6, %c0_7] : memref<2x32x96xf32, #tpu.memory_space<vmem>>, vector<1x32x96xf32>
    %4 = vector.shape_cast %3 : vector<1x32x96xf32> to vector<32x96xf32>
    %cst = arith.constant dense<0.000000e+00> : vector<32x96xf32>
    %5 = tpu.matmul %2, %4, %cst {dimension_numbers = #tpu.dot_dimension_numbers<[1], [0], [0], [1], [0, 0, 1, 1], [], []>} : vector<32x32xf32>, vector<32x96xf32>, vector<32x96xf32> -> vector<32x96xf32>
    %c0_8 = arith.constant 0 : index
    %c0_9 = arith.constant 0 : index
    %c0_10 = arith.constant 0 : index
    %6 = vector.load %arg4[%c0_8, %c0_9, %c0_10] : memref<2x1x96xf32, #tpu.memory_space<vmem>>, vector<1x1x96xf32>
    %7 = vector.shape_cast %6 : vector<1x1x96xf32> to vector<1x96xf32>
    %8 = vector.broadcast %7 : vector<1x96xf32> to vector<32x96xf32>
    %9 = arith.addf %5, %8 : vector<32x96xf32>
    %10 = vector.extract_strided_slice %9 {offsets = [0, 0], sizes = [32, 32], strides = [1, 1]} : vector<32x96xf32> to vector<32x32xf32>
    %11 = vector.shape_cast %10 : vector<32x32xf32> to vector<4x8x32xf32>
    %12 = vector.extract_strided_slice %9 {offsets = [0, 32], sizes = [32, 32], strides = [1, 1]} : vector<32x96xf32> to vector<32x32xf32>
    %13 = vector.shape_cast %12 : vector<32x32xf32> to vector<4x8x32xf32>
    %14 = vector.extract_strided_slice %9 {offsets = [0, 64], sizes = [32, 32], strides = [1, 1]} : vector<32x96xf32> to vector<32x32xf32>
    %15 = vector.shape_cast %14 : vector<32x32xf32> to vector<4x8x32xf32>
    %16 = vector.extract_strided_slice %11 {offsets = [0, 0, 0], sizes = [4, 8, 8], strides = [1, 1, 1]} : vector<4x8x32xf32> to vector<4x8x8xf32>
    %17 = vector.extract_strided_slice %13 {offsets = [0, 0, 0], sizes = [4, 8, 8], strides = [1, 1, 1]} : vector<4x8x32xf32> to vector<4x8x8xf32>
    "tpu.trace_start"() <{level = 10 : i32, message = "bqd,bkd->bqk"}> : () -> ()
    %cst_11 = arith.constant dense<0.000000e+00> : vector<4x8x8xf32>
    %18 = tpu.matmul %16, %17, %cst_11 {dimension_numbers = #tpu.dot_dimension_numbers<[2], [2], [1], [1], [0, 0, 0, 1, 1, 1], [0], [0]>} : vector<4x8x8xf32>, vector<4x8x8xf32>, vector<4x8x8xf32> -> vector<4x8x8xf32>
    "tpu.trace_stop"() : () -> ()
    %cst_12 = arith.constant 0.353553385 : f32
    %19 = vector.broadcast %cst_12 : f32 to vector<4x8x8xf32>
    %20 = arith.mulf %18, %19 : vector<4x8x8xf32>
    %21 = vector.broadcast %0 : vector<4x1x8xf32> to vector<4x8x8xf32>
    %22 = arith.addf %20, %21 : vector<4x8x8xf32>
    %cst_13 = arith.constant dense<0xFF800000> : vector<4x8xf32>
    %23 = vector.multi_reduction <maximumf>, %22, %cst_13 [2] : vector<4x8x8xf32> to vector<4x8xf32>
    %24 = vector.shape_cast %23 : vector<4x8xf32> to vector<4x8x1xf32>
    %25 = vector.broadcast %24 : vector<4x8x1xf32> to vector<4x8x8xf32>
    %26 = arith.subf %22, %25 : vector<4x8x8xf32>
    %27 = math.exp %26 : vector<4x8x8xf32>
    %cst_14 = arith.constant dense<0.000000e+00> : vector<4x8xf32>
    %28 = vector.multi_reduction <add>, %27, %cst_14 [2] : vector<4x8x8xf32> to vector<4x8xf32>
    %29 = vector.shape_cast %28 : vector<4x8xf32> to vector<4x8x1xf32>
    %30 = tpu.reciprocal %29 {approx = true} : vector<4x8x1xf32> -> vector<4x8x1xf32>
    %31 = vector.broadcast %30 : vector<4x8x1xf32> to vector<4x8x8xf32>
    %32 = arith.mulf %27, %31 : vector<4x8x8xf32>
    %33 = vector.extract_strided_slice %15 {offsets = [0, 0, 0], sizes = [4, 8, 8], strides = [1, 1, 1]} : vector<4x8x32xf32> to vector<4x8x8xf32>
    "tpu.trace_start"() <{level = 10 : i32, message = "bqk,bkd->bqd"}> : () -> ()
    %cst_15 = arith.constant dense<0.000000e+00> : vector<4x8x8xf32>
    %34 = tpu.matmul %32, %33, %cst_15 {dimension_numbers = #tpu.dot_dimension_numbers<[2], [1], [1], [2], [0, 0, 0, 1, 1, 2], [0], [0]>} : vector<4x8x8xf32>, vector<4x8x8xf32>, vector<4x8x8xf32> -> vector<4x8x8xf32>
    "tpu.trace_stop"() : () -> ()
    %35 = vector.extract_strided_slice %11 {offsets = [0, 0, 8], sizes = [4, 8, 8], strides = [1, 1, 1]} : vector<4x8x32xf32> to vector<4x8x8xf32>
    %36 = vector.extract_strided_slice %13 {offsets = [0, 0, 8], sizes = [4, 8, 8], strides = [1, 1, 1]} : vector<4x8x32xf32> to vector<4x8x8xf32>
    "tpu.trace_start"() <{level = 10 : i32, message = "bqd,bkd->bqk"}> : () -> ()
    %cst_16 = arith.constant dense<0.000000e+00> : vector<4x8x8xf32>
    %37 = tpu.matmul %35, %36, %cst_16 {dimension_numbers = #tpu.dot_dimension_numbers<[2], [2], [1], [1], [0, 0, 0, 1, 1, 1], [0], [0]>} : vector<4x8x8xf32>, vector<4x8x8xf32>, vector<4x8x8xf32> -> vector<4x8x8xf32>
    "tpu.trace_stop"() : () -> ()
    %cst_17 = arith.constant 0.353553385 : f32
    %38 = vector.broadcast %cst_17 : f32 to vector<4x8x8xf32>
    %39 = arith.mulf %37, %38 : vector<4x8x8xf32>
    %40 = vector.broadcast %0 : vector<4x1x8xf32> to vector<4x8x8xf32>
    %41 = arith.addf %39, %40 : vector<4x8x8xf32>
    %cst_18 = arith.constant dense<0xFF800000> : vector<4x8xf32>
    %42 = vector.multi_reduction <maximumf>, %41, %cst_18 [2] : vector<4x8x8xf32> to vector<4x8xf32>
    %43 = vector.shape_cast %42 : vector<4x8xf32> to vector<4x8x1xf32>
    %44 = vector.broadcast %43 : vector<4x8x1xf32> to vector<4x8x8xf32>
    %45 = arith.subf %41, %44 : vector<4x8x8xf32>
    %46 = math.exp %45 : vector<4x8x8xf32>
    %cst_19 = arith.constant dense<0.000000e+00> : vector<4x8xf32>
    %47 = vector.multi_reduction <add>, %46, %cst_19 [2] : vector<4x8x8xf32> to vector<4x8xf32>
    %48 = vector.shape_cast %47 : vector<4x8xf32> to vector<4x8x1xf32>
    %49 = tpu.reciprocal %48 {approx = true} : vector<4x8x1xf32> -> vector<4x8x1xf32>
    %50 = vector.broadcast %49 : vector<4x8x1xf32> to vector<4x8x8xf32>
    %51 = arith.mulf %46, %50 : vector<4x8x8xf32>
    %52 = vector.extract_strided_slice %15 {offsets = [0, 0, 8], sizes = [4, 8, 8], strides = [1, 1, 1]} : vector<4x8x32xf32> to vector<4x8x8xf32>
    "tpu.trace_start"() <{level = 10 : i32, message = "bqk,bkd->bqd"}> : () -> ()
    %cst_20 = arith.constant dense<0.000000e+00> : vector<4x8x8xf32>
    %53 = tpu.matmul %51, %52, %cst_20 {dimension_numbers = #tpu.dot_dimension_numbers<[2], [1], [1], [2], [0, 0, 0, 1, 1, 2], [0], [0]>} : vector<4x8x8xf32>, vector<4x8x8xf32>, vector<4x8x8xf32> -> vector<4x8x8xf32>
    "tpu.trace_stop"() : () -> ()
    %54 = vector.extract_strided_slice %11 {offsets = [0, 0, 16], sizes = [4, 8, 8], strides = [1, 1, 1]} : vector<4x8x32xf32> to vector<4x8x8xf32>
    %55 = vector.extract_strided_slice %13 {offsets = [0, 0, 16], sizes = [4, 8, 8], strides = [1, 1, 1]} : vector<4x8x32xf32> to vector<4x8x8xf32>
    "tpu.trace_start"() <{level = 10 : i32, message = "bqd,bkd->bqk"}> : () -> ()
    %cst_21 = arith.constant dense<0.000000e+00> : vector<4x8x8xf32>
    %56 = tpu.matmul %54, %55, %cst_21 {dimension_numbers = #tpu.dot_dimension_numbers<[2], [2], [1], [1], [0, 0, 0, 1, 1, 1], [0], [0]>} : vector<4x8x8xf32>, vector<4x8x8xf32>, vector<4x8x8xf32> -> vector<4x8x8xf32>
    "tpu.trace_stop"() : () -> ()
    %cst_22 = arith.constant 0.353553385 : f32
    %57 = vector.broadcast %cst_22 : f32 to vector<4x8x8xf32>
    %58 = arith.mulf %56, %57 : vector<4x8x8xf32>
    %59 = vector.broadcast %0 : vector<4x1x8xf32> to vector<4x8x8xf32>
    %60 = arith.addf %58, %59 : vector<4x8x8xf32>
    %cst_23 = arith.constant dense<0xFF800000> : vector<4x8xf32>
    %61 = vector.multi_reduction <maximumf>, %60, %cst_23 [2] : vector<4x8x8xf32> to vector<4x8xf32>
    %62 = vector.shape_cast %61 : vector<4x8xf32> to vector<4x8x1xf32>
    %63 = vector.broadcast %62 : vector<4x8x1xf32> to vector<4x8x8xf32>
    %64 = arith.subf %60, %63 : vector<4x8x8xf32>
    %65 = math.exp %64 : vector<4x8x8xf32>
    %cst_24 = arith.constant dense<0.000000e+00> : vector<4x8xf32>
    %66 = vector.multi_reduction <add>, %65, %cst_24 [2] : vector<4x8x8xf32> to vector<4x8xf32>
    %67 = vector.shape_cast %66 : vector<4x8xf32> to vector<4x8x1xf32>
    %68 = tpu.reciprocal %67 {approx = true} : vector<4x8x1xf32> -> vector<4x8x1xf32>
    %69 = vector.broadcast %68 : vector<4x8x1xf32> to vector<4x8x8xf32>
    %70 = arith.mulf %65, %69 : vector<4x8x8xf32>
    %71 = vector.extract_strided_slice %15 {offsets = [0, 0, 16], sizes = [4, 8, 8], strides = [1, 1, 1]} : vector<4x8x32xf32> to vector<4x8x8xf32>
    "tpu.trace_start"() <{level = 10 : i32, message = "bqk,bkd->bqd"}> : () -> ()
    %cst_25 = arith.constant dense<0.000000e+00> : vector<4x8x8xf32>
    %72 = tpu.matmul %70, %71, %cst_25 {dimension_numbers = #tpu.dot_dimension_numbers<[2], [1], [1], [2], [0, 0, 0, 1, 1, 2], [0], [0]>} : vector<4x8x8xf32>, vector<4x8x8xf32>, vector<4x8x8xf32> -> vector<4x8x8xf32>
    "tpu.trace_stop"() : () -> ()
    %73 = vector.extract_strided_slice %11 {offsets = [0, 0, 24], sizes = [4, 8, 8], strides = [1, 1, 1]} : vector<4x8x32xf32> to vector<4x8x8xf32>
    %74 = vector.extract_strided_slice %13 {offsets = [0, 0, 24], sizes = [4, 8, 8], strides = [1, 1, 1]} : vector<4x8x32xf32> to vector<4x8x8xf32>
    "tpu.trace_start"() <{level = 10 : i32, message = "bqd,bkd->bqk"}> : () -> ()
    %cst_26 = arith.constant dense<0.000000e+00> : vector<4x8x8xf32>
    %75 = tpu.matmul %73, %74, %cst_26 {dimension_numbers = #tpu.dot_dimension_numbers<[2], [2], [1], [1], [0, 0, 0, 1, 1, 1], [0], [0]>} : vector<4x8x8xf32>, vector<4x8x8xf32>, vector<4x8x8xf32> -> vector<4x8x8xf32>
    "tpu.trace_stop"() : () -> ()
    %cst_27 = arith.constant 0.353553385 : f32
    %76 = vector.broadcast %cst_27 : f32 to vector<4x8x8xf32>
    %77 = arith.mulf %75, %76 : vector<4x8x8xf32>
    %78 = vector.broadcast %0 : vector<4x1x8xf32> to vector<4x8x8xf32>
    %79 = arith.addf %77, %78 : vector<4x8x8xf32>
    %cst_28 = arith.constant dense<0xFF800000> : vector<4x8xf32>
    %80 = vector.multi_reduction <maximumf>, %79, %cst_28 [2] : vector<4x8x8xf32> to vector<4x8xf32>
    %81 = vector.shape_cast %80 : vector<4x8xf32> to vector<4x8x1xf32>
    %82 = vector.broadcast %81 : vector<4x8x1xf32> to vector<4x8x8xf32>
    %83 = arith.subf %79, %82 : vector<4x8x8xf32>
    %84 = math.exp %83 : vector<4x8x8xf32>
    %cst_29 = arith.constant dense<0.000000e+00> : vector<4x8xf32>
    %85 = vector.multi_reduction <add>, %84, %cst_29 [2] : vector<4x8x8xf32> to vector<4x8xf32>
    %86 = vector.shape_cast %85 : vector<4x8xf32> to vector<4x8x1xf32>
    %87 = tpu.reciprocal %86 {approx = true} : vector<4x8x1xf32> -> vector<4x8x1xf32>
    %88 = vector.broadcast %87 : vector<4x8x1xf32> to vector<4x8x8xf32>
    %89 = arith.mulf %84, %88 : vector<4x8x8xf32>
    %90 = vector.extract_strided_slice %15 {offsets = [0, 0, 24], sizes = [4, 8, 8], strides = [1, 1, 1]} : vector<4x8x32xf32> to vector<4x8x8xf32>
    "tpu.trace_start"() <{level = 10 : i32, message = "bqk,bkd->bqd"}> : () -> ()
    %cst_30 = arith.constant dense<0.000000e+00> : vector<4x8x8xf32>
    %91 = tpu.matmul %89, %90, %cst_30 {dimension_numbers = #tpu.dot_dimension_numbers<[2], [1], [1], [2], [0, 0, 0, 1, 1, 2], [0], [0]>} : vector<4x8x8xf32>, vector<4x8x8xf32>, vector<4x8x8xf32> -> vector<4x8x8xf32>
    "tpu.trace_stop"() : () -> ()
    %92 = tpu.concatenate %34, %53, %72, %91 in 2 : vector<4x8x8xf32>, vector<4x8x8xf32>, vector<4x8x8xf32>, vector<4x8x8xf32> -> vector<4x8x32xf32>
    %93 = vector.shape_cast %92 : vector<4x8x32xf32> to vector<32x32xf32>
    %c0_31 = arith.constant 0 : index
    %c0_32 = arith.constant 0 : index
    %c0_33 = arith.constant 0 : index
    %94 = vector.load %arg5[%c0_31, %c0_32, %c0_33] : memref<2x32x32xf32, #tpu.memory_space<vmem>>, vector<1x32x32xf32>
    %95 = vector.shape_cast %94 : vector<1x32x32xf32> to vector<32x32xf32>
    %cst_34 = arith.constant dense<0.000000e+00> : vector<32x32xf32>
    %96 = tpu.matmul %93, %95, %cst_34 {dimension_numbers = #tpu.dot_dimension_numbers<[1], [0], [0], [1], [0, 0, 1, 1], [], []>} : vector<32x32xf32>, vector<32x32xf32>, vector<32x32xf32> -> vector<32x32xf32>
    %c0_35 = arith.constant 0 : index
    %c0_36 = arith.constant 0 : index
    %c0_37 = arith.constant 0 : index
    %97 = vector.load %arg6[%c0_35, %c0_36, %c0_37] : memref<2x1x32xf32, #tpu.memory_space<vmem>>, vector<1x1x32xf32>
    %98 = vector.shape_cast %97 : vector<1x1x32xf32> to vector<1x32xf32>
    %99 = vector.broadcast %98 : vector<1x32xf32> to vector<32x32xf32>
    %100 = arith.addf %96, %99 : vector<32x32xf32>
    %101 = arith.addf %2, %100 : vector<32x32xf32>
    %cst_38 = arith.constant dense<0.000000e+00> : vector<32xf32>
    %102 = vector.multi_reduction <add>, %101, %cst_38 [1] : vector<32x32xf32> to vector<32xf32>
    %103 = vector.shape_cast %102 : vector<32xf32> to vector<32x1xf32>
    %cst_39 = arith.constant 3.200000e+01 : f32
    %104 = vector.broadcast %cst_39 : f32 to vector<32x1xf32>
    %105 = arith.divf %103, %104 : vector<32x1xf32>
    %106 = vector.broadcast %105 : vector<32x1xf32> to vector<32x32xf32>
    %107 = arith.subf %101, %106 : vector<32x32xf32>
    %108 = arith.mulf %107, %107 : vector<32x32xf32>
    %cst_40 = arith.constant dense<0.000000e+00> : vector<32xf32>
    %109 = vector.multi_reduction <add>, %108, %cst_40 [1] : vector<32x32xf32> to vector<32xf32>
    %110 = vector.shape_cast %109 : vector<32xf32> to vector<32x1xf32>
    %cst_41 = arith.constant 3.200000e+01 : f32
    %111 = vector.broadcast %cst_41 : f32 to vector<32x1xf32>
    %112 = arith.divf %110, %111 : vector<32x1xf32>
    %113 = vector.broadcast %105 : vector<32x1xf32> to vector<32x32xf32>
    %114 = arith.subf %101, %113 : vector<32x32xf32>
    %cst_42 = arith.constant 9.99999974E-6 : f32
    %115 = vector.broadcast %cst_42 : f32 to vector<32x1xf32>
    %116 = arith.addf %112, %115 : vector<32x1xf32>
    %117 = math.rsqrt %116 : vector<32x1xf32>
    %118 = vector.broadcast %117 : vector<32x1xf32> to vector<32x32xf32>
    %119 = arith.mulf %114, %118 : vector<32x32xf32>
    %c0_43 = arith.constant 0 : index
    %c0_44 = arith.constant 0 : index
    %c0_45 = arith.constant 0 : index
    %120 = vector.load %arg7[%c0_43, %c0_44, %c0_45] : memref<2x1x32xf32, #tpu.memory_space<vmem>>, vector<1x1x32xf32>
    %121 = vector.shape_cast %120 : vector<1x1x32xf32> to vector<1x32xf32>
    %122 = vector.broadcast %121 : vector<1x32xf32> to vector<32x32xf32>
    %123 = arith.mulf %119, %122 : vector<32x32xf32>
    %c0_46 = arith.constant 0 : index
    %c0_47 = arith.constant 0 : index
    %c0_48 = arith.constant 0 : index
    %124 = vector.load %arg8[%c0_46, %c0_47, %c0_48] : memref<2x1x32xf32, #tpu.memory_space<vmem>>, vector<1x1x32xf32>
    %125 = vector.shape_cast %124 : vector<1x1x32xf32> to vector<1x32xf32>
    %126 = vector.broadcast %125 : vector<1x32xf32> to vector<32x32xf32>
    %127 = arith.addf %123, %126 : vector<32x32xf32>
    %c0_49 = arith.constant 0 : index
    %c0_50 = arith.constant 0 : index
    %c0_51 = arith.constant 0 : index
    %128 = vector.load %arg9[%c0_49, %c0_50, %c0_51] : memref<2x32x128xf32, #tpu.memory_space<vmem>>, vector<1x32x128xf32>
    %129 = vector.shape_cast %128 : vector<1x32x128xf32> to vector<32x128xf32>
    %cst_52 = arith.constant dense<0.000000e+00> : vector<32x128xf32>
    %130 = tpu.matmul %127, %129, %cst_52 {dimension_numbers = #tpu.dot_dimension_numbers<[1], [0], [0], [1], [0, 0, 1, 1], [], []>} : vector<32x32xf32>, vector<32x128xf32>, vector<32x128xf32> -> vector<32x128xf32>
    %c0_53 = arith.constant 0 : index
    %c0_54 = arith.constant 0 : index
    %c0_55 = arith.constant 0 : index
    %131 = vector.load %arg10[%c0_53, %c0_54, %c0_55] : memref<2x1x128xf32, #tpu.memory_space<vmem>>, vector<1x1x128xf32>
    %132 = vector.shape_cast %131 : vector<1x1x128xf32> to vector<1x128xf32>
    %133 = vector.broadcast %132 : vector<1x128xf32> to vector<32x128xf32>
    %134 = arith.addf %130, %133 : vector<32x128xf32>
    %cst_56 = arith.constant 0.000000e+00 : f32
    %135 = vector.broadcast %cst_56 : f32 to vector<32x128xf32>
    %136 = arith.maximumf %134, %135 : vector<32x128xf32>
    %c0_57 = arith.constant 0 : index
    %c0_58 = arith.constant 0 : index
    %c0_59 = arith.constant 0 : index
    %137 = vector.load %arg11[%c0_57, %c0_58, %c0_59] : memref<2x128x32xf32, #tpu.memory_space<vmem>>, vector<1x128x32xf32>
    %138 = vector.shape_cast %137 : vector<1x128x32xf32> to vector<128x32xf32>
    %cst_60 = arith.constant dense<0.000000e+00> : vector<32x32xf32>
    %139 = tpu.matmul %136, %138, %cst_60 {dimension_numbers = #tpu.dot_dimension_numbers<[1], [0], [0], [1], [0, 0, 1, 1], [], []>} : vector<32x128xf32>, vector<128x32xf32>, vector<32x32xf32> -> vector<32x32xf32>
    %c0_61 = arith.constant 0 : index
    %c0_62 = arith.constant 0 : index
    %c0_63 = arith.constant 0 : index
    %140 = vector.load %arg12[%c0_61, %c0_62, %c0_63] : memref<2x1x32xf32, #tpu.memory_space<vmem>>, vector<1x1x32xf32>
    %141 = vector.shape_cast %140 : vector<1x1x32xf32> to vector<1x32xf32>
    %142 = vector.broadcast %141 : vector<1x32xf32> to vector<32x32xf32>
    %143 = arith.addf %139, %142 : vector<32x32xf32>
    %144 = arith.addf %127, %143 : vector<32x32xf32>
    %cst_64 = arith.constant dense<0.000000e+00> : vector<32xf32>
    %145 = vector.multi_reduction <add>, %144, %cst_64 [1] : vector<32x32xf32> to vector<32xf32>
    %146 = vector.shape_cast %145 : vector<32xf32> to vector<32x1xf32>
    %cst_65 = arith.constant 3.200000e+01 : f32
    %147 = vector.broadcast %cst_65 : f32 to vector<32x1xf32>
    %148 = arith.divf %146, %147 : vector<32x1xf32>
    %149 = vector.broadcast %148 : vector<32x1xf32> to vector<32x32xf32>
    %150 = arith.subf %144, %149 : vector<32x32xf32>
    %151 = arith.mulf %150, %150 : vector<32x32xf32>
    %cst_66 = arith.constant dense<0.000000e+00> : vector<32xf32>
    %152 = vector.multi_reduction <add>, %151, %cst_66 [1] : vector<32x32xf32> to vector<32xf32>
    %153 = vector.shape_cast %152 : vector<32xf32> to vector<32x1xf32>
    %cst_67 = arith.constant 3.200000e+01 : f32
    %154 = vector.broadcast %cst_67 : f32 to vector<32x1xf32>
    %155 = arith.divf %153, %154 : vector<32x1xf32>
    %156 = vector.broadcast %148 : vector<32x1xf32> to vector<32x32xf32>
    %157 = arith.subf %144, %156 : vector<32x32xf32>
    %cst_68 = arith.constant 9.99999974E-6 : f32
    %158 = vector.broadcast %cst_68 : f32 to vector<32x1xf32>
    %159 = arith.addf %155, %158 : vector<32x1xf32>
    %160 = math.rsqrt %159 : vector<32x1xf32>
    %161 = vector.broadcast %160 : vector<32x1xf32> to vector<32x32xf32>
    %162 = arith.mulf %157, %161 : vector<32x32xf32>
    %c0_69 = arith.constant 0 : index
    %c0_70 = arith.constant 0 : index
    %c0_71 = arith.constant 0 : index
    %163 = vector.load %arg13[%c0_69, %c0_70, %c0_71] : memref<2x1x32xf32, #tpu.memory_space<vmem>>, vector<1x1x32xf32>
    %164 = vector.shape_cast %163 : vector<1x1x32xf32> to vector<1x32xf32>
    %165 = vector.broadcast %164 : vector<1x32xf32> to vector<32x32xf32>
    %166 = arith.mulf %162, %165 : vector<32x32xf32>
    %c0_72 = arith.constant 0 : index
    %c0_73 = arith.constant 0 : index
    %c0_74 = arith.constant 0 : index
    %167 = vector.load %arg14[%c0_72, %c0_73, %c0_74] : memref<2x1x32xf32, #tpu.memory_space<vmem>>, vector<1x1x32xf32>
    %168 = vector.shape_cast %167 : vector<1x1x32xf32> to vector<1x32xf32>
    %169 = vector.broadcast %168 : vector<1x32xf32> to vector<32x32xf32>
    %170 = arith.addf %166, %169 : vector<32x32xf32>
    %c1 = arith.constant 1 : index
    %c0_75 = arith.constant 0 : index
    %c0_76 = arith.constant 0 : index
    %171 = vector.load %arg3[%c1, %c0_75, %c0_76] : memref<2x32x96xf32, #tpu.memory_space<vmem>>, vector<1x32x96xf32>
    %172 = vector.shape_cast %171 : vector<1x32x96xf32> to vector<32x96xf32>
    %cst_77 = arith.constant dense<0.000000e+00> : vector<32x96xf32>
    %173 = tpu.matmul %170, %172, %cst_77 {dimension_numbers = #tpu.dot_dimension_numbers<[1], [0], [0], [1], [0, 0, 1, 1], [], []>} : vector<32x32xf32>, vector<32x96xf32>, vector<32x96xf32> -> vector<32x96xf32>
    %c1_78 = arith.constant 1 : index
    %c0_79 = arith.constant 0 : index
    %c0_80 = arith.constant 0 : index
    %174 = vector.load %arg4[%c1_78, %c0_79, %c0_80] : memref<2x1x96xf32, #tpu.memory_space<vmem>>, vector<1x1x96xf32>
    %175 = vector.shape_cast %174 : vector<1x1x96xf32> to vector<1x96xf32>
    %176 = vector.broadcast %175 : vector<1x96xf32> to vector<32x96xf32>
    %177 = arith.addf %173, %176 : vector<32x96xf32>
    %178 = vector.extract_strided_slice %177 {offsets = [0, 0], sizes = [32, 32], strides = [1, 1]} : vector<32x96xf32> to vector<32x32xf32>
    %179 = vector.shape_cast %178 : vector<32x32xf32> to vector<4x8x32xf32>
    %180 = vector.extract_strided_slice %177 {offsets = [0, 32], sizes = [32, 32], strides = [1, 1]} : vector<32x96xf32> to vector<32x32xf32>
    %181 = vector.shape_cast %180 : vector<32x32xf32> to vector<4x8x32xf32>
    %182 = vector.extract_strided_slice %177 {offsets = [0, 64], sizes = [32, 32], strides = [1, 1]} : vector<32x96xf32> to vector<32x32xf32>
    %183 = vector.shape_cast %182 : vector<32x32xf32> to vector<4x8x32xf32>
    %184 = vector.extract_strided_slice %179 {offsets = [0, 0, 0], sizes = [4, 8, 8], strides = [1, 1, 1]} : vector<4x8x32xf32> to vector<4x8x8xf32>
    %185 = vector.extract_strided_slice %181 {offsets = [0, 0, 0], sizes = [4, 8, 8], strides = [1, 1, 1]} : vector<4x8x32xf32> to vector<4x8x8xf32>
    "tpu.trace_start"() <{level = 10 : i32, message = "bqd,bkd->bqk"}> : () -> ()
    %cst_81 = arith.constant dense<0.000000e+00> : vector<4x8x8xf32>
    %186 = tpu.matmul %184, %185, %cst_81 {dimension_numbers = #tpu.dot_dimension_numbers<[2], [2], [1], [1], [0, 0, 0, 1, 1, 1], [0], [0]>} : vector<4x8x8xf32>, vector<4x8x8xf32>, vector<4x8x8xf32> -> vector<4x8x8xf32>
    "tpu.trace_stop"() : () -> ()
    %cst_82 = arith.constant 0.353553385 : f32
    %187 = vector.broadcast %cst_82 : f32 to vector<4x8x8xf32>
    %188 = arith.mulf %186, %187 : vector<4x8x8xf32>
    %189 = vector.broadcast %0 : vector<4x1x8xf32> to vector<4x8x8xf32>
    %190 = arith.addf %188, %189 : vector<4x8x8xf32>
    %cst_83 = arith.constant dense<0xFF800000> : vector<4x8xf32>
    %191 = vector.multi_reduction <maximumf>, %190, %cst_83 [2] : vector<4x8x8xf32> to vector<4x8xf32>
    %192 = vector.shape_cast %191 : vector<4x8xf32> to vector<4x8x1xf32>
    %193 = vector.broadcast %192 : vector<4x8x1xf32> to vector<4x8x8xf32>
    %194 = arith.subf %190, %193 : vector<4x8x8xf32>
    %195 = math.exp %194 : vector<4x8x8xf32>
    %cst_84 = arith.constant dense<0.000000e+00> : vector<4x8xf32>
    %196 = vector.multi_reduction <add>, %195, %cst_84 [2] : vector<4x8x8xf32> to vector<4x8xf32>
    %197 = vector.shape_cast %196 : vector<4x8xf32> to vector<4x8x1xf32>
    %198 = tpu.reciprocal %197 {approx = true} : vector<4x8x1xf32> -> vector<4x8x1xf32>
    %199 = vector.broadcast %198 : vector<4x8x1xf32> to vector<4x8x8xf32>
    %200 = arith.mulf %195, %199 : vector<4x8x8xf32>
    %201 = vector.extract_strided_slice %183 {offsets = [0, 0, 0], sizes = [4, 8, 8], strides = [1, 1, 1]} : vector<4x8x32xf32> to vector<4x8x8xf32>
    "tpu.trace_start"() <{level = 10 : i32, message = "bqk,bkd->bqd"}> : () -> ()
    %cst_85 = arith.constant dense<0.000000e+00> : vector<4x8x8xf32>
    %202 = tpu.matmul %200, %201, %cst_85 {dimension_numbers = #tpu.dot_dimension_numbers<[2], [1], [1], [2], [0, 0, 0, 1, 1, 2], [0], [0]>} : vector<4x8x8xf32>, vector<4x8x8xf32>, vector<4x8x8xf32> -> vector<4x8x8xf32>
    "tpu.trace_stop"() : () -> ()
    %203 = vector.extract_strided_slice %179 {offsets = [0, 0, 8], sizes = [4, 8, 8], strides = [1, 1, 1]} : vector<4x8x32xf32> to vector<4x8x8xf32>
    %204 = vector.extract_strided_slice %181 {offsets = [0, 0, 8], sizes = [4, 8, 8], strides = [1, 1, 1]} : vector<4x8x32xf32> to vector<4x8x8xf32>
    "tpu.trace_start"() <{level = 10 : i32, message = "bqd,bkd->bqk"}> : () -> ()
    %cst_86 = arith.constant dense<0.000000e+00> : vector<4x8x8xf32>
    %205 = tpu.matmul %203, %204, %cst_86 {dimension_numbers = #tpu.dot_dimension_numbers<[2], [2], [1], [1], [0, 0, 0, 1, 1, 1], [0], [0]>} : vector<4x8x8xf32>, vector<4x8x8xf32>, vector<4x8x8xf32> -> vector<4x8x8xf32>
    "tpu.trace_stop"() : () -> ()
    %cst_87 = arith.constant 0.353553385 : f32
    %206 = vector.broadcast %cst_87 : f32 to vector<4x8x8xf32>
    %207 = arith.mulf %205, %206 : vector<4x8x8xf32>
    %208 = vector.broadcast %0 : vector<4x1x8xf32> to vector<4x8x8xf32>
    %209 = arith.addf %207, %208 : vector<4x8x8xf32>
    %cst_88 = arith.constant dense<0xFF800000> : vector<4x8xf32>
    %210 = vector.multi_reduction <maximumf>, %209, %cst_88 [2] : vector<4x8x8xf32> to vector<4x8xf32>
    %211 = vector.shape_cast %210 : vector<4x8xf32> to vector<4x8x1xf32>
    %212 = vector.broadcast %211 : vector<4x8x1xf32> to vector<4x8x8xf32>
    %213 = arith.subf %209, %212 : vector<4x8x8xf32>
    %214 = math.exp %213 : vector<4x8x8xf32>
    %cst_89 = arith.constant dense<0.000000e+00> : vector<4x8xf32>
    %215 = vector.multi_reduction <add>, %214, %cst_89 [2] : vector<4x8x8xf32> to vector<4x8xf32>
    %216 = vector.shape_cast %215 : vector<4x8xf32> to vector<4x8x1xf32>
    %217 = tpu.reciprocal %216 {approx = true} : vector<4x8x1xf32> -> vector<4x8x1xf32>
    %218 = vector.broadcast %217 : vector<4x8x1xf32> to vector<4x8x8xf32>
    %219 = arith.mulf %214, %218 : vector<4x8x8xf32>
    %220 = vector.extract_strided_slice %183 {offsets = [0, 0, 8], sizes = [4, 8, 8], strides = [1, 1, 1]} : vector<4x8x32xf32> to vector<4x8x8xf32>
    "tpu.trace_start"() <{level = 10 : i32, message = "bqk,bkd->bqd"}> : () -> ()
    %cst_90 = arith.constant dense<0.000000e+00> : vector<4x8x8xf32>
    %221 = tpu.matmul %219, %220, %cst_90 {dimension_numbers = #tpu.dot_dimension_numbers<[2], [1], [1], [2], [0, 0, 0, 1, 1, 2], [0], [0]>} : vector<4x8x8xf32>, vector<4x8x8xf32>, vector<4x8x8xf32> -> vector<4x8x8xf32>
    "tpu.trace_stop"() : () -> ()
    %222 = vector.extract_strided_slice %179 {offsets = [0, 0, 16], sizes = [4, 8, 8], strides = [1, 1, 1]} : vector<4x8x32xf32> to vector<4x8x8xf32>
    %223 = vector.extract_strided_slice %181 {offsets = [0, 0, 16], sizes = [4, 8, 8], strides = [1, 1, 1]} : vector<4x8x32xf32> to vector<4x8x8xf32>
    "tpu.trace_start"() <{level = 10 : i32, message = "bqd,bkd->bqk"}> : () -> ()
    %cst_91 = arith.constant dense<0.000000e+00> : vector<4x8x8xf32>
    %224 = tpu.matmul %222, %223, %cst_91 {dimension_numbers = #tpu.dot_dimension_numbers<[2], [2], [1], [1], [0, 0, 0, 1, 1, 1], [0], [0]>} : vector<4x8x8xf32>, vector<4x8x8xf32>, vector<4x8x8xf32> -> vector<4x8x8xf32>
    "tpu.trace_stop"() : () -> ()
    %cst_92 = arith.constant 0.353553385 : f32
    %225 = vector.broadcast %cst_92 : f32 to vector<4x8x8xf32>
    %226 = arith.mulf %224, %225 : vector<4x8x8xf32>
    %227 = vector.broadcast %0 : vector<4x1x8xf32> to vector<4x8x8xf32>
    %228 = arith.addf %226, %227 : vector<4x8x8xf32>
    %cst_93 = arith.constant dense<0xFF800000> : vector<4x8xf32>
    %229 = vector.multi_reduction <maximumf>, %228, %cst_93 [2] : vector<4x8x8xf32> to vector<4x8xf32>
    %230 = vector.shape_cast %229 : vector<4x8xf32> to vector<4x8x1xf32>
    %231 = vector.broadcast %230 : vector<4x8x1xf32> to vector<4x8x8xf32>
    %232 = arith.subf %228, %231 : vector<4x8x8xf32>
    %233 = math.exp %232 : vector<4x8x8xf32>
    %cst_94 = arith.constant dense<0.000000e+00> : vector<4x8xf32>
    %234 = vector.multi_reduction <add>, %233, %cst_94 [2] : vector<4x8x8xf32> to vector<4x8xf32>
    %235 = vector.shape_cast %234 : vector<4x8xf32> to vector<4x8x1xf32>
    %236 = tpu.reciprocal %235 {approx = true} : vector<4x8x1xf32> -> vector<4x8x1xf32>
    %237 = vector.broadcast %236 : vector<4x8x1xf32> to vector<4x8x8xf32>
    %238 = arith.mulf %233, %237 : vector<4x8x8xf32>
    %239 = vector.extract_strided_slice %183 {offsets = [0, 0, 16], sizes = [4, 8, 8], strides = [1, 1, 1]} : vector<4x8x32xf32> to vector<4x8x8xf32>
    "tpu.trace_start"() <{level = 10 : i32, message = "bqk,bkd->bqd"}> : () -> ()
    %cst_95 = arith.constant dense<0.000000e+00> : vector<4x8x8xf32>
    %240 = tpu.matmul %238, %239, %cst_95 {dimension_numbers = #tpu.dot_dimension_numbers<[2], [1], [1], [2], [0, 0, 0, 1, 1, 2], [0], [0]>} : vector<4x8x8xf32>, vector<4x8x8xf32>, vector<4x8x8xf32> -> vector<4x8x8xf32>
    "tpu.trace_stop"() : () -> ()
    %241 = vector.extract_strided_slice %179 {offsets = [0, 0, 24], sizes = [4, 8, 8], strides = [1, 1, 1]} : vector<4x8x32xf32> to vector<4x8x8xf32>
    %242 = vector.extract_strided_slice %181 {offsets = [0, 0, 24], sizes = [4, 8, 8], strides = [1, 1, 1]} : vector<4x8x32xf32> to vector<4x8x8xf32>
    "tpu.trace_start"() <{level = 10 : i32, message = "bqd,bkd->bqk"}> : () -> ()
    %cst_96 = arith.constant dense<0.000000e+00> : vector<4x8x8xf32>
    %243 = tpu.matmul %241, %242, %cst_96 {dimension_numbers = #tpu.dot_dimension_numbers<[2], [2], [1], [1], [0, 0, 0, 1, 1, 1], [0], [0]>} : vector<4x8x8xf32>, vector<4x8x8xf32>, vector<4x8x8xf32> -> vector<4x8x8xf32>
    "tpu.trace_stop"() : () -> ()
    %cst_97 = arith.constant 0.353553385 : f32
    %244 = vector.broadcast %cst_97 : f32 to vector<4x8x8xf32>
    %245 = arith.mulf %243, %244 : vector<4x8x8xf32>
    %246 = vector.broadcast %0 : vector<4x1x8xf32> to vector<4x8x8xf32>
    %247 = arith.addf %245, %246 : vector<4x8x8xf32>
    %cst_98 = arith.constant dense<0xFF800000> : vector<4x8xf32>
    %248 = vector.multi_reduction <maximumf>, %247, %cst_98 [2] : vector<4x8x8xf32> to vector<4x8xf32>
    %249 = vector.shape_cast %248 : vector<4x8xf32> to vector<4x8x1xf32>
    %250 = vector.broadcast %249 : vector<4x8x1xf32> to vector<4x8x8xf32>
    %251 = arith.subf %247, %250 : vector<4x8x8xf32>
    %252 = math.exp %251 : vector<4x8x8xf32>
    %cst_99 = arith.constant dense<0.000000e+00> : vector<4x8xf32>
    %253 = vector.multi_reduction <add>, %252, %cst_99 [2] : vector<4x8x8xf32> to vector<4x8xf32>
    %254 = vector.shape_cast %253 : vector<4x8xf32> to vector<4x8x1xf32>
    %255 = tpu.reciprocal %254 {approx = true} : vector<4x8x1xf32> -> vector<4x8x1xf32>
    %256 = vector.broadcast %255 : vector<4x8x1xf32> to vector<4x8x8xf32>
    %257 = arith.mulf %252, %256 : vector<4x8x8xf32>
    %258 = vector.extract_strided_slice %183 {offsets = [0, 0, 24], sizes = [4, 8, 8], strides = [1, 1, 1]} : vector<4x8x32xf32> to vector<4x8x8xf32>
    "tpu.trace_start"() <{level = 10 : i32, message = "bqk,bkd->bqd"}> : () -> ()
    %cst_100 = arith.constant dense<0.000000e+00> : vector<4x8x8xf32>
    %259 = tpu.matmul %257, %258, %cst_100 {dimension_numbers = #tpu.dot_dimension_numbers<[2], [1], [1], [2], [0, 0, 0, 1, 1, 2], [0], [0]>} : vector<4x8x8xf32>, vector<4x8x8xf32>, vector<4x8x8xf32> -> vector<4x8x8xf32>
    "tpu.trace_stop"() : () -> ()
    %260 = tpu.concatenate %202, %221, %240, %259 in 2 : vector<4x8x8xf32>, vector<4x8x8xf32>, vector<4x8x8xf32>, vector<4x8x8xf32> -> vector<4x8x32xf32>
    %261 = vector.shape_cast %260 : vector<4x8x32xf32> to vector<32x32xf32>
    %c1_101 = arith.constant 1 : index
    %c0_102 = arith.constant 0 : index
    %c0_103 = arith.constant 0 : index
    %262 = vector.load %arg5[%c1_101, %c0_102, %c0_103] : memref<2x32x32xf32, #tpu.memory_space<vmem>>, vector<1x32x32xf32>
    %263 = vector.shape_cast %262 : vector<1x32x32xf32> to vector<32x32xf32>
    %cst_104 = arith.constant dense<0.000000e+00> : vector<32x32xf32>
    %264 = tpu.matmul %261, %263, %cst_104 {dimension_numbers = #tpu.dot_dimension_numbers<[1], [0], [0], [1], [0, 0, 1, 1], [], []>} : vector<32x32xf32>, vector<32x32xf32>, vector<32x32xf32> -> vector<32x32xf32>
    %c1_105 = arith.constant 1 : index
    %c0_106 = arith.constant 0 : index
    %c0_107 = arith.constant 0 : index
    %265 = vector.load %arg6[%c1_105, %c0_106, %c0_107] : memref<2x1x32xf32, #tpu.memory_space<vmem>>, vector<1x1x32xf32>
    %266 = vector.shape_cast %265 : vector<1x1x32xf32> to vector<1x32xf32>
    %267 = vector.broadcast %266 : vector<1x32xf32> to vector<32x32xf32>
    %268 = arith.addf %264, %267 : vector<32x32xf32>
    %269 = arith.addf %170, %268 : vector<32x32xf32>
    %cst_108 = arith.constant dense<0.000000e+00> : vector<32xf32>
    %270 = vector.multi_reduction <add>, %269, %cst_108 [1] : vector<32x32xf32> to vector<32xf32>
    %271 = vector.shape_cast %270 : vector<32xf32> to vector<32x1xf32>
    %cst_109 = arith.constant 3.200000e+01 : f32
    %272 = vector.broadcast %cst_109 : f32 to vector<32x1xf32>
    %273 = arith.divf %271, %272 : vector<32x1xf32>
    %274 = vector.broadcast %273 : vector<32x1xf32> to vector<32x32xf32>
    %275 = arith.subf %269, %274 : vector<32x32xf32>
    %276 = arith.mulf %275, %275 : vector<32x32xf32>
    %cst_110 = arith.constant dense<0.000000e+00> : vector<32xf32>
    %277 = vector.multi_reduction <add>, %276, %cst_110 [1] : vector<32x32xf32> to vector<32xf32>
    %278 = vector.shape_cast %277 : vector<32xf32> to vector<32x1xf32>
    %cst_111 = arith.constant 3.200000e+01 : f32
    %279 = vector.broadcast %cst_111 : f32 to vector<32x1xf32>
    %280 = arith.divf %278, %279 : vector<32x1xf32>
    %281 = vector.broadcast %273 : vector<32x1xf32> to vector<32x32xf32>
    %282 = arith.subf %269, %281 : vector<32x32xf32>
    %cst_112 = arith.constant 9.99999974E-6 : f32
    %283 = vector.broadcast %cst_112 : f32 to vector<32x1xf32>
    %284 = arith.addf %280, %283 : vector<32x1xf32>
    %285 = math.rsqrt %284 : vector<32x1xf32>
    %286 = vector.broadcast %285 : vector<32x1xf32> to vector<32x32xf32>
    %287 = arith.mulf %282, %286 : vector<32x32xf32>
    %c1_113 = arith.constant 1 : index
    %c0_114 = arith.constant 0 : index
    %c0_115 = arith.constant 0 : index
    %288 = vector.load %arg7[%c1_113, %c0_114, %c0_115] : memref<2x1x32xf32, #tpu.memory_space<vmem>>, vector<1x1x32xf32>
    %289 = vector.shape_cast %288 : vector<1x1x32xf32> to vector<1x32xf32>
    %290 = vector.broadcast %289 : vector<1x32xf32> to vector<32x32xf32>
    %291 = arith.mulf %287, %290 : vector<32x32xf32>
    %c1_116 = arith.constant 1 : index
    %c0_117 = arith.constant 0 : index
    %c0_118 = arith.constant 0 : index
    %292 = vector.load %arg8[%c1_116, %c0_117, %c0_118] : memref<2x1x32xf32, #tpu.memory_space<vmem>>, vector<1x1x32xf32>
    %293 = vector.shape_cast %292 : vector<1x1x32xf32> to vector<1x32xf32>
    %294 = vector.broadcast %293 : vector<1x32xf32> to vector<32x32xf32>
    %295 = arith.addf %291, %294 : vector<32x32xf32>
    %c1_119 = arith.constant 1 : index
    %c0_120 = arith.constant 0 : index
    %c0_121 = arith.constant 0 : index
    %296 = vector.load %arg9[%c1_119, %c0_120, %c0_121] : memref<2x32x128xf32, #tpu.memory_space<vmem>>, vector<1x32x128xf32>
    %297 = vector.shape_cast %296 : vector<1x32x128xf32> to vector<32x128xf32>
    %cst_122 = arith.constant dense<0.000000e+00> : vector<32x128xf32>
    %298 = tpu.matmul %295, %297, %cst_122 {dimension_numbers = #tpu.dot_dimension_numbers<[1], [0], [0], [1], [0, 0, 1, 1], [], []>} : vector<32x32xf32>, vector<32x128xf32>, vector<32x128xf32> -> vector<32x128xf32>
    %c1_123 = arith.constant 1 : index
    %c0_124 = arith.constant 0 : index
    %c0_125 = arith.constant 0 : index
    %299 = vector.load %arg10[%c1_123, %c0_124, %c0_125] : memref<2x1x128xf32, #tpu.memory_space<vmem>>, vector<1x1x128xf32>
    %300 = vector.shape_cast %299 : vector<1x1x128xf32> to vector<1x128xf32>
    %301 = vector.broadcast %300 : vector<1x128xf32> to vector<32x128xf32>
    %302 = arith.addf %298, %301 : vector<32x128xf32>
    %cst_126 = arith.constant 0.000000e+00 : f32
    %303 = vector.broadcast %cst_126 : f32 to vector<32x128xf32>
    %304 = arith.maximumf %302, %303 : vector<32x128xf32>
    %c1_127 = arith.constant 1 : index
    %c0_128 = arith.constant 0 : index
    %c0_129 = arith.constant 0 : index
    %305 = vector.load %arg11[%c1_127, %c0_128, %c0_129] : memref<2x128x32xf32, #tpu.memory_space<vmem>>, vector<1x128x32xf32>
    %306 = vector.shape_cast %305 : vector<1x128x32xf32> to vector<128x32xf32>
    %cst_130 = arith.constant dense<0.000000e+00> : vector<32x32xf32>
    %307 = tpu.matmul %304, %306, %cst_130 {dimension_numbers = #tpu.dot_dimension_numbers<[1], [0], [0], [1], [0, 0, 1, 1], [], []>} : vector<32x128xf32>, vector<128x32xf32>, vector<32x32xf32> -> vector<32x32xf32>
    %c1_131 = arith.constant 1 : index
    %c0_132 = arith.constant 0 : index
    %c0_133 = arith.constant 0 : index
    %308 = vector.load %arg12[%c1_131, %c0_132, %c0_133] : memref<2x1x32xf32, #tpu.memory_space<vmem>>, vector<1x1x32xf32>
    %309 = vector.shape_cast %308 : vector<1x1x32xf32> to vector<1x32xf32>
    %310 = vector.broadcast %309 : vector<1x32xf32> to vector<32x32xf32>
    %311 = arith.addf %307, %310 : vector<32x32xf32>
    %312 = arith.addf %295, %311 : vector<32x32xf32>
    %cst_134 = arith.constant dense<0.000000e+00> : vector<32xf32>
    %313 = vector.multi_reduction <add>, %312, %cst_134 [1] : vector<32x32xf32> to vector<32xf32>
    %314 = vector.shape_cast %313 : vector<32xf32> to vector<32x1xf32>
    %cst_135 = arith.constant 3.200000e+01 : f32
    %315 = vector.broadcast %cst_135 : f32 to vector<32x1xf32>
    %316 = arith.divf %314, %315 : vector<32x1xf32>
    %317 = vector.broadcast %316 : vector<32x1xf32> to vector<32x32xf32>
    %318 = arith.subf %312, %317 : vector<32x32xf32>
    %319 = arith.mulf %318, %318 : vector<32x32xf32>
    %cst_136 = arith.constant dense<0.000000e+00> : vector<32xf32>
    %320 = vector.multi_reduction <add>, %319, %cst_136 [1] : vector<32x32xf32> to vector<32xf32>
    %321 = vector.shape_cast %320 : vector<32xf32> to vector<32x1xf32>
    %cst_137 = arith.constant 3.200000e+01 : f32
    %322 = vector.broadcast %cst_137 : f32 to vector<32x1xf32>
    %323 = arith.divf %321, %322 : vector<32x1xf32>
    %324 = vector.broadcast %316 : vector<32x1xf32> to vector<32x32xf32>
    %325 = arith.subf %312, %324 : vector<32x32xf32>
    %cst_138 = arith.constant 9.99999974E-6 : f32
    %326 = vector.broadcast %cst_138 : f32 to vector<32x1xf32>
    %327 = arith.addf %323, %326 : vector<32x1xf32>
    %328 = math.rsqrt %327 : vector<32x1xf32>
    %329 = vector.broadcast %328 : vector<32x1xf32> to vector<32x32xf32>
    %330 = arith.mulf %325, %329 : vector<32x32xf32>
    %c1_139 = arith.constant 1 : index
    %c0_140 = arith.constant 0 : index
    %c0_141 = arith.constant 0 : index
    %331 = vector.load %arg13[%c1_139, %c0_140, %c0_141] : memref<2x1x32xf32, #tpu.memory_space<vmem>>, vector<1x1x32xf32>
    %332 = vector.shape_cast %331 : vector<1x1x32xf32> to vector<1x32xf32>
    %333 = vector.broadcast %332 : vector<1x32xf32> to vector<32x32xf32>
    %334 = arith.mulf %330, %333 : vector<32x32xf32>
    %c1_142 = arith.constant 1 : index
    %c0_143 = arith.constant 0 : index
    %c0_144 = arith.constant 0 : index
    %335 = vector.load %arg14[%c1_142, %c0_143, %c0_144] : memref<2x1x32xf32, #tpu.memory_space<vmem>>, vector<1x1x32xf32>
    %336 = vector.shape_cast %335 : vector<1x1x32xf32> to vector<1x32xf32>
    %337 = vector.broadcast %336 : vector<1x32xf32> to vector<32x32xf32>
    %338 = arith.addf %334, %337 : vector<32x32xf32>
    %339 = vector.shape_cast %338 : vector<32x32xf32> to vector<4x8x32xf32>
    %c0_145 = arith.constant 0 : index
    %c0_146 = arith.constant 0 : index
    %c0_147 = arith.constant 0 : index
    %340 = vector.load %arg15[%c0_145, %c0_146, %c0_147] : memref<4x8x32xf32, #tpu.memory_space<vmem>>, vector<4x8x32xf32>
    tpu.vector_store %arg15[%c0_145, %c0_146, %c0_147], %339 {strides = array<i32>} : memref<4x8x32xf32, #tpu.memory_space<vmem>>, vector<4x8x32xf32>,
    return
  }
  func.func @transform_0(%arg0: i32) -> (i32, i32, i32) {
    %c0_i32 = arith.constant 0 : i32
    %c0_i32_0 = arith.constant 0 : i32
    %c0_i32_1 = arith.constant 0 : i32
    return %arg0, %c0_i32, %c0_i32_0 : i32, i32, i32
  }
  func.func @transform_1(%arg0: i32) -> (i32, i32, i32) {
    %c0_i32 = arith.constant 0 : i32
    %c0_i32_0 = arith.constant 0 : i32
    %c0_i32_1 = arith.constant 0 : i32
    return %arg0, %c0_i32, %c0_i32_0 : i32, i32, i32
  }
  func.func @transform_2(%arg0: i32) -> (i32, i32, i32) {
    %c0_i32 = arith.constant 0 : i32
    %c0_i32_0 = arith.constant 0 : i32
    %c0_i32_1 = arith.constant 0 : i32
    %c0_i32_2 = arith.constant 0 : i32
    return %c0_i32, %c0_i32_0, %c0_i32_1 : i32, i32, i32
  }
  func.func @transform_3(%arg0: i32) -> (i32, i32, i32) {
    %c0_i32 = arith.constant 0 : i32
    %c0_i32_0 = arith.constant 0 : i32
    %c0_i32_1 = arith.constant 0 : i32
    %c0_i32_2 = arith.constant 0 : i32
    return %c0_i32, %c0_i32_0, %c0_i32_1 : i32, i32, i32
  }
  func.func @transform_4(%arg0: i32) -> (i32, i32, i32) {
    %c0_i32 = arith.constant 0 : i32
    %c0_i32_0 = arith.constant 0 : i32
    %c0_i32_1 = arith.constant 0 : i32
    %c0_i32_2 = arith.constant 0 : i32
    return %c0_i32, %c0_i32_0, %c0_i32_1 : i32, i32, i32
  }
  func.func @transform_5(%arg0: i32) -> (i32, i32, i32) {
    %c0_i32 = arith.constant 0 : i32
    %c0_i32_0 = arith.constant 0 : i32
    %c0_i32_1 = arith.constant 0 : i32
    %c0_i32_2 = arith.constant 0 : i32
    return %c0_i32, %c0_i32_0, %c0_i32_1 : i32, i32, i32
  }
  func.func @transform_6(%arg0: i32) -> (i32, i32, i32) {
    %c0_i32 = arith.constant 0 : i32
    %c0_i32_0 = arith.constant 0 : i32
    %c0_i32_1 = arith.constant 0 : i32
    %c0_i32_2 = arith.constant 0 : i32
    return %c0_i32, %c0_i32_0, %c0_i32_1 : i32, i32, i32
  }
  func.func @transform_7(%arg0: i32) -> (i32, i32, i32) {
    %c0_i32 = arith.constant 0 : i32
    %c0_i32_0 = arith.constant 0 : i32
    %c0_i32_1 = arith.constant 0 : i32
    %c0_i32_2 = arith.constant 0 : i32
    return %c0_i32, %c0_i32_0, %c0_i32_1 : i32, i32, i32
  }
  func.func @transform_8(%arg0: i32) -> (i32, i32, i32) {
    %c0_i32 = arith.constant 0 : i32
    %c0_i32_0 = arith.constant 0 : i32
    %c0_i32_1 = arith.constant 0 : i32
    %c0_i32_2 = arith.constant 0 : i32
    return %c0_i32, %c0_i32_0, %c0_i32_1 : i32, i32, i32
  }
  func.func @transform_9(%arg0: i32) -> (i32, i32, i32) {
    %c0_i32 = arith.constant 0 : i32
    %c0_i32_0 = arith.constant 0 : i32
    %c0_i32_1 = arith.constant 0 : i32
    %c0_i32_2 = arith.constant 0 : i32
    return %c0_i32, %c0_i32_0, %c0_i32_1 : i32, i32, i32
  }
  func.func @transform_10(%arg0: i32) -> (i32, i32, i32) {
    %c0_i32 = arith.constant 0 : i32
    %c0_i32_0 = arith.constant 0 : i32
    %c0_i32_1 = arith.constant 0 : i32
    %c0_i32_2 = arith.constant 0 : i32
    return %c0_i32, %c0_i32_0, %c0_i32_1 : i32, i32, i32
  }
  func.func @transform_11(%arg0: i32) -> (i32, i32, i32) {
    %c0_i32 = arith.constant 0 : i32
    %c0_i32_0 = arith.constant 0 : i32
    %c0_i32_1 = arith.constant 0 : i32
    %c0_i32_2 = arith.constant 0 : i32
    return %c0_i32, %c0_i32_0, %c0_i32_1 : i32, i32, i32
  }
  func.func @transform_12(%arg0: i32) -> (i32, i32, i32) {
    %c0_i32 = arith.constant 0 : i32
    %c0_i32_0 = arith.constant 0 : i32
    %c0_i32_1 = arith.constant 0 : i32
    %c0_i32_2 = arith.constant 0 : i32
    return %c0_i32, %c0_i32_0, %c0_i32_1 : i32, i32, i32
  }
  func.func @transform_13(%arg0: i32) -> (i32, i32, i32) {
    %c0_i32 = arith.constant 0 : i32
    %c0_i32_0 = arith.constant 0 : i32
    %c0_i32_1 = arith.constant 0 : i32
    %c0_i32_2 = arith.constant 0 : i32
    return %c0_i32, %c0_i32_0, %c0_i32_1 : i32, i32, i32
  }
  func.func @transform_14(%arg0: i32) -> (i32, i32, i32) {
    %c0_i32 = arith.constant 0 : i32
    %c0_i32_0 = arith.constant 0 : i32
    %c0_i32_1 = arith.constant 0 : i32
    return %arg0, %c0_i32, %c0_i32_0 : i32, i32, i32
  }
}

</mosaic_0001>

<bundles_post_ra>
// kernel: tpu_custom_call.1
= control target key start
LH: loop header
LB: loop body
LE: loop exit
PB: predicated region body
PF: predicated region fallthrough
CT: control target
= control target key end

     0   :  { %vm67_vm0 = vcmask 261120   ;;  %s9034_s0 = inlined_call_operand.vmem [shape: f32[4,8,32], index: 0, kind: input, shape index: {}]   ;;  %s9035_s1 = inlined_call_operand.vmem [shape: f32[4,1,8], index: 1, kind: input, shape index: {}]   ;;  %s9036_s2 = inlined_call_operand.vmem [shape: f32[2,32,96], index: 2, kind: input, shape index: {}]   ;;  %s9037_s3 = inlined_call_operand.vmem [shape: f32[2,1,96], index: 3, kind: input, shape index: {}]   ;;  %s9038_s4 = inlined_call_operand.vmem [shape: f32[2,32,32], index: 4, kind: input, shape index: {}]   ;;  %s9039_s5 = inlined_call_operand.vmem [shape: f32[2,1,32], index: 5, kind: input, shape index: {}]   ;;  %s9040_s6 = inlined_call_operand.vmem [shape: f32[2,1,32], index: 6, kind: input, shape index: {}]   ;;  %s9041_s7 = inlined_call_operand.vmem [shape: f32[2,1,32], index: 7, kind: input, shape index: {}]   ;;  %s9042_s8 = inlined_call_operand.vmem [shape: f32[2,32,128], index: 8, kind: input, shape index: {}]   ;;  %s9043_s9 = inlined_call_operand.vmem [shape: f32[2,1,128], index: 9, kind: input, shape index: {}]   ;;  %s9044_s10 = inlined_call_operand.vmem [shape: f32[2,128,32], index: 10, kind: input, shape index: {}]   ;;  %s9045_s11 = inlined_call_operand.vmem [shape: f32[2,1,32], index: 11, kind: input, shape index: {}]   ;;  %s9046_s12 = inlined_call_operand.vmem [shape: f32[2,1,32], index: 12, kind: input, shape index: {}]   ;;  %s9047_s13 = inlined_call_operand.vmem [shape: f32[2,1,32], index: 13, kind: input, shape index: {}]   ;;  %s9048_s14 = inlined_call_operand.hbm [shape: f32[4,8,32], index: 14, kind: output, shape index: {}]  }
   0x1   :  { %v59_v0 = vld [vmem:[%s9036_s2 + $0x18] sm:$0xff]  ;;  %v58_v1 = vld [vmem:[%s9036_s2 + $0x10] sm:$0xff]  ;;  %v52_v2 = vld [vmem:[%s9034_s0] sm:$0xff] }
   0x2   :  { %7149 = vmatprep.subr.mxu0 %v59_v0  ;;  %v57_v3 = vld [vmem:[%s9036_s2 + $0x8] sm:$0xff]  ;;  %7157 = vmatprep.mubr.msk.f32.mxu0 %vm67_vm0, %v52_v2 }
   0x3   :  { %7150 = vmatpush3.msra.mxu0 %v59_v0 }
   0x4   :  { %19 = vsyncpa [#allocation3], 0  ;;  %7151 = vmatprep.subr.mxu0 %v58_v1  ;;  %v56_v4 = vld [vmem:[%s9036_s2] sm:$0xff]  ;;  %v53_v5 = vld [vmem:[%s9034_s0 + $0x8] sm:$0xff]  ;;  %v7837_v8 = vmov 0.0   ;;  %vm7838_vm1 = vmmov 0  }
   0x5   :  { %7152 = vmatpush3.msra.mxu0 %v58_v1  ;;  %v54_v6 = vld [vmem:[%s9034_s0 + $0x10] sm:$0xff]  ;;  %v55_v7 = vld [vmem:[%s9034_s0 + $0x18] sm:$0xff]  ;;  %7168 = vmatprep.subr.mxu1 %v7837_v8  ;;  %v6757_v10 = vld [vmem:[%s9037_s3] ss:$0 sm:$0xff]  ;;  %s7839_s15 = smov 96   ;;  %vm168_vm2 = vcmask 64512  }
   0x6   :  { %7153 = vmatprep.subr.mxu0 %v57_v3  ;;  %7170 = vmatprep.mubr.msk.f32.mxu1 %vm7838_vm1, %v7837_v8  ;;  %v8010_v23 = vld [vmem:[%s9035_s1] ss:$0 sm:$0xff]  ;;  %v8016_v28 = vld [vmem:[%s9035_s1 + $0x1] ss:$0 sm:$0xff]  ;;  %v8023_v35 = vld [vmem:[%s9035_s1 + $0x2] ss:$0 sm:$0xff] }
   0x7   :  { %7154 = vmatpush3.msra.mxu0 %v57_v3  ;;  %v8029_v41 = vld [vmem:[%s9035_s1 + $0x3] ss:$0 sm:$0xff]  ;;  %s7840_s24 = smov 64   ;;  %s7841_s25 = smov 88   ;;  %vm2910_vm3 = vcmask 130048   ;;  %vm2915_vm4 = vcmask 195584  }
   0x8   :  { %7155 = vmatprep.subr.mxu0 %v56_v4  ;;  %s7842_s26 = smov 120   ;;  %s7843_s27 = smov 56  }
   0x9   :  { %7156 = vmatpush3.msra.mxu0 %v56_v4  ;;  %s7844_s28 = smov 80   ;;  %s7845_s29 = smov 112  }
   0xa   :  { %7158 = vmatmul.mubr.msk.f32.vlgmr.msra.gmra.mxu0 %vm67_vm0, %v53_v5  ;;  %7163 = vmatprep.subr.mxu0 %v7837_v8  ;;  %s9057_s30 = smov 48   ;;  %s9055_s16 = smov 72  }
   0xb   :  { %7160 = vmatprep.mubr.msk.f32.mxu0 %vm67_vm0, %v54_v6  ;;  %s9053_s17 = smov 104   ;;  %s9051_s18 = smov 40  }
   0xc   :  { %s9049_s19 = smov 8   ;;  %s7851_s20 = smov 16  }
   0xd   :  { %s7852_s21 = smov 24  }
   0xe   :  { %7161 = vmatmul.mubr.msk.f32.gmra.mxu0 %vm67_vm0, %v55_v7 }
   0xf   :  { %7165 = vmatprep.mubr.msk.f32.mxu0 %vm7838_vm1, %v7837_v8 }
  0xca   :  { %v7159_v9 = vpop.f32.mrf.mxu0 }
  0xcb   :  { %v7971_v15 = vadd.f32 %v7159_v9, %v6757_v10 }
  0xcc   :  { %v146_v11 = vpop.f32.mrf.mxu0 }
  0xcd   :  { %v7967_v12 = vadd.f32 %v6757_v10, %v146_v11 }
  0xce   :  { %v7162_v13 = vpop.f32.mrf.mxu0 }
  0xcf   :  { %166 = vrot.lane.b32.xlu0 %v7967_v12, %s7839_s15  ;;  %v7979_v17 = vadd.f32 %v7162_v13, %v6757_v10 }
  0xd0   :  { %v156_v14 = vpop.f32.mrf.mxu0 }
  0xd1   :  { %v7973_v16 = vadd.f32 %v6757_v10, %v156_v14 }
  0xd3   :  { %321 = vrot.lane.b32.xlu1 %v7973_v16, %s7839_s15  ;;  %244 = vrot.lane.b32.xlu0 %v7971_v15, %s7839_s15 }
  0xd7   :  { %398 = vrot.lane.b32.xlu1 %v7979_v17, %s7839_s15 }
 0x141   :  { %v167_v18 = vpop.permute.xlu0 %166 }
 0x142   :  { %7164 = vmatpush3.xpose.msk.msra.mxu0 %vm168_vm2, %v167_v18 }
 0x143   :  { %7178 = vmatprep.subr.mxu0 %v7837_v8 }
 0x145   :  { %v322_v19 = vpop.permute.xlu1 %321  ;;  %7166 = vmatmul.mubr.msk.f32.vlgmr.msra.gmra.mxu0 %vm168_vm2, %v7967_v12  ;;  %v245_v20 = vpop.permute.xlu0 %244 }
 0x146   :  { %7169 = vmatpush3.xpose.msk.msra.mxu1 %vm168_vm2, %v245_v20  ;;  %7180 = vmatprep.mubr.msk.f32.mxu0 %vm7838_vm1, %v7837_v8 }
 0x147   :  { %7173 = vmatprep.subr.mxu1 %v7837_v8 }
 0x149   :  { %v399_v21 = vpop.permute.xlu1 %398  ;;  %7171 = vmatmul.mubr.msk.f32.vlgmr.msra.gmra.mxu1 %vm168_vm2, %v7971_v15 }
 0x14a   :  { %7174 = vmatpush3.xpose.msk.msra.mxu1 %vm168_vm2, %v322_v19  ;;  %7179 = vmatpush3.xpose.msk.msra.mxu0 %vm168_vm2, %v399_v21 }
 0x14b   :  { %7175 = vmatprep.mubr.msk.f32.mxu1 %vm7838_vm1, %v7837_v8  ;;  %7183 = vmatprep.subr.mxu1 %v7837_v8 }
 0x14c   :  { %7188 = vmatprep.subr.mxu0 %v7837_v8 }
 0x14d   :  { %7176 = vmatmul.mubr.msk.f32.vlgmr.msra.gmra.mxu1 %vm168_vm2, %v7973_v16  ;;  %7181 = vmatmul.mubr.msk.f32.vlgmr.msra.gmra.mxu0 %vm168_vm2, %v7979_v17 }
 0x14e   :  { %7185 = vmatprep.mubr.msk.f32.mxu1 %vm7838_vm1, %v7837_v8  ;;  %7190 = vmatprep.mubr.msk.f32.mxu0 %vm7838_vm1, %v7837_v8 }
 0x205   :  { %v239_v22 = vpop.f32.mrf.mxu0 }
 0x206   :  { %v474_v24 = vmul.f32 0.35355338, %v239_v22 }
 0x207   :  { %v7167_v25 = vpop.f32.mrf.mxu0 }
 0x208   :  { %v502_v26 = vadd.f32 %v8010_v23, %v474_v24 }
 0x209   :  { %v316_v27 = vpop.f32.mrf.mxu1 }
 0x20a   :  { %v475_v29 = vmul.f32 0.35355338, %v316_v27  ;;  %v506_v30 = vsel %vm168_vm2, %v502_v26, -inf }
 0x20b   :  { %v7172_v31 = vpop.f32.mrf.mxu1  ;;  %507 = vmax.xlane.f32.xlu0 %v506_v30 }
 0x20c   :  { %v503_v32 = vadd.f32 %v8016_v28, %v475_v29 }
 0x20d   :  { %v393_v33 = vpop.f32.mrf.mxu1  ;;  %v470_v34 = vpop.f32.mrf.mxu0 }
 0x20e   :  { %v476_v36 = vmul.f32 0.35355338, %v393_v33  ;;  %v477_v37 = vmul.f32 0.35355338, %v470_v34  ;;  %v509_v38 = vsel %vm168_vm2, %v503_v32, -inf }
 0x20f   :  { %v7177_v39 = vpop.f32.mrf.mxu1  ;;  %v7182_v40 = vpop.f32.mrf.mxu0  ;;  %510 = vmax.xlane.f32.xlu1 %v509_v38 }
 0x210   :  { %v504_v42 = vadd.f32 %v8023_v35, %v476_v36  ;;  %v505_v44 = vadd.f32 %v8029_v41, %v477_v37 }
 0x212   :  { %v512_v43 = vsel %vm168_vm2, %v504_v42, -inf  ;;  %v515_v45 = vsel %vm168_vm2, %v505_v44, -inf }
 0x213   :  { %513 = vmax.xlane.f32.xlu0 %v512_v43 }
 0x217   :  { %516 = vmax.xlane.f32.xlu0 %v515_v45 }
 0x220   :  { %550 = vrot.lane.b32.xlu1 %v7967_v12, %s7840_s24 }
 0x224   :  { %702 = vrot.lane.b32.xlu1 %v7973_v16, %s7840_s24 }
 0x228   :  { %778 = vrot.lane.b32.xlu1 %v7979_v17, %s7840_s24 }
 0x22c   :  { %934 = vrot.lane.b32.xlu1 %v7971_v15, %s7841_s25 }
 0x22d   :  { %626 = vrot.lane.b32.xlu0 %v7971_v15, %s7840_s24 }
 0x230   :  { %932 = vrot.lane.b32.xlu1 %v7971_v15, %s7842_s26 }
 0x231   :  { %856 = vrot.lane.b32.xlu0 %v7967_v12, %s7841_s25 }
 0x235   :  { %854 = vrot.lane.b32.xlu0 %v7967_v12, %s7842_s26 }
 0x294   :  { %v508_v46 = vpop.xlane.xlu0 %507 }
 0x295   :  { %v518_v47 = vsub.f32 %v502_v26, %v508_v46 }
 0x297   :  { %v522_v48 = vmul.f32 1.442695, %v518_v47 }
 0x298   :  { %v511_v49 = vpop.xlane.xlu1 %510 }
 0x299   :  { %7647 = vpow2.f32 %v522_v48  ;;  %v519_v50 = vsub.f32 %v503_v32, %v511_v49 }
 0x29b   :  { %v524_v51 = vmul.f32 1.442695, %v519_v50 }
 0x29c   :  { %v551_v52 = vpop.permute.xlu1 %550  ;;  %v514_v53 = vpop.xlane.xlu0 %513 }
 0x29d   :  { %7649 = vpow2.f32 %v524_v51  ;;  %v520_v54 = vsub.f32 %v504_v42, %v514_v53  ;;  %7184 = vmatpush3.msra.mxu1 %v551_v52 }
 0x29e   :  { %7193 = vmatprep.subr.mxu1 %v7837_v8 }
 0x29f   :  { %v526_v55 = vmul.f32 1.442695, %v520_v54 }
 0x2a0   :  { %v517_v56 = vpop.xlane.xlu0 %516  ;;  %v703_v4 = vpop.permute.xlu1 %702 }
 0x2a1   :  { %7651 = vpow2.f32 %v526_v55  ;;  %v521_v57 = vsub.f32 %v505_v44, %v517_v56 }
 0x2a3   :  { %v528_v58 = vmul.f32 1.442695, %v521_v57 }
 0x2a4   :  { %v627_v59 = vpop.permute.xlu0 %626  ;;  %v779_v5 = vpop.permute.xlu1 %778 }
 0x2a5   :  { %7653 = vpow2.f32 %v528_v58  ;;  %7189 = vmatpush3.msra.mxu0 %v627_v59 }
 0x2a6   :  { %v7648_v60 = vpop.eup %7647  ;;  %7198 = vmatprep.subr.mxu0 %v7837_v8 }
 0x2a7   :  { %v530_v61 = vsel %vm168_vm2, %v7648_v60, 0.0 }
 0x2a8   :  { %531 = vadd.xlane.f32.xlu1 %v530_v61  ;;  %v935_v6 = vpop.permute.xlu1 %934  ;;  %v857_v7 = vpop.permute.xlu0 %856 }
 0x2aa   :  { %v7650_v62 = vpop.eup %7649 }
 0x2ab   :  { %v533_v63 = vsel %vm168_vm2, %v7650_v62, 0.0 }
 0x2ac   :  { %534 = vadd.xlane.f32.xlu0 %v533_v63  ;;  %v933_v9 = vpop.permute.xlu1 %932  ;;  %v855_v10 = vpop.permute.xlu0 %854 }
 0x2ae   :  { %v7652_v0 = vpop.eup %7651 }
 0x2af   :  { %v536_v1 = vsel %vm168_vm2, %v7652_v0, 0.0 }
 0x2b0   :  { %537 = vadd.xlane.f32.xlu1 %v536_v1 }
 0x2b2   :  { %v7654_v2 = vpop.eup %7653 }
 0x2b3   :  { %v539_v3 = vsel %vm168_vm2, %v7654_v2, 0.0 }
 0x2b4   :  { %540 = vadd.xlane.f32.xlu0 %v539_v3 }
 0x2c1   :  { %1090 = vrot.lane.b32.xlu1 %v7979_v17, %s7841_s25 }
 0x2c5   :  { %1088 = vrot.lane.b32.xlu1 %v7979_v17, %s7842_s26 }
 0x2ca   :  { %1012 = vrot.lane.b32.xlu0 %v7973_v16, %s7841_s25 }
 0x2ce   :  { %1010 = vrot.lane.b32.xlu0 %v7973_v16, %s7842_s26 }
 0x331   :  { %v532_v11 = vpop.xlane.xlu1 %531 }
 0x332   :  { %7655 = vrcp.f32 %v532_v11 }
 0x335   :  { %v535_v13 = vpop.xlane.xlu0 %534 }
 0x336   :  { %7657 = vrcp.f32 %v535_v13 }
 0x339   :  { %v538_v14 = vpop.xlane.xlu1 %537 }
 0x33a   :  { %7659 = vrcp.f32 %v538_v14 }
 0x33d   :  { %v541_v18 = vpop.xlane.xlu0 %540  ;;  %v1091_v30 = vpop.permute.xlu1 %1090 }
 0x33e   :  { %7661 = vrcp.f32 %v541_v18 }
 0x33f   :  { %v7656_v19 = vpop.eup %7655 }
 0x340   :  { %v546_v20 = vmul.f32 %v7656_v19, %v7648_v60 }
 0x341   :  { %v1013_v27 = vpop.permute.xlu0 %1012  ;;  %v1089_v32 = vpop.permute.xlu1 %1088 }
 0x342   :  { %7186 = vmatmul.mubr.msk.f32.vlgmr.msra.gmra.mxu1 %vm168_vm2, %v546_v20 }
 0x343   :  { %v7658_v21 = vpop.eup %7657  ;;  %7194 = vmatpush3.msra.mxu1 %v703_v4  ;;  %7195 = vmatprep.mubr.msk.f32.mxu1 %vm7838_vm1, %v7837_v8 }
 0x344   :  { %v547_v22 = vmul.f32 %v7658_v21, %v7650_v62  ;;  %7203 = vmatprep.subr.mxu1 %v7837_v8 }
 0x345   :  { %v1011_v31 = vpop.permute.xlu0 %1010 }
 0x346   :  { %7191 = vmatmul.mubr.msk.f32.vlgmr.msra.gmra.mxu0 %vm168_vm2, %v547_v22 }
 0x347   :  { %v7660_v24 = vpop.eup %7659  ;;  %7199 = vmatpush3.msra.mxu0 %v779_v5  ;;  %7200 = vmatprep.mubr.msk.f32.mxu0 %vm7838_vm1, %v7837_v8 }
 0x348   :  { %v548_v25 = vmul.f32 %v7660_v24, %v7652_v0  ;;  %7208 = vmatprep.subr.mxu0 %v7837_v8 }
 0x34a   :  { %7196 = vmatmul.mubr.msk.f32.vlgmr.msra.gmra.mxu1 %vm168_vm2, %v548_v25 }
 0x34b   :  { %v7662_v26 = vpop.eup %7661  ;;  %7204 = vmatpush3.xpose.msk.msra.mxu1 %vm168_vm2, %v857_v7  ;;  %7205 = vmatprep.mubr.msk.f32.mxu1 %vm7838_vm1, %v7837_v8 }
 0x34c   :  { %7213 = vmatprep.subr.mxu1 %v7837_v8  ;;  %v549_v29 = vmul.f32 %v7662_v26, %v7654_v2 }
 0x34e   :  { %7201 = vmatmul.mubr.msk.f32.vlgmr.msra.gmra.mxu0 %vm168_vm2, %v549_v29  ;;  %7206 = vmatmul.mubr.msk.f32.vlgmr.msra.gmra.mxu1 %vm168_vm2, %v855_v10 }
 0x34f   :  { %7209 = vmatpush3.xpose.msk.msra.mxu0 %vm168_vm2, %v935_v6  ;;  %7214 = vmatpush3.xpose.msk.msra.mxu1 %vm168_vm2, %v1013_v27 }
 0x350   :  { %7210 = vmatprep.mubr.msk.f32.mxu0 %vm7838_vm1, %v7837_v8  ;;  %7215 = vmatprep.mubr.msk.f32.mxu1 %vm7838_vm1, %v7837_v8 }
 0x351   :  { %7218 = vmatprep.subr.mxu0 %v7837_v8  ;;  %7223 = vmatprep.subr.mxu1 %v7837_v8 }
 0x352   :  { %7211 = vmatmul.mubr.msk.f32.vlgmr.msra.gmra.mxu0 %vm168_vm2, %v933_v9  ;;  %7216 = vmatmul.mubr.msk.f32.vlgmr.msra.gmra.mxu1 %vm168_vm2, %v1011_v31 }
 0x353   :  { %7219 = vmatpush3.xpose.msk.msra.mxu0 %vm168_vm2, %v1091_v30  ;;  %7220 = vmatprep.mubr.msk.f32.mxu0 %vm7838_vm1, %v7837_v8 }
 0x354   :  { %7228 = vmatprep.subr.mxu0 %v7837_v8  ;;  %7225 = vmatprep.mubr.msk.f32.mxu1 %vm7838_vm1, %v7837_v8 }
 0x356   :  { %7221 = vmatmul.mubr.msk.f32.vlgmr.msra.gmra.mxu0 %vm168_vm2, %v1089_v32 }
 0x357   :  { %7230 = vmatprep.mubr.msk.f32.mxu0 %vm7838_vm1, %v7837_v8 }
 0x402   :  { %v8099_v33 = vpop.f32.mrf.mxu1 }
 0x404   :  { %v7187_v34 = vpop.f32.mrf.mxu1 }
 0x406   :  { %v8101_v36 = vpop.f32.mrf.mxu0 }
 0x408   :  { %v7192_v37 = vpop.f32.mrf.mxu0 }
 0x40a   :  { %v8103_v38 = vpop.f32.mrf.mxu1 }
 0x40c   :  { %v7197_v39 = vpop.f32.mrf.mxu1 }
 0x40e   :  { %v8105_v40 = vpop.f32.mrf.mxu0  ;;  %v928_v42 = vpop.f32.mrf.mxu1 }
 0x40f   :  { %v1166_v43 = vmul.f32 0.35355338, %v928_v42 }
 0x410   :  { %v7202_v44 = vpop.f32.mrf.mxu0  ;;  %v7207_v45 = vpop.f32.mrf.mxu1 }
 0x411   :  { %v1170_v46 = vadd.f32 %v8010_v23, %v1166_v43 }
 0x412   :  { %v1006_v47 = vpop.f32.mrf.mxu0  ;;  %v1084_v48 = vpop.f32.mrf.mxu1 }
 0x413   :  { %v1167_v49 = vmul.f32 0.35355338, %v1006_v47  ;;  %v1168_v50 = vmul.f32 0.35355338, %v1084_v48  ;;  %v1174_v51 = vsel %vm168_vm2, %v1170_v46, -inf }
 0x414   :  { %1175 = vmax.xlane.f32.xlu0 %v1174_v51  ;;  %v7212_v52 = vpop.f32.mrf.mxu0  ;;  %v7217_v53 = vpop.f32.mrf.mxu1 }
 0x415   :  { %v1171_v54 = vadd.f32 %v8016_v28, %v1167_v49  ;;  %v1172_v55 = vadd.f32 %v8023_v35, %v1168_v50 }
 0x416   :  { %v1162_v56 = vpop.f32.mrf.mxu0 }
 0x417   :  { %v1169_v57 = vmul.f32 0.35355338, %v1162_v56  ;;  %v1177_v58 = vsel %vm168_vm2, %v1171_v54, -inf  ;;  %v1180_v59 = vsel %vm168_vm2, %v1172_v55, -inf }
 0x418   :  { %1178 = vmax.xlane.f32.xlu1 %v1177_v58  ;;  %v7222_v60 = vpop.f32.mrf.mxu0  ;;  %1181 = vmax.xlane.f32.xlu0 %v1180_v59 }
 0x419   :  { %v1173_v61 = vadd.f32 %v8029_v41, %v1169_v57 }
 0x41b   :  { %v1183_v62 = vsel %vm168_vm2, %v1173_v61, -inf }
 0x41c   :  { %1184 = vmax.xlane.f32.xlu0 %v1183_v62 }
 0x429   :  { %1218 = vrot.lane.b32.xlu1 %v7967_v12, %s7843_s27 }
 0x42d   :  { %1370 = vrot.lane.b32.xlu1 %v7973_v16, %s7843_s27 }
 0x431   :  { %1446 = vrot.lane.b32.xlu1 %v7979_v17, %s7843_s27 }
 0x432   :  { %1294 = vrot.lane.b32.xlu0 %v7971_v15, %s7843_s27 }
 0x435   :  { %1602 = vrot.lane.b32.xlu1 %v7971_v15, %s7844_s28 }
 0x436   :  { %1524 = vrot.lane.b32.xlu0 %v7967_v12, %s7844_s28 }
 0x439   :  { %1600 = vrot.lane.b32.xlu1 %v7971_v15, %s7845_s29 }
 0x43a   :  { %1522 = vrot.lane.b32.xlu0 %v7967_v12, %s7845_s29 }
 0x49d   :  { %v1176_v63 = vpop.xlane.xlu0 %1175 }
 0x49e   :  { %v1186_v0 = vsub.f32 %v1170_v46, %v1176_v63 }
 0x4a0   :  { %v1190_v1 = vmul.f32 1.442695, %v1186_v0 }
 0x4a1   :  { %v1179_v2 = vpop.xlane.xlu1 %1178  ;;  %v1182_v3 = vpop.xlane.xlu0 %1181 }
 0x4a2   :  { %7663 = vpow2.f32 %v1190_v1  ;;  %v1187_v4 = vsub.f32 %v1171_v54, %v1179_v2  ;;  %v1188_v5 = vsub.f32 %v1172_v55, %v1182_v3 }
 0x4a4   :  { %v1192_v6 = vmul.f32 1.442695, %v1187_v4  ;;  %v1194_v7 = vmul.f32 1.442695, %v1188_v5 }
 0x4a5   :  { %v1219_v9 = vpop.permute.xlu1 %1218  ;;  %v1185_v10 = vpop.xlane.xlu0 %1184 }
 0x4a6   :  { %7665 = vpow2.f32 %v1192_v6  ;;  %v1189_v11 = vsub.f32 %v1173_v61, %v1185_v10  ;;  %7224 = vmatpush3.msra.mxu1 %v1219_v9 }
 0x4a7   :  { %7667 = vpow2.f32 %v1194_v7  ;;  %7233 = vmatprep.subr.mxu1 %v7837_v8 }
 0x4a8   :  { %v1196_v13 = vmul.f32 1.442695, %v1189_v11 }
 0x4a9   :  { %v1295_v14 = vpop.permute.xlu0 %1294  ;;  %v1371_v27 = vpop.permute.xlu1 %1370 }
 0x4aa   :  { %7669 = vpow2.f32 %v1196_v13  ;;  %7229 = vmatpush3.msra.mxu0 %v1295_v14 }
 0x4ab   :  { %7238 = vmatprep.subr.mxu0 %v7837_v8 }
 0x4ad   :  { %v1447_v29 = vpop.permute.xlu1 %1446  ;;  %v1525_v31 = vpop.permute.xlu0 %1524 }
 0x4af   :  { %v7664_v18 = vpop.eup %7663 }
 0x4b0   :  { %v1198_v19 = vsel %vm168_vm2, %v7664_v18, 0.0 }
 0x4b1   :  { %1199 = vadd.xlane.f32.xlu1 %v1198_v19  ;;  %v1603_v30 = vpop.permute.xlu1 %1602  ;;  %v1523_v34 = vpop.permute.xlu0 %1522 }
 0x4b3   :  { %v7666_v20 = vpop.eup %7665 }
 0x4b4   :  { %v7668_v21 = vpop.eup %7667  ;;  %v1201_v22 = vsel %vm168_vm2, %v7666_v20, 0.0 }
 0x4b5   :  { %1202 = vadd.xlane.f32.xlu0 %v1201_v22  ;;  %v1204_v24 = vsel %vm168_vm2, %v7668_v21, 0.0  ;;  %v1601_v32 = vpop.permute.xlu1 %1600 }
 0x4b6   :  { %1205 = vadd.xlane.f32.xlu1 %v1204_v24 }
 0x4b7   :  { %v7670_v25 = vpop.eup %7669 }
 0x4b8   :  { %v1207_v26 = vsel %vm168_vm2, %v7670_v25, 0.0 }
 0x4b9   :  { %1208 = vadd.xlane.f32.xlu0 %v1207_v26 }
 0x4c7   :  { %1758 = vrot.lane.b32.xlu1 %v7979_v17, %s7844_s28 }
 0x4cb   :  { %1756 = vrot.lane.b32.xlu1 %v7979_v17, %s7845_s29 }
 0x4cf   :  { %1680 = vrot.lane.b32.xlu0 %v7973_v16, %s7844_s28 }
 0x4d3   :  { %1678 = vrot.lane.b32.xlu0 %v7973_v16, %s7845_s29 }
 0x53a   :  { %v1200_v37 = vpop.xlane.xlu1 %1199 }
 0x53b   :  { %7671 = vrcp.f32 %v1200_v37 }
 0x53e   :  { %v1203_v39 = vpop.xlane.xlu0 %1202 }
 0x53f   :  { %v1206_v42 = vpop.xlane.xlu1 %1205  ;;  %7673 = vrcp.f32 %v1203_v39 }
 0x540   :  { %7675 = vrcp.f32 %v1206_v42 }
 0x542   :  { %v1209_v43 = vpop.xlane.xlu0 %1208 }
 0x543   :  { %7677 = vrcp.f32 %v1209_v43  ;;  %v1759_v53 = vpop.permute.xlu1 %1758 }
 0x546   :  { %v1681_v51 = vpop.permute.xlu0 %1680 }
 0x547   :  { %v1757_v55 = vpop.permute.xlu1 %1756 }
 0x548   :  { %v7672_v44 = vpop.eup %7671 }
 0x549   :  { %v1214_v45 = vmul.f32 %v7672_v44, %v7664_v18 }
 0x54a   :  { %v1679_v54 = vpop.permute.xlu0 %1678 }
 0x54b   :  { %7226 = vmatmul.mubr.msk.f32.vlgmr.msra.gmra.mxu1 %vm168_vm2, %v1214_v45 }
 0x54c   :  { %v7674_v46 = vpop.eup %7673  ;;  %7234 = vmatpush3.msra.mxu1 %v1371_v27  ;;  %7235 = vmatprep.mubr.msk.f32.mxu1 %vm7838_vm1, %v7837_v8 }
 0x54d   :  { %v7676_v47 = vpop.eup %7675  ;;  %7243 = vmatprep.subr.mxu1 %v7837_v8  ;;  %v1215_v48 = vmul.f32 %v7674_v46, %v7666_v20 }
 0x54e   :  { %v1216_v49 = vmul.f32 %v7676_v47, %v7668_v21 }
 0x54f   :  { %7231 = vmatmul.mubr.msk.f32.vlgmr.msra.gmra.mxu0 %vm168_vm2, %v1215_v48 }
 0x550   :  { %v7678_v50 = vpop.eup %7677  ;;  %7236 = vmatmul.mubr.msk.f32.vlgmr.msra.gmra.mxu1 %vm168_vm2, %v1216_v49  ;;  %7239 = vmatpush3.msra.mxu0 %v1447_v29 }
 0x551   :  { %7244 = vmatpush3.xpose.msk.msra.mxu1 %vm168_vm2, %v1525_v31  ;;  %7240 = vmatprep.mubr.msk.f32.mxu0 %vm7838_vm1, %v7837_v8  ;;  %v1217_v52 = vmul.f32 %v7678_v50, %v7670_v25 }
 0x552   :  { %7245 = vmatprep.mubr.msk.f32.mxu1 %vm7838_vm1, %v7837_v8  ;;  %7248 = vmatprep.subr.mxu0 %v7837_v8 }
 0x553   :  { %7253 = vmatprep.subr.mxu1 %v7837_v8  ;;  %7241 = vmatmul.mubr.msk.f32.vlgmr.msra.gmra.mxu0 %vm168_vm2, %v1217_v52 }
 0x554   :  { %7246 = vmatmul.mubr.msk.f32.vlgmr.msra.gmra.mxu1 %vm168_vm2, %v1523_v34  ;;  %7249 = vmatpush3.xpose.msk.msra.mxu0 %vm168_vm2, %v1603_v30 }
 0x555   :  { %7254 = vmatpush3.xpose.msk.msra.mxu1 %vm168_vm2, %v1681_v51  ;;  %7250 = vmatprep.mubr.msk.f32.mxu0 %vm7838_vm1, %v7837_v8 }
 0x556   :  { %7255 = vmatprep.mubr.msk.f32.mxu1 %vm7838_vm1, %v7837_v8  ;;  %7258 = vmatprep.subr.mxu0 %v7837_v8 }
 0x557   :  { %7251 = vmatmul.mubr.msk.f32.vlgmr.msra.gmra.mxu0 %vm168_vm2, %v1601_v32  ;;  %7263 = vmatprep.subr.mxu1 %v7837_v8 }
 0x558   :  { %7256 = vmatmul.mubr.msk.f32.vlgmr.msra.gmra.mxu1 %vm168_vm2, %v1679_v54  ;;  %7259 = vmatpush3.xpose.msk.msra.mxu0 %vm168_vm2, %v1759_v53 }
 0x559   :  { %7260 = vmatprep.mubr.msk.f32.mxu0 %vm7838_vm1, %v7837_v8  ;;  %7268 = vmatprep.subr.mxu0 %v7837_v8 }
 0x55a   :  { %7265 = vmatprep.mubr.msk.f32.mxu1 %vm7838_vm1, %v7837_v8 }
 0x55b   :  { %7261 = vmatmul.mubr.msk.f32.vlgmr.msra.gmra.mxu0 %vm168_vm2, %v1757_v55 }
 0x55c   :  { %7270 = vmatprep.mubr.msk.f32.mxu0 %vm7838_vm1, %v7837_v8 }
 0x60b   :  { %v8179_v56 = vpop.f32.mrf.mxu1 }
 0x60d   :  { %v7227_v57 = vpop.f32.mrf.mxu1 }
 0x60f   :  { %v8181_v58 = vpop.f32.mrf.mxu0 }
 0x610   :  { %v8183_v59 = vpop.f32.mrf.mxu1 }
 0x611   :  { %v7232_v60 = vpop.f32.mrf.mxu0 }
 0x612   :  { %v7237_v61 = vpop.f32.mrf.mxu1 }
 0x613   :  { %v8185_v62 = vpop.f32.mrf.mxu0 }
 0x614   :  { %v1596_v63 = vpop.f32.mrf.mxu1 }
 0x615   :  { %v1834_v0 = vmul.f32 0.35355338, %v1596_v63  ;;  %v7242_v1 = vpop.f32.mrf.mxu0 }
 0x616   :  { %v7247_v2 = vpop.f32.mrf.mxu1 }
 0x617   :  { %v1674_v3 = vpop.f32.mrf.mxu0  ;;  %v1838_v4 = vadd.f32 %v8010_v23, %v1834_v0 }
 0x618   :  { %v1835_v5 = vmul.f32 0.35355338, %v1674_v3  ;;  %v1752_v6 = vpop.f32.mrf.mxu1 }
 0x619   :  { %v1836_v7 = vmul.f32 0.35355338, %v1752_v6  ;;  %v1842_v9 = vsel %vm168_vm2, %v1838_v4, -inf  ;;  %v7252_v10 = vpop.f32.mrf.mxu0 }
 0x61a   :  { %1843 = vmax.xlane.f32.xlu0 %v1842_v9  ;;  %v7257_v11 = vpop.f32.mrf.mxu1  ;;  %v1839_v13 = vadd.f32 %v8016_v28, %v1835_v5 }
 0x61b   :  { %v1830_v14 = vpop.f32.mrf.mxu0  ;;  %v1840_v18 = vadd.f32 %v8023_v35, %v1836_v7 }
 0x61c   :  { %v1837_v19 = vmul.f32 0.35355338, %v1830_v14  ;;  %v1845_v20 = vsel %vm168_vm2, %v1839_v13, -inf }
 0x61d   :  { %1846 = vmax.xlane.f32.xlu1 %v1845_v20  ;;  %v7262_v21 = vpop.f32.mrf.mxu0  ;;  %v1848_v22 = vsel %vm168_vm2, %v1840_v18, -inf }
 0x61e   :  { %1849 = vmax.xlane.f32.xlu0 %v1848_v22  ;;  %v1841_v24 = vadd.f32 %v8029_v41, %v1837_v19 }
 0x620   :  { %v1851_v25 = vsel %vm168_vm2, %v1841_v24, -inf }
 0x622   :  { %1852 = vmax.xlane.f32.xlu0 %v1851_v25 }
 0x62e   :  { %1886 = vrot.lane.b32.xlu1 %v7967_v12, %s9057_s30 }
 0x632   :  { %2038 = vrot.lane.b32.xlu1 %v7973_v16, %s9057_s30 }
 0x636   :  { %2114 = vrot.lane.b32.xlu1 %v7979_v17, %s9057_s30 }
 0x638   :  { %1962 = vrot.lane.b32.xlu0 %v7971_v15, %s9057_s30 }
 0x63a   :  { %2270 = vrot.lane.b32.xlu1 %v7971_v15, %s9055_s16 }
 0x63c   :  { %2192 = vrot.lane.b32.xlu0 %v7967_v12, %s9055_s16 }
 0x6a3   :  { %v1844_v26 = vpop.xlane.xlu0 %1843 }
 0x6a4   :  { %v1854_v27 = vsub.f32 %v1838_v4, %v1844_v26 }
 0x6a6   :  { %v1858_v29 = vmul.f32 1.442695, %v1854_v27  ;;  %v1847_v30 = vpop.xlane.xlu1 %1846 }
 0x6a7   :  { %v1855_v31 = vsub.f32 %v1839_v13, %v1847_v30  ;;  %v1850_v32 = vpop.xlane.xlu0 %1849 }
 0x6a8   :  { %7679 = vpow2.f32 %v1858_v29  ;;  %v1856_v34 = vsub.f32 %v1840_v18, %v1850_v32 }
 0x6a9   :  { %v1860_v37 = vmul.f32 1.442695, %v1855_v31 }
 0x6aa   :  { %v1862_v39 = vmul.f32 1.442695, %v1856_v34  ;;  %v1887_v42 = vpop.permute.xlu1 %1886 }
 0x6ab   :  { %7681 = vpow2.f32 %v1860_v37  ;;  %v1853_v43 = vpop.xlane.xlu0 %1852  ;;  %7264 = vmatpush3.msra.mxu1 %v1887_v42 }
 0x6ac   :  { %7683 = vpow2.f32 %v1862_v39  ;;  %v1857_v44 = vsub.f32 %v1841_v24, %v1853_v43  ;;  %7273 = vmatprep.subr.mxu1 %v7837_v8 }
 0x6ae   :  { %v1864_v45 = vmul.f32 1.442695, %v1857_v44  ;;  %v2039_v55 = vpop.permute.xlu1 %2038 }
 0x6af   :  { %v1963_v46 = vpop.permute.xlu0 %1962 }
 0x6b0   :  { %7685 = vpow2.f32 %v1864_v45  ;;  %7269 = vmatpush3.msra.mxu0 %v1963_v46 }
 0x6b1   :  { %7278 = vmatprep.subr.mxu0 %v7837_v8 }
 0x6b2   :  { %v2115_v57 = vpop.permute.xlu1 %2114 }
 0x6b3   :  { %v2193_v61 = vpop.permute.xlu0 %2192 }
 0x6b5   :  { %v7680_v47 = vpop.eup %7679 }
 0x6b6   :  { %v1866_v48 = vsel %vm168_vm2, %v7680_v47, 0.0  ;;  %v2271_v60 = vpop.permute.xlu1 %2270 }
 0x6b7   :  { %1867 = vadd.xlane.f32.xlu1 %v1866_v48 }
 0x6b8   :  { %v7682_v49 = vpop.eup %7681 }
 0x6b9   :  { %v7684_v50 = vpop.eup %7683  ;;  %v1869_v51 = vsel %vm168_vm2, %v7682_v49, 0.0 }
 0x6ba   :  { %1870 = vadd.xlane.f32.xlu0 %v1869_v51  ;;  %v1872_v52 = vsel %vm168_vm2, %v7684_v50, 0.0 }
 0x6bb   :  { %1873 = vadd.xlane.f32.xlu1 %v1872_v52 }
 0x6bd   :  { %v7686_v53 = vpop.eup %7685 }
 0x6be   :  { %v1875_v54 = vsel %vm168_vm2, %v7686_v53, 0.0 }
 0x6bf   :  { %1876 = vadd.xlane.f32.xlu0 %v1875_v54 }
 0x6cc   :  { %2268 = vrot.lane.b32.xlu1 %v7971_v15, %s9053_s17 }
 0x6d0   :  { %2426 = vrot.lane.b32.xlu1 %v7979_v17, %s9055_s16 }
 0x6d4   :  { %2424 = vrot.lane.b32.xlu1 %v7979_v17, %s9053_s17 }
 0x6d5   :  { %2190 = vrot.lane.b32.xlu0 %v7967_v12, %s9053_s17 }
 0x6d9   :  { %2348 = vrot.lane.b32.xlu0 %v7973_v16, %s9055_s16 }
 0x6dd   :  { %2346 = vrot.lane.b32.xlu0 %v7973_v16, %s9053_s17 }
 0x740   :  { %v1868_v63 = vpop.xlane.xlu1 %1867 }
 0x741   :  { %7687 = vrcp.f32 %v1868_v63 }
 0x743   :  { %v1871_v0 = vpop.xlane.xlu0 %1870 }
 0x744   :  { %v1874_v1 = vpop.xlane.xlu1 %1873  ;;  %7689 = vrcp.f32 %v1871_v0 }
 0x745   :  { %7691 = vrcp.f32 %v1874_v1 }
 0x748   :  { %v1877_v2 = vpop.xlane.xlu0 %1876  ;;  %v2269_v11 = vpop.permute.xlu1 %2268 }
 0x749   :  { %7693 = vrcp.f32 %v1877_v2 }
 0x74c   :  { %v2191_v5 = vpop.permute.xlu0 %2190  ;;  %v2427_v19 = vpop.permute.xlu1 %2426 }
 0x74e   :  { %v7688_v3 = vpop.eup %7687 }
 0x74f   :  { %v1882_v4 = vmul.f32 %v7688_v3, %v7680_v47 }
 0x750   :  { %v2349_v14 = vpop.permute.xlu0 %2348  ;;  %v2425_v21 = vpop.permute.xlu1 %2424 }
 0x751   :  { %v7690_v6 = vpop.eup %7689  ;;  %7266 = vmatmul.mubr.msk.f32.vlgmr.msra.gmra.mxu1 %vm168_vm2, %v1882_v4 }
 0x752   :  { %v7692_v7 = vpop.eup %7691  ;;  %7274 = vmatpush3.msra.mxu1 %v2039_v55  ;;  %7275 = vmatprep.mubr.msk.f32.mxu1 %vm7838_vm1, %v7837_v8  ;;  %v1883_v9 = vmul.f32 %v7690_v6, %v7682_v49 }
 0x753   :  { %7283 = vmatprep.subr.mxu1 %v7837_v8  ;;  %v1884_v10 = vmul.f32 %v7692_v7, %v7684_v50 }
 0x754   :  { %7271 = vmatmul.mubr.msk.f32.vlgmr.msra.gmra.mxu0 %vm168_vm2, %v1883_v9  ;;  %v2347_v20 = vpop.permute.xlu0 %2346 }
 0x755   :  { %7276 = vmatmul.mubr.msk.f32.vlgmr.msra.gmra.mxu1 %vm168_vm2, %v1884_v10  ;;  %7279 = vmatpush3.msra.mxu0 %v2115_v57 }
 0x756   :  { %v7694_v13 = vpop.eup %7693  ;;  %7284 = vmatpush3.xpose.msk.msra.mxu1 %vm168_vm2, %v2193_v61  ;;  %7280 = vmatprep.mubr.msk.f32.mxu0 %vm7838_vm1, %v7837_v8 }
 0x757   :  { %7285 = vmatprep.mubr.msk.f32.mxu1 %vm7838_vm1, %v7837_v8  ;;  %7288 = vmatprep.subr.mxu0 %v7837_v8  ;;  %v1885_v18 = vmul.f32 %v7694_v13, %v7686_v53 }
 0x758   :  { %7293 = vmatprep.subr.mxu1 %v7837_v8 }
 0x759   :  { %7281 = vmatmul.mubr.msk.f32.vlgmr.msra.gmra.mxu0 %vm168_vm2, %v1885_v18  ;;  %7286 = vmatmul.mubr.msk.f32.vlgmr.msra.gmra.mxu1 %vm168_vm2, %v2191_v5 }
 0x75a   :  { %7289 = vmatpush3.xpose.msk.msra.mxu0 %vm168_vm2, %v2271_v60  ;;  %7294 = vmatpush3.xpose.msk.msra.mxu1 %vm168_vm2, %v2349_v14 }
 0x75b   :  { %7290 = vmatprep.mubr.msk.f32.mxu0 %vm7838_vm1, %v7837_v8  ;;  %7295 = vmatprep.mubr.msk.f32.mxu1 %vm7838_vm1, %v7837_v8 }
 0x75c   :  { %7298 = vmatprep.subr.mxu0 %v7837_v8  ;;  %7303 = vmatprep.subr.mxu1 %v7837_v8 }
 0x75d   :  { %7291 = vmatmul.mubr.msk.f32.vlgmr.msra.gmra.mxu0 %vm168_vm2, %v2269_v11  ;;  %7296 = vmatmul.mubr.msk.f32.vlgmr.msra.gmra.mxu1 %vm168_vm2, %v2347_v20 }
 0x75e   :  { %7299 = vmatpush3.xpose.msk.msra.mxu0 %vm168_vm2, %v2427_v19  ;;  %7300 = vmatprep.mubr.msk.f32.mxu0 %vm7838_vm1, %v7837_v8 }
 0x75f   :  { %7308 = vmatprep.subr.mxu0 %v7837_v8  ;;  %7305 = vmatprep.mubr.msk.f32.mxu1 %vm7838_vm1, %v7837_v8 }
 0x761   :  { %7301 = vmatmul.mubr.msk.f32.vlgmr.msra.gmra.mxu0 %vm168_vm2, %v2425_v21 }
 0x762   :  { %7310 = vmatprep.mubr.msk.f32.mxu0 %vm7838_vm1, %v7837_v8 }
 0x811   :  { %v8259_v22 = vpop.f32.mrf.mxu1 }
 0x813   :  { %v7267_v24 = vpop.f32.mrf.mxu1 }
 0x814   :  { %v8261_v25 = vpop.f32.mrf.mxu0 }
 0x815   :  { %v8263_v26 = vpop.f32.mrf.mxu1 }
 0x816   :  { %v7272_v27 = vpop.f32.mrf.mxu0 }
 0x817   :  { %v7277_v29 = vpop.f32.mrf.mxu1 }
 0x819   :  { %v8265_v30 = vpop.f32.mrf.mxu0  ;;  %v2264_v31 = vpop.f32.mrf.mxu1 }
 0x81a   :  { %v2502_v32 = vmul.f32 0.35355338, %v2264_v31  ;;  %v2923_v31 = vld [vmem:[%s9038_s4 + $0x18] sm:$0xff] }
 0x81b   :  { %v7282_v34 = vpop.f32.mrf.mxu0  ;;  %v7287_v37 = vpop.f32.mrf.mxu1 }
 0x81c   :  { %v2506_v39 = vadd.f32 %v8010_v23, %v2502_v32  ;;  %v2922_v32 = vld [vmem:[%s9038_s4 + $0x10] sm:$0xff]  ;;  %v2921_v34 = vld [vmem:[%s9038_s4 + $0x8] sm:$0xff]  ;;  %v2920_v37 = vld [vmem:[%s9038_s4] sm:$0xff] }
 0x81d   :  { %v2342_v42 = vpop.f32.mrf.mxu0  ;;  %v2420_v43 = vpop.f32.mrf.mxu1 }
 0x81e   :  { %v2503_v44 = vmul.f32 0.35355338, %v2342_v42  ;;  %v2504_v45 = vmul.f32 0.35355338, %v2420_v43  ;;  %v2510_v46 = vsel %vm168_vm2, %v2506_v39, -inf }
 0x81f   :  { %v7292_v47 = vpop.f32.mrf.mxu0  ;;  %2511 = vmax.xlane.f32.xlu0 %v2510_v46  ;;  %v7297_v48 = vpop.f32.mrf.mxu1 }
 0x820   :  { %v2507_v49 = vadd.f32 %v8016_v28, %v2503_v44  ;;  %v2508_v50 = vadd.f32 %v8023_v35, %v2504_v45 }
 0x821   :  { %v2498_v51 = vpop.f32.mrf.mxu0 }
 0x822   :  { %v2505_v52 = vmul.f32 0.35355338, %v2498_v51  ;;  %v2513_v53 = vsel %vm168_vm2, %v2507_v49, -inf  ;;  %v2516_v54 = vsel %vm168_vm2, %v2508_v50, -inf }
 0x823   :  { %2514 = vmax.xlane.f32.xlu1 %v2513_v53  ;;  %v7302_v23 = vpop.f32.mrf.mxu0  ;;  %2517 = vmax.xlane.f32.xlu0 %v2516_v54 }
 0x824   :  { %v2509_v55 = vadd.f32 %v8029_v41, %v2505_v52 }
 0x826   :  { %v2519_v57 = vsel %vm168_vm2, %v2509_v55, -inf }
 0x827   :  { %2520 = vmax.xlane.f32.xlu0 %v2519_v57 }
 0x834   :  { %2554 = vrot.lane.b32.xlu1 %v7967_v12, %s9051_s18 }
 0x8a8   :  { %v2512_v28 = vpop.xlane.xlu0 %2511 }
 0x8a9   :  { %v2522_v35 = vsub.f32 %v2506_v39, %v2512_v28 }
 0x8ab   :  { %v2526_v60 = vmul.f32 1.442695, %v2522_v35 }
 0x8ac   :  { %v2515_v61 = vpop.xlane.xlu1 %2514  ;;  %v2518_v63 = vpop.xlane.xlu0 %2517 }
 0x8ad   :  { %7695 = vpow2.f32 %v2526_v60  ;;  %v2523_v0 = vsub.f32 %v2507_v49, %v2515_v61  ;;  %v2524_v1 = vsub.f32 %v2508_v50, %v2518_v63 }
 0x8af   :  { %v2528_v2 = vmul.f32 1.442695, %v2523_v0  ;;  %v2530_v3 = vmul.f32 1.442695, %v2524_v1 }
 0x8b0   :  { %v2555_v4 = vpop.permute.xlu1 %2554  ;;  %v2521_v5 = vpop.xlane.xlu0 %2520 }
 0x8b1   :  { %7697 = vpow2.f32 %v2528_v2  ;;  %v2525_v41 = vsub.f32 %v2509_v55, %v2521_v5  ;;  %7304 = vmatpush3.msra.mxu1 %v2555_v4 }
 0x8b2   :  { %7699 = vpow2.f32 %v2530_v3  ;;  %7313 = vmatprep.subr.mxu1 %v7837_v8 }
 0x8b3   :  { %v2532_v6 = vmul.f32 1.442695, %v2525_v41 }
 0x8b5   :  { %7701 = vpow2.f32 %v2532_v6 }
 0x8ba   :  { %v7696_v12 = vpop.eup %7695 }
 0x8bb   :  { %v2534_v7 = vsel %vm168_vm2, %v7696_v12, 0.0 }
 0x8bc   :  { %2535 = vadd.xlane.f32.xlu1 %v2534_v7 }
 0x8be   :  { %v7698_v9 = vpop.eup %7697 }
 0x8bf   :  { %v7700_v10 = vpop.eup %7699  ;;  %v2537_v11 = vsel %vm168_vm2, %v7698_v9, 0.0 }
 0x8c0   :  { %2538 = vadd.xlane.f32.xlu0 %v2537_v11  ;;  %v2540_v13 = vsel %vm168_vm2, %v7700_v10, 0.0  ;;  %v7808_v11 = vld [vmem:[%s9034_s0] sm:$0xff] }
 0x8c1   :  { %2541 = vadd.xlane.f32.xlu1 %v2540_v13 }
 0x8c2   :  { %v7702_v14 = vpop.eup %7701 }
 0x8c3   :  { %v2543_v18 = vsel %vm168_vm2, %v7702_v14, 0.0 }
 0x8c4   :  { %2544 = vadd.xlane.f32.xlu0 %v2543_v18 }
 0x8d2   :  { %2706 = vrot.lane.b32.xlu1 %v7973_v16, %s9051_s18 }
 0x8d6   :  { %2782 = vrot.lane.b32.xlu1 %v7979_v17, %s9051_s18 }
 0x8da   :  { %2864 = vrot.lane.b32.xlu1 %v8181_v58, %s9049_s19  ;;  %2630 = vrot.lane.b32.xlu0 %v7971_v15, %s9051_s18 }
 0x8de   :  { %2880 = vrot.lane.b32.xlu1 %v8261_v25, %s7851_s20  ;;  %2862 = vrot.lane.b32.xlu0 %v8179_v56, %s9049_s19 }
 0x8e2   :  { %2868 = vrot.lane.b32.xlu1 %v8185_v62, %s9049_s19  ;;  %2878 = vrot.lane.b32.xlu0 %v8259_v22, %s7851_s20 }
 0x8e6   :  { %2866 = vrot.lane.b32.xlu0 %v8183_v59, %s9049_s19 }
 0x945   :  { %v2536_v16 = vpop.xlane.xlu1 %2535 }
 0x946   :  { %7703 = vrcp.f32 %v2536_v16 }
 0x949   :  { %v2539_v17 = vpop.xlane.xlu0 %2538 }
 0x94a   :  { %v2542_v15 = vpop.xlane.xlu1 %2541  ;;  %7705 = vrcp.f32 %v2539_v17 }
 0x94b   :  { %7707 = vrcp.f32 %v2542_v15 }
 0x94d   :  { %v2545_v58 = vpop.xlane.xlu0 %2544 }
 0x94e   :  { %7709 = vrcp.f32 %v2545_v58  ;;  %v2707_v62 = vpop.permute.xlu1 %2706  ;;  %v7809_v58 = vld [vmem:[%s9034_s0 + $0x10] sm:$0xff] }
 0x951   :  { %v2631_v19 = vpop.permute.xlu0 %2630 }
 0x952   :  { %7309 = vmatpush3.msra.mxu0 %v2631_v19  ;;  %v2783_v25 = vpop.permute.xlu1 %2782 }
 0x953   :  { %v7704_v56 = vpop.eup %7703  ;;  %7318 = vmatprep.subr.mxu0 %v7837_v8 }
 0x954   :  { %v2550_v20 = vmul.f32 %v7704_v56, %v7696_v12 }
 0x955   :  { %v2863_v49 = vpop.permute.xlu0 %2862 }
 0x956   :  { %7306 = vmatmul.mubr.msk.f32.vlgmr.msra.gmra.mxu1 %vm168_vm2, %v2550_v20  ;;  %v2865_v50 = vpop.permute.xlu1 %2864 }
 0x957   :  { %v7706_v21 = vpop.eup %7705  ;;  %7314 = vmatpush3.msra.mxu1 %v2707_v62  ;;  %7315 = vmatprep.mubr.msk.f32.mxu1 %vm7838_vm1, %v7837_v8  ;;  %v7810_v62 = vld [vmem:[%s9034_s0 + $0x18] sm:$0xff] }
 0x958   :  { %v7708_v59 = vpop.eup %7707  ;;  %v2551_v22 = vmul.f32 %v7706_v21, %v7698_v9  ;;  %v7807_v9 = vld [vmem:[%s9034_s0 + $0x8] sm:$0xff] }
 0x959   :  { %v2552_v24 = vmul.f32 %v7708_v59, %v7700_v10  ;;  %v2879_v51 = vpop.permute.xlu0 %2878 }
 0x95a   :  { %7311 = vmatmul.mubr.msk.f32.vlgmr.msra.gmra.mxu0 %vm168_vm2, %v2551_v22  ;;  %v2881_v52 = vpop.permute.xlu1 %2880 }
 0x95b   :  { %v7710_v27 = vpop.eup %7709  ;;  %7316 = vmatmul.mubr.msk.f32.vlgmr.msra.gmra.mxu1 %vm168_vm2, %v2552_v24  ;;  %7319 = vmatpush3.msra.mxu0 %v2783_v25 }
 0x95c   :  { %7320 = vmatprep.mubr.msk.f32.mxu0 %vm7838_vm1, %v7837_v8  ;;  %v2553_v29 = vmul.f32 %v7710_v27, %v7702_v14  ;;  %7323 = vmatprep.subr.mxu0 %v2923_v31 }
 0x95d   :  { %v2867_v53 = vpop.permute.xlu0 %2866 }
 0x95e   :  { %7321 = vmatmul.mubr.msk.f32.vlgmr.msra.gmra.mxu0 %vm168_vm2, %v2553_v29  ;;  %v2869_v23 = vpop.permute.xlu1 %2868 }
 0x95f   :  { %7324 = vmatpush3.msra.mxu0 %v2923_v31 }
 0x960   :  { %7325 = vmatprep.subr.mxu0 %v2922_v32 }
 0x961   :  { %7326 = vmatpush3.msra.mxu0 %v2922_v32 }
 0x962   :  { %7327 = vmatprep.subr.mxu0 %v2921_v34 }
 0x963   :  { %7328 = vmatpush3.msra.mxu0 %v2921_v34 }
 0x964   :  { %7329 = vmatprep.subr.mxu0 %v2920_v37 }
 0x965   :  { %7330 = vmatpush3.msra.mxu0 %v2920_v37 }
 0xa16   :  { %v2626_v39 = vpop.f32.mrf.mxu1 }
 0xa17   :  { %2894 = vrot.lane.b32.xlu0 %v2626_v39, %s7852_s21 }
 0xa18   :  { %v7307_v42 = vpop.f32.mrf.mxu1 }
 0xa1a   :  { %v2702_v43 = vpop.f32.mrf.mxu0 }
 0xa1b   :  { %v2778_v44 = vpop.f32.mrf.mxu1  ;;  %2882 = vrot.lane.b32.xlu0 %v8263_v26, %s7851_s20  ;;  %2896 = vrot.lane.b32.xlu1 %v2702_v43, %s7852_s21  ;;  %v2906_v26 = vsel %vm168_vm2, %v8099_v33, %v2863_v49  ;;  %v2908_v33 = vsel %vm168_vm2, %v8103_v38, %v2867_v53  ;;  %v6814_v38 = vld [vmem:[%s9039_s5] ss:$0 sm:$0xff]  ;;  %v3108_v53 = vld [vmem:[%s9042_s8 + $0x8] sm:$0xff] }
 0xa1c   :  { %v7312_v45 = vpop.f32.mrf.mxu0  ;;  %v2911_v54 = vsel %vm2910_vm3, %v2906_v26, %v2879_v51  ;;  %v3110_v51 = vld [vmem:[%s9042_s8 + $0x18] sm:$0xff]  ;;  %v3107_v26 = vld [vmem:[%s9042_s8] sm:$0xff] }
 0xa1d   :  { %v7317_v46 = vpop.f32.mrf.mxu1  ;;  %7337 = vmatprep.subr.mxu0 %v3110_v51 }
 0xa1e   :  { %v2854_v47 = vpop.f32.mrf.mxu0 }
 0xa1f   :  { %2898 = vrot.lane.b32.xlu0 %v2778_v44, %s7852_s21  ;;  %2884 = vrot.lane.b32.xlu1 %v8265_v30, %s7851_s20  ;;  %v2907_v30 = vsel %vm168_vm2, %v8101_v36, %v2865_v50  ;;  %v2909_v36 = vsel %vm168_vm2, %v8105_v40, %v2869_v23  ;;  %v3233_v23 = vld [vmem:[%s9044_s10 + $0x70] sm:$0xff] }
 0xa20   :  { %v7322_v48 = vpop.f32.mrf.mxu0  ;;  %v2912_v28 = vsel %vm2910_vm3, %v2907_v30, %v2881_v52  ;;  %v3109_v52 = vld [vmem:[%s9042_s8 + $0x10] sm:$0xff]  ;;  %v3230_v30 = vld [vmem:[%s9044_s10 + $0x58] sm:$0xff] }
 0xa23   :  { %2900 = vrot.lane.b32.xlu1 %v2854_v47, %s7852_s21 }
 0xa89   :  { %v2895_v55 = vpop.permute.xlu0 %2894 }
 0xa8a   :  { %v2916_v57 = vsel %vm2915_vm4, %v2911_v54, %v2895_v55  ;;  %v3234_v54 = vld [vmem:[%s9044_s10 + $0x78] sm:$0xff]  ;;  %v3232_v55 = vld [vmem:[%s9044_s10 + $0x68] sm:$0xff] }
 0xa8b   :  { %7331 = vmatprep.mubr.msk.f32.mxu0 %vm67_vm0, %v2916_v57  ;;  %7351 = vmatprep.subr.mxu1 %v3234_v54  ;;  %v3231_v57 = vld [vmem:[%s9044_s10 + $0x60] sm:$0xff] }
 0xa8c   :  { %7352 = vmatpush3.msra.mxu1 %v3234_v54 }
 0xa8d   :  { %v2897_v35 = vpop.permute.xlu1 %2896  ;;  %v2883_v60 = vpop.permute.xlu0 %2882  ;;  %7353 = vmatprep.subr.mxu1 %v3233_v23 }
 0xa8e   :  { %v2917_v61 = vsel %vm2915_vm4, %v2912_v28, %v2897_v35  ;;  %v2913_v63 = vsel %vm2910_vm3, %v2908_v33, %v2883_v60  ;;  %7354 = vmatpush3.msra.mxu1 %v3233_v23  ;;  %v3229_v28 = vld [vmem:[%s9044_s10 + $0x50] sm:$0xff]  ;;  %v3228_v35 = vld [vmem:[%s9044_s10 + $0x48] sm:$0xff]  ;;  %v3227_v60 = vld [vmem:[%s9044_s10 + $0x40] sm:$0xff] }
 0xa8f   :  { %7332 = vmatmul.mubr.msk.f32.vlgmr.msra.gmra.mxu0 %vm67_vm0, %v2917_v61  ;;  %7355 = vmatprep.subr.mxu1 %v3232_v55  ;;  %v3226_v61 = vld [vmem:[%s9044_s10 + $0x38] sm:$0xff]  ;;  %v3225_v33 = vld [vmem:[%s9044_s10 + $0x30] sm:$0xff] }
 0xa90   :  { %7338 = vmatpush3.msra.mxu0 %v3110_v51  ;;  %7356 = vmatpush3.msra.mxu1 %v3232_v55  ;;  %v6826_v51 = vld [vmem:[%s9045_s11] ss:$0 sm:$0xff] }
 0xa91   :  { %v2885_v0 = vpop.permute.xlu1 %2884  ;;  %v2899_v1 = vpop.permute.xlu0 %2898  ;;  %7339 = vmatprep.subr.mxu0 %v3109_v52  ;;  %7357 = vmatprep.subr.mxu1 %v3231_v57 }
 0xa92   :  { %v2918_v2 = vsel %vm2915_vm4, %v2913_v63, %v2899_v1  ;;  %v2914_v3 = vsel %vm2910_vm3, %v2909_v36, %v2885_v0  ;;  %7340 = vmatpush3.msra.mxu0 %v3109_v52  ;;  %7358 = vmatpush3.msra.mxu1 %v3231_v57  ;;  %v3224_v63 = vld [vmem:[%s9044_s10 + $0x28] sm:$0xff]  ;;  %v3223_v0 = vld [vmem:[%s9044_s10 + $0x20] sm:$0xff] }
 0xa93   :  { %7334 = vmatprep.mubr.msk.f32.mxu0 %vm67_vm0, %v2918_v2  ;;  %7341 = vmatprep.subr.mxu0 %v3108_v53 }
 0xa94   :  { %7342 = vmatpush3.msra.mxu0 %v3108_v53  ;;  %7359 = vmatprep.subr.mxu1 %v3230_v30 }
 0xa95   :  { %v2901_v4 = vpop.permute.xlu1 %2900  ;;  %7343 = vmatprep.subr.mxu0 %v3107_v26  ;;  %7360 = vmatpush3.msra.mxu1 %v3230_v30 }
 0xa96   :  { %v2919_v5 = vsel %vm2915_vm4, %v2914_v3, %v2901_v4  ;;  %7344 = vmatpush3.msra.mxu0 %v3107_v26  ;;  %7361 = vmatprep.subr.mxu1 %v3229_v28 }
 0xa97   :  { %7335 = vmatmul.mubr.msk.f32.gmra.mxu0 %vm67_vm0, %v2919_v5  ;;  %7362 = vmatpush3.msra.mxu1 %v3229_v28 }
 0xa98   :  { %7363 = vmatprep.subr.mxu1 %v3228_v35 }
 0xa99   :  { %7364 = vmatpush3.msra.mxu1 %v3228_v35 }
 0xa9a   :  { %7365 = vmatprep.subr.mxu1 %v3227_v60 }
 0xa9b   :  { %7366 = vmatpush3.msra.mxu1 %v3227_v60 }
 0xa9c   :  { %7367 = vmatprep.subr.mxu1 %v3226_v61 }
 0xa9d   :  { %7368 = vmatpush3.msra.mxu1 %v3226_v61 }
 0xa9e   :  { %7369 = vmatprep.subr.mxu1 %v3225_v33 }
 0xa9f   :  { %7370 = vmatpush3.msra.mxu1 %v3225_v33 }
 0xaa0   :  { %7371 = vmatprep.subr.mxu1 %v3224_v63 }
 0xaa1   :  { %7372 = vmatpush3.msra.mxu1 %v3224_v63 }
 0xaa2   :  { %7373 = vmatprep.subr.mxu1 %v3223_v0 }
 0xaa3   :  { %7374 = vmatpush3.msra.mxu1 %v3223_v0 }
 0xb4f   :  { %v7333_v41 = vpop.f32.mrf.mxu0 }
 0xb50   :  { %v3015_v6 = vadd.f32 %v7333_v41, %v6814_v38 }
 0xb51   :  { %v3009_v12 = vpop.f32.mrf.mxu0 }
 0xb52   :  { %v3010_v7 = vadd.f32 %v6814_v38, %v3009_v12  ;;  %v3029_v40 = vadd.f32 %v7807_v9, %v3015_v6 }
 0xb54   :  { %v3035_v10 = vsel %vm67_vm0, %v3029_v40, 0.0  ;;  %v3028_v13 = vadd.f32 %v7808_v11, %v3010_v7  ;;  %v6819_v11 = vld [vmem:[%s9040_s6] ss:$0 sm:$0xff] }
 0xb55   :  { %3036 = vadd.xlane.f32.xlu1 %v3035_v10 }
 0xb56   :  { %v3032_v14 = vsel %vm67_vm0, %v3028_v13, 0.0 }
 0xb57   :  { %3033 = vadd.xlane.f32.xlu0 %v3032_v14  ;;  %v7336_v18 = vpop.f32.mrf.mxu0 }
 0xb58   :  { %v3025_v17 = vadd.f32 %v7336_v18, %v6814_v38 }
 0xb59   :  { %v3019_v16 = vpop.f32.mrf.mxu0 }
 0xb5a   :  { %v3020_v15 = vadd.f32 %v6814_v38, %v3019_v16  ;;  %v3031_v20 = vadd.f32 %v7810_v62, %v3025_v17  ;;  %v6820_v17 = vld [vmem:[%s9041_s7] ss:$0 sm:$0xff] }
 0xb5c   :  { %v3030_v19 = vadd.f32 %v7809_v58, %v3020_v15  ;;  %v3041_v21 = vsel %vm67_vm0, %v3031_v20, 0.0 }
 0xb5e   :  { %v3038_v56 = vsel %vm67_vm0, %v3030_v19, 0.0 }
 0xb5f   :  { %3039 = vadd.xlane.f32.xlu0 %v3038_v56 }
 0xb63   :  { %3042 = vadd.xlane.f32.xlu0 %v3041_v21 }
 0xbde   :  { %v3037_v59 = vpop.xlane.xlu1 %3036 }
 0xbdf   :  { %v3046_v22 = vmul.f32 0.03125, %v3037_v59 }
 0xbe0   :  { %v3034_v24 = vpop.xlane.xlu0 %3033 }
 0xbe1   :  { %v8368_v25 = vsub.f32 %v3029_v40, %v3046_v22  ;;  %v3045_v27 = vmul.f32 0.03125, %v3034_v24 }
 0xbe3   :  { %v8370_v29 = vsub.f32 %v3028_v13, %v3045_v27  ;;  %v3054_v31 = vmul.f32 %v8368_v25, %v8368_v25  ;;  %v3221_v27 = vld [vmem:[%s9044_s10 + $0x10] sm:$0xff] }
 0xbe5   :  { %v3060_v32 = vsel %vm67_vm0, %v3054_v31, 0.0  ;;  %v3053_v34 = vmul.f32 %v8370_v29, %v8370_v29  ;;  %v3219_v31 = vld [vmem:[%s9044_s10] sm:$0xff] }
 0xbe6   :  { %3061 = vadd.xlane.f32.xlu0 %v3060_v32  ;;  %v6821_v32 = vld [vmem:[%s9043_s9] ss:$0 sm:$0xff] }
 0xbe7   :  { %v3057_v37 = vsel %vm67_vm0, %v3053_v34, 0.0 }
 0xbe8   :  { %3058 = vadd.xlane.f32.xlu1 %v3057_v37  ;;  %v3040_v39 = vpop.xlane.xlu0 %3039 }
 0xbe9   :  { %v3047_v42 = vmul.f32 0.03125, %v3040_v39 }
 0xbeb   :  { %v8378_v43 = vsub.f32 %v3030_v19, %v3047_v42 }
 0xbec   :  { %v3043_v44 = vpop.xlane.xlu0 %3042 }
 0xbed   :  { %v3048_v45 = vmul.f32 0.03125, %v3043_v44  ;;  %v3055_v46 = vmul.f32 %v8378_v43, %v8378_v43 }
 0xbef   :  { %v8382_v47 = vsub.f32 %v3031_v20, %v3048_v45  ;;  %v3063_v48 = vsel %vm67_vm0, %v3055_v46, 0.0 }
 0xbf0   :  { %3064 = vadd.xlane.f32.xlu1 %v3063_v48 }
 0xbf1   :  { %v3056_v49 = vmul.f32 %v8382_v47, %v8382_v47 }
 0xbf3   :  { %v3066_v50 = vsel %vm67_vm0, %v3056_v49, 0.0 }
 0xbf4   :  { %3067 = vadd.xlane.f32.xlu0 %v3066_v50 }
 0xc6f   :  { %v3062_v1 = vpop.xlane.xlu0 %3061 }
 0xc70   :  { %v3070_v2 = vmul.f32 0.03125, %v3062_v1 }
 0xc71   :  { %v3059_v36 = vpop.xlane.xlu1 %3058 }
 0xc72   :  { %v3074_v3 = vadd.f32 1e-05, %v3070_v2  ;;  %v3069_v4 = vmul.f32 0.03125, %v3059_v36 }
 0xc74   :  { %7711 = vrsqrt.f32 %v3074_v3  ;;  %v3073_v5 = vadd.f32 1e-05, %v3069_v4 }
 0xc76   :  { %7713 = vrsqrt.f32 %v3073_v5 }
 0xc79   :  { %v3065_v38 = vpop.xlane.xlu1 %3064 }
 0xc7a   :  { %v3071_v41 = vmul.f32 0.03125, %v3065_v38 }
 0xc7c   :  { %v3075_v6 = vadd.f32 1e-05, %v3071_v41 }
 0xc7d   :  { %v3068_v12 = vpop.xlane.xlu0 %3067 }
 0xc7e   :  { %7715 = vrsqrt.f32 %v3075_v6  ;;  %v3072_v7 = vmul.f32 0.03125, %v3068_v12 }
 0xc80   :  { %v3076_v9 = vadd.f32 1e-05, %v3072_v7 }
 0xc81   :  { %v7712_v40 = vpop.eup %7711 }
 0xc82   :  { %v3082_v10 = vmul.f32 %v7712_v40, %v8368_v25  ;;  %7717 = vrsqrt.f32 %v3076_v9  ;;  %v3222_v25 = vld [vmem:[%s9044_s10 + $0x18] sm:$0xff] }
 0xc83   :  { %v7714_v13 = vpop.eup %7713  ;;  %7375 = vmatprep.subr.mxu1 %v3222_v25 }
 0xc84   :  { %v3081_v14 = vmul.f32 %v7714_v13, %v8370_v29  ;;  %v3093_v18 = vmul.f32 %v6819_v11, %v3082_v10  ;;  %7376 = vmatpush3.msra.mxu1 %v3222_v25  ;;  %v3220_v29 = vld [vmem:[%s9044_s10 + $0x8] sm:$0xff] }
 0xc85   :  { %7377 = vmatprep.subr.mxu1 %v3221_v27 }
 0xc86   :  { %v3092_v16 = vmul.f32 %v6819_v11, %v3081_v14  ;;  %v3104_v58 = vadd.f32 %v6820_v17, %v3093_v18  ;;  %7378 = vmatpush3.msra.mxu1 %v3221_v27 }
 0xc87   :  { %7379 = vmatprep.subr.mxu1 %v3220_v29 }
 0xc88   :  { %v3103_v15 = vadd.f32 %v6820_v17, %v3092_v16  ;;  %7380 = vmatpush3.msra.mxu1 %v3220_v29 }
 0xc89   :  { %7381 = vmatprep.subr.mxu1 %v3219_v31 }
 0xc8a   :  { %7345 = vmatprep.mubr.msk.f32.mxu0 %vm67_vm0, %v3103_v15  ;;  %7382 = vmatpush3.msra.mxu1 %v3219_v31 }
 0xc8b   :  { %v7716_v19 = vpop.eup %7715  ;;  %7346 = vmatmul.mubr.msk.f32.vlgmr.msra.gmra.mxu0 %vm67_vm0, %v3104_v58  ;;  %7433 = vmatprep.subr.mxu1 %v7837_v8 }
 0xc8c   :  { %v3083_v56 = vmul.f32 %v7716_v19, %v8378_v43  ;;  %v6831_v19 = vld [vmem:[%s9036_s2 + $0x30] sm:$0xff] }
 0xc8e   :  { %v3094_v62 = vmul.f32 %v6819_v11, %v3083_v56  ;;  %v6830_v56 = vld [vmem:[%s9036_s2 + $0x28] sm:$0xff] }
 0xc8f   :  { %v7718_v20 = vpop.eup %7717 }
 0xc90   :  { %v3105_v21 = vadd.f32 %v6820_v17, %v3094_v62  ;;  %v3084_v59 = vmul.f32 %v7718_v20, %v8382_v47  ;;  %v6829_v62 = vld [vmem:[%s9036_s2 + $0x20] sm:$0xff] }
 0xc92   :  { %7348 = vmatprep.mubr.msk.f32.mxu0 %vm67_vm0, %v3105_v21  ;;  %v3095_v22 = vmul.f32 %v6819_v11, %v3084_v59 }
 0xc94   :  { %v3106_v24 = vadd.f32 %v6820_v17, %v3095_v22 }
 0xc96   :  { %7349 = vmatmul.mubr.msk.f32.gmra.mxu0 %vm67_vm0, %v3106_v24 }
 0xd4b   :  { %v7347_v34 = vpop.f32.mrf.mxu0 }
 0xd4c   :  { %v3202_v37 = vadd.f32 %v7347_v34, %v6821_v32 }
 0xd4d   :  { %v3196_v39 = vpop.f32.mrf.mxu0 }
 0xd4e   :  { %v3197_v42 = vadd.f32 %v6821_v32, %v3196_v39  ;;  %v3216_v44 = vmax.f32 %v3202_v37, 0.0 }
 0xd50   :  { %v3215_v43 = vmax.f32 %v3197_v42, 0.0 }
 0xd52   :  { %7383 = vmatprep.mubr.f32.mxu1 %v3215_v43  ;;  %v6827_v43 = vld [vmem:[%s9046_s12] ss:$0 sm:$0xff] }
 0xd53   :  { %7384 = vmatmul.mubr.f32.vlgmr.msra.gmra.mxu1 %v3216_v44 }
 0xd56   :  { %v7350_v45 = vpop.f32.mrf.mxu0 }
 0xd57   :  { %v3212_v46 = vadd.f32 %v7350_v45, %v6821_v32 }
 0xd58   :  { %v3206_v47 = vpop.f32.mrf.mxu0 }
 0xd59   :  { %v3207_v48 = vadd.f32 %v6821_v32, %v3206_v47  ;;  %v3218_v50 = vmax.f32 %v3212_v46, 0.0 }
 0xd5b   :  { %v3217_v49 = vmax.f32 %v3207_v48, 0.0  ;;  %v6828_v48 = vld [vmem:[%s9047_s13] ss:$0 sm:$0xff] }
 0xd5d   :  { %7386 = vmatprep.mubr.f32.mxu1 %v3217_v49 }
 0xd5e   :  { %7387 = vmatmul.mubr.f32.gmra.mxu1 %v3218_v50 }
 0xd5f   :  { %7435 = vmatprep.mubr.msk.f32.mxu1 %vm7838_vm1, %v7837_v8 }
 0xe13   :  { %v7385_v52 = vpop.f32.mrf.mxu1 }
 0xe14   :  { %v3314_v53 = vadd.f32 %v7385_v52, %v6826_v51 }
 0xe15   :  { %v3308_v26 = vpop.f32.mrf.mxu1 }
 0xe16   :  { %v3328_v54 = vadd.f32 %v3314_v53, %v3104_v58  ;;  %v3309_v23 = vadd.f32 %v6826_v51, %v3308_v26  ;;  %v6832_v58 = vld [vmem:[%s9036_s2 + $0x38] sm:$0xff] }
 0xe17   :  { %7389 = vmatprep.subr.mxu0 %v6832_v58 }
 0xe18   :  { %v3334_v55 = vsel %vm67_vm0, %v3328_v54, 0.0  ;;  %v3327_v57 = vadd.f32 %v3309_v23, %v3103_v15  ;;  %7390 = vmatpush3.msra.mxu0 %v6832_v58 }
 0xe19   :  { %3335 = vadd.xlane.f32.xlu0 %v3334_v55  ;;  %7391 = vmatprep.subr.mxu0 %v6831_v19 }
 0xe1a   :  { %v3331_v30 = vsel %vm67_vm0, %v3327_v57, 0.0  ;;  %7392 = vmatpush3.msra.mxu0 %v6831_v19 }
 0xe1b   :  { %3332 = vadd.xlane.f32.xlu1 %v3331_v30  ;;  %7393 = vmatprep.subr.mxu0 %v6830_v56  ;;  %v6834_v30 = vld [vmem:[%s9037_s3 + $0x1] ss:$0 sm:$0xff] }
 0xe1c   :  { %7394 = vmatpush3.msra.mxu0 %v6830_v56 }
 0xe1d   :  { %7395 = vmatprep.subr.mxu0 %v6829_v62 }
 0xe1e   :  { %v7388_v28 = vpop.f32.mrf.mxu1  ;;  %7396 = vmatpush3.msra.mxu0 %v6829_v62 }
 0xe1f   :  { %v3324_v35 = vadd.f32 %v7388_v28, %v6826_v51  ;;  %7403 = vmatprep.subr.mxu0 %v7837_v8 }
 0xe20   :  { %v3318_v60 = vpop.f32.mrf.mxu1 }
 0xe21   :  { %v3330_v61 = vadd.f32 %v3324_v35, %v3106_v24  ;;  %v3319_v33 = vadd.f32 %v6826_v51, %v3318_v60 }
 0xe23   :  { %v3340_v63 = vsel %vm67_vm0, %v3330_v61, 0.0  ;;  %v3329_v0 = vadd.f32 %v3319_v33, %v3105_v21 }
 0xe24   :  { %3341 = vadd.xlane.f32.xlu0 %v3340_v63 }
 0xe25   :  { %v3337_v1 = vsel %vm67_vm0, %v3329_v0, 0.0 }
 0xe26   :  { %3338 = vadd.xlane.f32.xlu1 %v3337_v1 }
 0xea2   :  { %v3336_v2 = vpop.xlane.xlu0 %3335 }
 0xea3   :  { %v3344_v36 = vmul.f32 0.03125, %v3336_v2 }
 0xea4   :  { %v3333_v3 = vpop.xlane.xlu1 %3332 }
 0xea5   :  { %v3348_v4 = vsub.f32 %v3328_v54, %v3344_v36  ;;  %v3343_v5 = vmul.f32 0.03125, %v3333_v3 }
 0xea7   :  { %v3347_v38 = vsub.f32 %v3327_v57, %v3343_v5  ;;  %v3352_v41 = vmul.f32 %v3348_v4, %v3348_v4 }
 0xea9   :  { %v3358_v6 = vsel %vm67_vm0, %v3352_v41, 0.0  ;;  %v3351_v12 = vmul.f32 %v3347_v38, %v3347_v38 }
 0xeaa   :  { %3359 = vadd.xlane.f32.xlu0 %v3358_v6  ;;  %v8562_v6 = vld [vmem:[%s9035_s1] ss:$0 sm:$0xff] }
 0xeab   :  { %v3355_v7 = vsel %vm67_vm0, %v3351_v12, 0.0 }
 0xeac   :  { %3356 = vadd.xlane.f32.xlu1 %v3355_v7 }
 0xead   :  { %v3342_v9 = vpop.xlane.xlu0 %3341 }
 0xeae   :  { %v3346_v40 = vmul.f32 0.03125, %v3342_v9 }
 0xeaf   :  { %v3339_v10 = vpop.xlane.xlu1 %3338 }
 0xeb0   :  { %v3350_v11 = vsub.f32 %v3330_v61, %v3346_v40  ;;  %v3345_v13 = vmul.f32 0.03125, %v3339_v10 }
 0xeb2   :  { %v3349_v14 = vsub.f32 %v3329_v0, %v3345_v13  ;;  %v3354_v18 = vmul.f32 %v3350_v11, %v3350_v11 }
 0xeb4   :  { %v3364_v16 = vsel %vm67_vm0, %v3354_v18, 0.0  ;;  %v3353_v17 = vmul.f32 %v3349_v14, %v3349_v14 }
 0xeb5   :  { %3365 = vadd.xlane.f32.xlu0 %v3364_v16 }
 0xeb6   :  { %v3361_v15 = vsel %vm67_vm0, %v3353_v17, 0.0 }
 0xeb7   :  { %3362 = vadd.xlane.f32.xlu1 %v3361_v15  ;;  %v8576_v15 = vld [vmem:[%s9035_s1 + $0x2] ss:$0 sm:$0xff] }
 0xf33   :  { %v3360_v20 = vpop.xlane.xlu0 %3359 }
 0xf34   :  { %v3368_v21 = vmul.f32 0.03125, %v3360_v20 }
 0xf35   :  { %v3357_v59 = vpop.xlane.xlu1 %3356 }
 0xf36   :  { %v3372_v22 = vadd.f32 1e-05, %v3368_v21  ;;  %v3367_v24 = vmul.f32 0.03125, %v3357_v59  ;;  %v8583_v21 = vld [vmem:[%s9035_s1 + $0x3] ss:$0 sm:$0xff] }
 0xf38   :  { %7719 = vrsqrt.f32 %v3372_v22  ;;  %v3371_v25 = vadd.f32 1e-05, %v3367_v24 }
 0xf3a   :  { %7721 = vrsqrt.f32 %v3371_v25 }
 0xf3e   :  { %v3366_v27 = vpop.xlane.xlu0 %3365 }
 0xf3f   :  { %v3370_v29 = vmul.f32 0.03125, %v3366_v27 }
 0xf40   :  { %v3363_v31 = vpop.xlane.xlu1 %3362 }
 0xf41   :  { %v3374_v32 = vadd.f32 1e-05, %v3370_v29  ;;  %v3369_v34 = vmul.f32 0.03125, %v3363_v31 }
 0xf43   :  { %7723 = vrsqrt.f32 %v3374_v32  ;;  %v3373_v37 = vadd.f32 1e-05, %v3369_v34 }
 0xf45   :  { %v7720_v39 = vpop.eup %7719  ;;  %7725 = vrsqrt.f32 %v3373_v37 }
 0xf46   :  { %v3380_v42 = vmul.f32 %v7720_v39, %v3348_v4 }
 0xf47   :  { %v7722_v44 = vpop.eup %7721 }
 0xf48   :  { %v3379_v45 = vmul.f32 %v7722_v44, %v3347_v38  ;;  %v3391_v46 = vmul.f32 %v6827_v43, %v3380_v42 }
 0xf4a   :  { %v3390_v47 = vmul.f32 %v6827_v43, %v3379_v45  ;;  %v8500_v50 = vadd.f32 %v6828_v48, %v3391_v46 }
 0xf4c   :  { %v8498_v49 = vadd.f32 %v6828_v48, %v3390_v47 }
 0xf4e   :  { %7397 = vmatprep.mubr.msk.f32.mxu0 %vm67_vm0, %v8498_v49 }
 0xf4f   :  { %7398 = vmatmul.mubr.msk.f32.vlgmr.msra.gmra.mxu0 %vm67_vm0, %v8500_v50 }
 0xf50   :  { %v7724_v51 = vpop.eup %7723 }
 0xf51   :  { %v3382_v52 = vmul.f32 %v7724_v51, %v3350_v11  ;;  %v8569_v11 = vld [vmem:[%s9035_s1 + $0x1] ss:$0 sm:$0xff]  ;;  %s9059_s1 = smov 48  }
 0xf52   :  { %v7726_v53 = vpop.eup %7725 }
 0xf53   :  { %v3381_v26 = vmul.f32 %v7726_v53, %v3349_v14  ;;  %v3393_v54 = vmul.f32 %v6827_v43, %v3382_v52 }
 0xf55   :  { %v3392_v23 = vmul.f32 %v6827_v43, %v3381_v26  ;;  %v8508_v57 = vadd.f32 %v6828_v48, %v3393_v54 }
 0xf57   :  { %v8506_v55 = vadd.f32 %v6828_v48, %v3392_v23 }
 0xf59   :  { %7400 = vmatprep.mubr.msk.f32.mxu0 %vm67_vm0, %v8506_v55 }
 0xf5a   :  { %7401 = vmatmul.mubr.msk.f32.gmra.mxu0 %vm67_vm0, %v8508_v57 }
 0xf5b   :  { %7405 = vmatprep.mubr.msk.f32.mxu0 %vm7838_vm1, %v7837_v8 }
0x100f   :  { %v7399_v28 = vpop.f32.mrf.mxu0 }
0x1010   :  { %v8519_v35 = vadd.f32 %v7399_v28, %v6834_v30 }
0x1011   :  { %v3496_v60 = vpop.f32.mrf.mxu0 }
0x1012   :  { %v8521_v61 = vadd.f32 %v6834_v30, %v3496_v60  ;;  %3593 = vrot.lane.b32.xlu0 %v8519_v35, %s7839_s15 }
0x1014   :  { %3516 = vrot.lane.b32.xlu1 %v8521_v61, %s7839_s15 }
0x101a   :  { %v7402_v33 = vpop.f32.mrf.mxu0 }
0x101b   :  { %v8531_v1 = vadd.f32 %v7402_v33, %v6834_v30 }
0x101c   :  { %v3506_v63 = vpop.f32.mrf.mxu0 }
0x101d   :  { %v8527_v0 = vadd.f32 %v6834_v30, %v3506_v63 }
0x101f   :  { %3670 = vrot.lane.b32.xlu1 %v8527_v0, %s7839_s15 }
0x1023   :  { %3747 = vrot.lane.b32.xlu1 %v8531_v1, %s7839_s15 }
0x1084   :  { %v3594_v36 = vpop.permute.xlu0 %3593 }
0x1086   :  { %v3517_v2 = vpop.permute.xlu1 %3516 }
0x1087   :  { %7404 = vmatpush3.xpose.msk.msra.mxu0 %vm168_vm2, %v3517_v2 }
0x1088   :  { %7408 = vmatprep.subr.mxu0 %v7837_v8 }
0x108a   :  { %7406 = vmatmul.mubr.msk.f32.vlgmr.msra.gmra.mxu0 %vm168_vm2, %v8521_v61 }
0x108b   :  { %7409 = vmatpush3.xpose.msk.msra.mxu0 %vm168_vm2, %v3594_v36  ;;  %7410 = vmatprep.mubr.msk.f32.mxu0 %vm7838_vm1, %v7837_v8 }
0x108c   :  { %7413 = vmatprep.subr.mxu0 %v7837_v8 }
0x108e   :  { %7411 = vmatmul.mubr.msk.f32.vlgmr.msra.gmra.mxu0 %vm168_vm2, %v8519_v35 }
0x108f   :  { %7415 = vmatprep.mubr.msk.f32.mxu0 %vm7838_vm1, %v7837_v8 }
0x1091   :  { %v3671_v3 = vpop.permute.xlu1 %3670 }
0x1092   :  { %7414 = vmatpush3.xpose.msk.msra.mxu0 %vm168_vm2, %v3671_v3 }
0x1093   :  { %7418 = vmatprep.subr.mxu0 %v7837_v8 }
0x1095   :  { %v3748_v4 = vpop.permute.xlu1 %3747  ;;  %7416 = vmatmul.mubr.msk.f32.vlgmr.msra.gmra.mxu0 %vm168_vm2, %v8527_v0 }
0x1096   :  { %7419 = vmatpush3.xpose.msk.msra.mxu0 %vm168_vm2, %v3748_v4  ;;  %7420 = vmatprep.mubr.msk.f32.mxu0 %vm7838_vm1, %v7837_v8 }
0x1097   :  { %7423 = vmatprep.subr.mxu0 %v7837_v8 }
0x1099   :  { %7421 = vmatmul.mubr.msk.f32.vlgmr.msra.gmra.mxu0 %vm168_vm2, %v8531_v1 }
0x109a   :  { %7425 = vmatprep.mubr.msk.f32.mxu0 %vm7838_vm1, %v7837_v8 }
0x114a   :  { %v3588_v5 = vpop.f32.mrf.mxu0 }
0x114b   :  { %v3823_v38 = vmul.f32 0.35355338, %v3588_v5 }
0x114c   :  { %v7407_v41 = vpop.f32.mrf.mxu0 }
0x114d   :  { %v3827_v12 = vadd.f32 %v8562_v6, %v3823_v38 }
0x114e   :  { %v3665_v7 = vpop.f32.mrf.mxu0 }
0x114f   :  { %v3824_v9 = vmul.f32 0.35355338, %v3665_v7  ;;  %v3831_v40 = vsel %vm168_vm2, %v3827_v12, -inf }
0x1150   :  { %3832 = vmax.xlane.f32.xlu0 %v3831_v40  ;;  %v7412_v10 = vpop.f32.mrf.mxu0 }
0x1151   :  { %v3828_v13 = vadd.f32 %v8569_v11, %v3824_v9 }
0x1153   :  { %v3834_v14 = vsel %vm168_vm2, %v3828_v13, -inf }
0x1154   :  { %3835 = vmax.xlane.f32.xlu1 %v3834_v14 }
0x1155   :  { %v3742_v18 = vpop.f32.mrf.mxu0 }
0x1156   :  { %v3825_v16 = vmul.f32 0.35355338, %v3742_v18 }
0x1157   :  { %v7417_v17 = vpop.f32.mrf.mxu0 }
0x1158   :  { %v3829_v58 = vadd.f32 %v8576_v15, %v3825_v16 }
0x1159   :  { %v3819_v19 = vpop.f32.mrf.mxu0 }
0x115a   :  { %v3826_v56 = vmul.f32 0.35355338, %v3819_v19  ;;  %v3837_v62 = vsel %vm168_vm2, %v3829_v58, -inf }
0x115b   :  { %3838 = vmax.xlane.f32.xlu0 %v3837_v62  ;;  %v7422_v20 = vpop.f32.mrf.mxu0 }
0x115c   :  { %v3830_v59 = vadd.f32 %v8583_v21, %v3826_v56 }
0x115e   :  { %v3840_v22 = vsel %vm168_vm2, %v3830_v59, -inf }
0x115f   :  { %3841 = vmax.xlane.f32.xlu0 %v3840_v22 }
0x1165   :  { %3875 = vrot.lane.b32.xlu1 %v8521_v61, %s7840_s24 }
0x1169   :  { %4027 = vrot.lane.b32.xlu1 %v8527_v0, %s7840_s24 }
0x116d   :  { %4103 = vrot.lane.b32.xlu1 %v8531_v1, %s7840_s24 }
0x1171   :  { %4259 = vrot.lane.b32.xlu1 %v8519_v35, %s7841_s25 }
0x1175   :  { %4257 = vrot.lane.b32.xlu1 %v8519_v35, %s7842_s26  ;;  %3951 = vrot.lane.b32.xlu0 %v8519_v35, %s7840_s24  ;;  %s9060_s24 = smov 72  }
0x1179   :  { %4181 = vrot.lane.b32.xlu0 %v8521_v61, %s7841_s25 }
0x117d   :  { %4179 = vrot.lane.b32.xlu0 %v8521_v61, %s7842_s26 }
0x11d9   :  { %v3833_v24 = vpop.xlane.xlu0 %3832 }
0x11da   :  { %v3843_v25 = vsub.f32 %v3827_v12, %v3833_v24 }
0x11dc   :  { %v3847_v27 = vmul.f32 1.442695, %v3843_v25 }
0x11dd   :  { %v3836_v29 = vpop.xlane.xlu1 %3835 }
0x11de   :  { %7727 = vpow2.f32 %v3847_v27  ;;  %v3844_v31 = vsub.f32 %v3828_v13, %v3836_v29 }
0x11e0   :  { %v3849_v32 = vmul.f32 1.442695, %v3844_v31 }
0x11e1   :  { %v3876_v34 = vpop.permute.xlu1 %3875 }
0x11e2   :  { %7729 = vpow2.f32 %v3849_v32  ;;  %7424 = vmatpush3.msra.mxu0 %v3876_v34 }
0x11e3   :  { %7428 = vmatprep.subr.mxu0 %v7837_v8 }
0x11e4   :  { %v3839_v37 = vpop.xlane.xlu0 %3838 }
0x11e5   :  { %v3845_v39 = vsub.f32 %v3829_v58, %v3839_v37  ;;  %v4028_v42 = vpop.permute.xlu1 %4027 }
0x11e6   :  { %7434 = vmatpush3.msra.mxu1 %v4028_v42 }
0x11e7   :  { %v3851_v43 = vmul.f32 1.442695, %v3845_v39  ;;  %7443 = vmatprep.subr.mxu1 %v7837_v8 }
0x11e8   :  { %v3842_v44 = vpop.xlane.xlu0 %3841 }
0x11e9   :  { %7731 = vpow2.f32 %v3851_v43  ;;  %v3846_v45 = vsub.f32 %v3830_v59, %v3842_v44  ;;  %v4104_v30 = vpop.permute.xlu1 %4103 }
0x11eb   :  { %v7728_v46 = vpop.eup %7727  ;;  %v3853_v47 = vmul.f32 1.442695, %v3846_v45 }
0x11ec   :  { %v3855_v48 = vsel %vm168_vm2, %v7728_v46, 0.0  ;;  %v3952_v28 = vpop.permute.xlu0 %3951 }
0x11ed   :  { %7733 = vpow2.f32 %v3853_v47  ;;  %3856 = vadd.xlane.f32.xlu1 %v3855_v48  ;;  %v4260_v60 = vpop.permute.xlu1 %4259 }
0x11ef   :  { %v7730_v51 = vpop.eup %7729 }
0x11f0   :  { %v3858_v52 = vsel %vm168_vm2, %v7730_v51, 0.0  ;;  %v4182_v33 = vpop.permute.xlu0 %4181 }
0x11f1   :  { %3859 = vadd.xlane.f32.xlu0 %v3858_v52  ;;  %v4258_v63 = vpop.permute.xlu1 %4257 }
0x11f4   :  { %v4180_v2 = vpop.permute.xlu0 %4179 }
0x11f6   :  { %v7732_v53 = vpop.eup %7731 }
0x11f7   :  { %v3861_v26 = vsel %vm168_vm2, %v7732_v53, 0.0 }
0x11f8   :  { %3862 = vadd.xlane.f32.xlu1 %v3861_v26 }
0x11fa   :  { %v7734_v54 = vpop.eup %7733 }
0x11fb   :  { %v3864_v23 = vsel %vm168_vm2, %v7734_v54, 0.0 }
0x11fc   :  { %3865 = vadd.xlane.f32.xlu0 %v3864_v23 }
0x1209   :  { %4415 = vrot.lane.b32.xlu1 %v8531_v1, %s7841_s25 }
0x120d   :  { %4413 = vrot.lane.b32.xlu1 %v8531_v1, %s7842_s26 }
0x1212   :  { %4337 = vrot.lane.b32.xlu0 %v8527_v0, %s7841_s25  ;;  %s9061_s25 = smov 104  }
0x1216   :  { %4335 = vrot.lane.b32.xlu0 %v8527_v0, %s7842_s26  ;;  %s9062_s26 = smov 40  }
0x1276   :  { %v3857_v36 = vpop.xlane.xlu1 %3856 }
0x1277   :  { %7735 = vrcp.f32 %v3857_v36 }
0x127a   :  { %v3860_v3 = vpop.xlane.xlu0 %3859 }
0x127b   :  { %7737 = vrcp.f32 %v3860_v3 }
0x1281   :  { %v3863_v4 = vpop.xlane.xlu1 %3862 }
0x1282   :  { %7739 = vrcp.f32 %v3863_v4 }
0x1284   :  { %v7736_v5 = vpop.eup %7735 }
0x1285   :  { %v3866_v38 = vpop.xlane.xlu0 %3865  ;;  %v3871_v41 = vmul.f32 %v7736_v5, %v7728_v46  ;;  %v4416_v18 = vpop.permute.xlu1 %4415 }
0x1286   :  { %7741 = vrcp.f32 %v3866_v38 }
0x1287   :  { %7426 = vmatmul.mubr.msk.f32.vlgmr.msra.gmra.mxu0 %vm168_vm2, %v3871_v41 }
0x1288   :  { %v7738_v12 = vpop.eup %7737  ;;  %7429 = vmatpush3.msra.mxu0 %v3952_v28  ;;  %7430 = vmatprep.mubr.msk.f32.mxu0 %vm7838_vm1, %v7837_v8 }
0x1289   :  { %7438 = vmatprep.subr.mxu0 %v7837_v8  ;;  %v3872_v7 = vmul.f32 %v7738_v12, %v7730_v51  ;;  %v4338_v13 = vpop.permute.xlu0 %4337  ;;  %v4414_v17 = vpop.permute.xlu1 %4413 }
0x128b   :  { %7431 = vmatmul.mubr.msk.f32.vlgmr.msra.gmra.mxu0 %vm168_vm2, %v3872_v7 }
0x128c   :  { %7439 = vmatpush3.msra.mxu0 %v4104_v30  ;;  %7440 = vmatprep.mubr.msk.f32.mxu0 %vm7838_vm1, %v7837_v8 }
0x128d   :  { %7448 = vmatprep.subr.mxu0 %v7837_v8  ;;  %v4336_v16 = vpop.permute.xlu0 %4335 }
0x128f   :  { %v7740_v9 = vpop.eup %7739 }
0x1290   :  { %v3873_v40 = vmul.f32 %v7740_v9, %v7732_v53 }
0x1292   :  { %7436 = vmatmul.mubr.msk.f32.vlgmr.msra.gmra.mxu1 %vm168_vm2, %v3873_v40 }
0x1293   :  { %v7742_v10 = vpop.eup %7741  ;;  %7444 = vmatpush3.xpose.msk.msra.mxu1 %vm168_vm2, %v4182_v33  ;;  %7445 = vmatprep.mubr.msk.f32.mxu1 %vm7838_vm1, %v7837_v8 }
0x1294   :  { %7453 = vmatprep.subr.mxu1 %v7837_v8  ;;  %v3874_v14 = vmul.f32 %v7742_v10, %v7734_v54 }
0x1296   :  { %7441 = vmatmul.mubr.msk.f32.vlgmr.msra.gmra.mxu0 %vm168_vm2, %v3874_v14  ;;  %7446 = vmatmul.mubr.msk.f32.vlgmr.msra.gmra.mxu1 %vm168_vm2, %v4180_v2 }
0x1297   :  { %7449 = vmatpush3.xpose.msk.msra.mxu0 %vm168_vm2, %v4260_v60  ;;  %7454 = vmatpush3.xpose.msk.msra.mxu1 %vm168_vm2, %v4338_v13 }
0x1298   :  { %7450 = vmatprep.mubr.msk.f32.mxu0 %vm7838_vm1, %v7837_v8  ;;  %7455 = vmatprep.mubr.msk.f32.mxu1 %vm7838_vm1, %v7837_v8 }
0x1299   :  { %7458 = vmatprep.subr.mxu0 %v7837_v8  ;;  %7463 = vmatprep.subr.mxu1 %v7837_v8 }
0x129a   :  { %7451 = vmatmul.mubr.msk.f32.vlgmr.msra.gmra.mxu0 %vm168_vm2, %v4258_v63  ;;  %7456 = vmatmul.mubr.msk.f32.vlgmr.msra.gmra.mxu1 %vm168_vm2, %v4336_v16 }
0x129b   :  { %7459 = vmatpush3.xpose.msk.msra.mxu0 %vm168_vm2, %v4416_v18  ;;  %7460 = vmatprep.mubr.msk.f32.mxu0 %vm7838_vm1, %v7837_v8 }
0x129c   :  { %7468 = vmatprep.subr.mxu0 %v7837_v8  ;;  %7465 = vmatprep.mubr.msk.f32.mxu1 %vm7838_vm1, %v7837_v8 }
0x129e   :  { %7461 = vmatmul.mubr.msk.f32.vlgmr.msra.gmra.mxu0 %vm168_vm2, %v4414_v17 }
0x129f   :  { %7470 = vmatprep.mubr.msk.f32.mxu0 %vm7838_vm1, %v7837_v8 }
0x1347   :  { %v8651_v58 = vpop.f32.mrf.mxu0 }
0x1349   :  { %v7427_v19 = vpop.f32.mrf.mxu0 }
0x134b   :  { %v8653_v56 = vpop.f32.mrf.mxu0 }
0x134d   :  { %v7432_v62 = vpop.f32.mrf.mxu0 }
0x1352   :  { %v8655_v20 = vpop.f32.mrf.mxu1 }
0x1354   :  { %v7437_v59 = vpop.f32.mrf.mxu1 }
0x1356   :  { %v8657_v22 = vpop.f32.mrf.mxu0  ;;  %v4253_v24 = vpop.f32.mrf.mxu1 }
0x1357   :  { %v4491_v25 = vmul.f32 0.35355338, %v4253_v24 }
0x1358   :  { %v7442_v27 = vpop.f32.mrf.mxu0  ;;  %v7447_v29 = vpop.f32.mrf.mxu1 }
0x1359   :  { %v4495_v31 = vadd.f32 %v8562_v6, %v4491_v25 }
0x135a   :  { %v4331_v32 = vpop.f32.mrf.mxu0  ;;  %v4409_v34 = vpop.f32.mrf.mxu1 }
0x135b   :  { %v4492_v37 = vmul.f32 0.35355338, %v4331_v32  ;;  %v4493_v39 = vmul.f32 0.35355338, %v4409_v34  ;;  %v4499_v42 = vsel %vm168_vm2, %v4495_v31, -inf }
0x135c   :  { %4500 = vmax.xlane.f32.xlu0 %v4499_v42  ;;  %v7452_v43 = vpop.f32.mrf.mxu0  ;;  %v7457_v44 = vpop.f32.mrf.mxu1 }
0x135d   :  { %v4496_v45 = vadd.f32 %v8569_v11, %v4492_v37  ;;  %v4497_v46 = vadd.f32 %v8576_v15, %v4493_v39 }
0x135e   :  { %v4487_v47 = vpop.f32.mrf.mxu0 }
0x135f   :  { %v4494_v48 = vmul.f32 0.35355338, %v4487_v47  ;;  %v4502_v51 = vsel %vm168_vm2, %v4496_v45, -inf  ;;  %v4505_v52 = vsel %vm168_vm2, %v4497_v46, -inf }
0x1360   :  { %4503 = vmax.xlane.f32.xlu1 %v4502_v51  ;;  %v7462_v53 = vpop.f32.mrf.mxu0  ;;  %4506 = vmax.xlane.f32.xlu0 %v4505_v52 }
0x1361   :  { %v4498_v26 = vadd.f32 %v8583_v21, %v4494_v48 }
0x1363   :  { %v4508_v54 = vsel %vm168_vm2, %v4498_v26, -inf }
0x1364   :  { %4509 = vmax.xlane.f32.xlu0 %v4508_v54 }
0x1371   :  { %4543 = vrot.lane.b32.xlu1 %v8521_v61, %s7843_s27 }
0x1375   :  { %4695 = vrot.lane.b32.xlu1 %v8527_v0, %s7843_s27 }
0x1379   :  { %4771 = vrot.lane.b32.xlu1 %v8531_v1, %s7843_s27 }
0x137a   :  { %4619 = vrot.lane.b32.xlu0 %v8519_v35, %s7843_s27  ;;  %s9063_s27 = smov 8  }
0x137d   :  { %4927 = vrot.lane.b32.xlu1 %v8519_v35, %s7844_s28 }
0x137e   :  { %4849 = vrot.lane.b32.xlu0 %v8521_v61, %s7844_s28 }
0x1381   :  { %4925 = vrot.lane.b32.xlu1 %v8519_v35, %s7845_s29 }
0x1382   :  { %4847 = vrot.lane.b32.xlu0 %v8521_v61, %s7845_s29 }
0x13e5   :  { %v4501_v23 = vpop.xlane.xlu0 %4500 }
0x13e6   :  { %v4511_v30 = vsub.f32 %v4495_v31, %v4501_v23 }
0x13e8   :  { %v4515_v28 = vmul.f32 1.442695, %v4511_v30 }
0x13e9   :  { %v4504_v60 = vpop.xlane.xlu1 %4503  ;;  %v4507_v33 = vpop.xlane.xlu0 %4506 }
0x13ea   :  { %7743 = vpow2.f32 %v4515_v28  ;;  %v4512_v63 = vsub.f32 %v4496_v45, %v4504_v60  ;;  %v4513_v2 = vsub.f32 %v4497_v46, %v4507_v33 }
0x13ec   :  { %v4517_v36 = vmul.f32 1.442695, %v4512_v63  ;;  %v4519_v3 = vmul.f32 1.442695, %v4513_v2 }
0x13ed   :  { %v4544_v4 = vpop.permute.xlu1 %4543  ;;  %v4510_v5 = vpop.xlane.xlu0 %4509 }
0x13ee   :  { %7745 = vpow2.f32 %v4517_v36  ;;  %v4514_v38 = vsub.f32 %v4498_v26, %v4510_v5  ;;  %7464 = vmatpush3.msra.mxu1 %v4544_v4 }
0x13ef   :  { %7747 = vpow2.f32 %v4519_v3  ;;  %7473 = vmatprep.subr.mxu1 %v7837_v8 }
0x13f0   :  { %v4521_v41 = vmul.f32 1.442695, %v4514_v38 }
0x13f1   :  { %v4620_v12 = vpop.permute.xlu0 %4619  ;;  %v4696_v17 = vpop.permute.xlu1 %4695 }
0x13f2   :  { %7749 = vpow2.f32 %v4521_v41  ;;  %7469 = vmatpush3.msra.mxu0 %v4620_v12 }
0x13f3   :  { %7478 = vmatprep.subr.mxu0 %v7837_v8 }
0x13f5   :  { %v4772_v19 = vpop.permute.xlu1 %4771  ;;  %v4850_v59 = vpop.permute.xlu0 %4849 }
0x13f7   :  { %v7744_v7 = vpop.eup %7743 }
0x13f8   :  { %v4523_v9 = vsel %vm168_vm2, %v7744_v7, 0.0 }
0x13f9   :  { %4524 = vadd.xlane.f32.xlu1 %v4523_v9  ;;  %v4928_v62 = vpop.permute.xlu1 %4927  ;;  %v4848_v25 = vpop.permute.xlu0 %4847 }
0x13fb   :  { %v7746_v40 = vpop.eup %7745 }
0x13fc   :  { %v7748_v10 = vpop.eup %7747  ;;  %v4526_v13 = vsel %vm168_vm2, %v7746_v40, 0.0 }
0x13fd   :  { %4527 = vadd.xlane.f32.xlu0 %v4526_v13  ;;  %v4529_v14 = vsel %vm168_vm2, %v7748_v10, 0.0  ;;  %v4926_v24 = vpop.permute.xlu1 %4925 }
0x13fe   :  { %4530 = vadd.xlane.f32.xlu1 %v4529_v14 }
0x13ff   :  { %v7750_v18 = vpop.eup %7749 }
0x1400   :  { %v4532_v16 = vsel %vm168_vm2, %v7750_v18, 0.0 }
0x1401   :  { %4533 = vadd.xlane.f32.xlu0 %v4532_v16 }
0x140f   :  { %5083 = vrot.lane.b32.xlu1 %v8531_v1, %s7844_s28 }
0x1413   :  { %5081 = vrot.lane.b32.xlu1 %v8531_v1, %s7845_s29 }
0x1417   :  { %5005 = vrot.lane.b32.xlu0 %v8527_v0, %s7844_s28 }
0x141b   :  { %5003 = vrot.lane.b32.xlu0 %v8527_v0, %s7845_s29 }
0x1482   :  { %v4525_v27 = vpop.xlane.xlu1 %4524 }
0x1483   :  { %7751 = vrcp.f32 %v4525_v27 }
0x1486   :  { %v4528_v29 = vpop.xlane.xlu0 %4527 }
0x1487   :  { %v4531_v31 = vpop.xlane.xlu1 %4530  ;;  %7753 = vrcp.f32 %v4528_v29 }
0x1488   :  { %7755 = vrcp.f32 %v4531_v31 }
0x148a   :  { %v4534_v32 = vpop.xlane.xlu0 %4533 }
0x148b   :  { %7757 = vrcp.f32 %v4534_v32  ;;  %v5084_v48 = vpop.permute.xlu1 %5083 }
0x148e   :  { %v5006_v46 = vpop.permute.xlu0 %5005 }
0x148f   :  { %v5082_v52 = vpop.permute.xlu1 %5081 }
0x1490   :  { %v7752_v34 = vpop.eup %7751 }
0x1491   :  { %v4539_v37 = vmul.f32 %v7752_v34, %v7744_v7 }
0x1492   :  { %v5004_v51 = vpop.permute.xlu0 %5003 }
0x1493   :  { %7466 = vmatmul.mubr.msk.f32.vlgmr.msra.gmra.mxu1 %vm168_vm2, %v4539_v37 }
0x1494   :  { %v7754_v39 = vpop.eup %7753  ;;  %7474 = vmatpush3.msra.mxu1 %v4696_v17  ;;  %7475 = vmatprep.mubr.msk.f32.mxu1 %vm7838_vm1, %v7837_v8 }
0x1495   :  { %v7756_v42 = vpop.eup %7755  ;;  %7483 = vmatprep.subr.mxu1 %v7837_v8  ;;  %v4540_v43 = vmul.f32 %v7754_v39, %v7746_v40 }
0x1496   :  { %v4541_v44 = vmul.f32 %v7756_v42, %v7748_v10 }
0x1497   :  { %7471 = vmatmul.mubr.msk.f32.vlgmr.msra.gmra.mxu0 %vm168_vm2, %v4540_v43 }
0x1498   :  { %v7758_v45 = vpop.eup %7757  ;;  %7476 = vmatmul.mubr.msk.f32.vlgmr.msra.gmra.mxu1 %vm168_vm2, %v4541_v44  ;;  %7479 = vmatpush3.msra.mxu0 %v4772_v19 }
0x1499   :  { %7484 = vmatpush3.xpose.msk.msra.mxu1 %vm168_vm2, %v4850_v59  ;;  %7480 = vmatprep.mubr.msk.f32.mxu0 %vm7838_vm1, %v7837_v8  ;;  %v4542_v47 = vmul.f32 %v7758_v45, %v7750_v18 }
0x149a   :  { %7485 = vmatprep.mubr.msk.f32.mxu1 %vm7838_vm1, %v7837_v8  ;;  %7488 = vmatprep.subr.mxu0 %v7837_v8 }
0x149b   :  { %7493 = vmatprep.subr.mxu1 %v7837_v8  ;;  %7481 = vmatmul.mubr.msk.f32.vlgmr.msra.gmra.mxu0 %vm168_vm2, %v4542_v47 }
0x149c   :  { %7486 = vmatmul.mubr.msk.f32.vlgmr.msra.gmra.mxu1 %vm168_vm2, %v4848_v25  ;;  %7489 = vmatpush3.xpose.msk.msra.mxu0 %vm168_vm2, %v4928_v62 }
0x149d   :  { %7494 = vmatpush3.xpose.msk.msra.mxu1 %vm168_vm2, %v5006_v46  ;;  %7490 = vmatprep.mubr.msk.f32.mxu0 %vm7838_vm1, %v7837_v8 }
0x149e   :  { %7495 = vmatprep.mubr.msk.f32.mxu1 %vm7838_vm1, %v7837_v8  ;;  %7498 = vmatprep.subr.mxu0 %v7837_v8 }
0x149f   :  { %7491 = vmatmul.mubr.msk.f32.vlgmr.msra.gmra.mxu0 %vm168_vm2, %v4926_v24  ;;  %7503 = vmatprep.subr.mxu1 %v7837_v8 }
0x14a0   :  { %7496 = vmatmul.mubr.msk.f32.vlgmr.msra.gmra.mxu1 %vm168_vm2, %v5004_v51  ;;  %7499 = vmatpush3.xpose.msk.msra.mxu0 %vm168_vm2, %v5084_v48 }
0x14a1   :  { %7500 = vmatprep.mubr.msk.f32.mxu0 %vm7838_vm1, %v7837_v8  ;;  %7508 = vmatprep.subr.mxu0 %v7837_v8 }
0x14a2   :  { %7505 = vmatprep.mubr.msk.f32.mxu1 %vm7838_vm1, %v7837_v8 }
0x14a3   :  { %7501 = vmatmul.mubr.msk.f32.vlgmr.msra.gmra.mxu0 %vm168_vm2, %v5082_v52 }
0x14a4   :  { %7510 = vmatprep.mubr.msk.f32.mxu0 %vm7838_vm1, %v7837_v8 }
0x1553   :  { %v8731_v53 = vpop.f32.mrf.mxu1 }
0x1555   :  { %v7467_v26 = vpop.f32.mrf.mxu1 }
0x1557   :  { %v8733_v54 = vpop.f32.mrf.mxu0 }
0x1558   :  { %v8735_v23 = vpop.f32.mrf.mxu1 }
0x1559   :  { %v7472_v30 = vpop.f32.mrf.mxu0 }
0x155a   :  { %v7477_v28 = vpop.f32.mrf.mxu1 }
0x155b   :  { %v8737_v60 = vpop.f32.mrf.mxu0 }
0x155c   :  { %v4921_v33 = vpop.f32.mrf.mxu1 }
0x155d   :  { %v5159_v63 = vmul.f32 0.35355338, %v4921_v33  ;;  %v7482_v2 = vpop.f32.mrf.mxu0 }
0x155e   :  { %v7487_v36 = vpop.f32.mrf.mxu1 }
0x155f   :  { %v5163_v3 = vadd.f32 %v8562_v6, %v5159_v63  ;;  %v4999_v4 = vpop.f32.mrf.mxu0 }
0x1560   :  { %v5160_v5 = vmul.f32 0.35355338, %v4999_v4  ;;  %v5077_v38 = vpop.f32.mrf.mxu1 }
0x1561   :  { %v5161_v41 = vmul.f32 0.35355338, %v5077_v38  ;;  %v5167_v12 = vsel %vm168_vm2, %v5163_v3, -inf  ;;  %v7492_v7 = vpop.f32.mrf.mxu0 }
0x1562   :  { %v5164_v9 = vadd.f32 %v8569_v11, %v5160_v5  ;;  %5168 = vmax.xlane.f32.xlu0 %v5167_v12  ;;  %v7497_v40 = vpop.f32.mrf.mxu1 }
0x1563   :  { %v5165_v10 = vadd.f32 %v8576_v15, %v5161_v41  ;;  %v5155_v13 = vpop.f32.mrf.mxu0 }
0x1564   :  { %v5162_v14 = vmul.f32 0.35355338, %v5155_v13  ;;  %v5170_v18 = vsel %vm168_vm2, %v5164_v9, -inf }
0x1565   :  { %5171 = vmax.xlane.f32.xlu1 %v5170_v18  ;;  %v7502_v16 = vpop.f32.mrf.mxu0  ;;  %v5173_v17 = vsel %vm168_vm2, %v5165_v10, -inf }
0x1566   :  { %v5166_v19 = vadd.f32 %v8583_v21, %v5162_v14  ;;  %5174 = vmax.xlane.f32.xlu0 %v5173_v17 }
0x1568   :  { %v5176_v62 = vsel %vm168_vm2, %v5166_v19, -inf }
0x156a   :  { %5177 = vmax.xlane.f32.xlu0 %v5176_v62 }
0x1576   :  { %5211 = vrot.lane.b32.xlu1 %v8521_v61, %s9059_s1 }
0x157a   :  { %5363 = vrot.lane.b32.xlu1 %v8527_v0, %s9059_s1 }
0x157e   :  { %5439 = vrot.lane.b32.xlu1 %v8531_v1, %s9059_s1 }
0x1580   :  { %5287 = vrot.lane.b32.xlu0 %v8519_v35, %s9059_s1 }
0x1582   :  { %5595 = vrot.lane.b32.xlu1 %v8519_v35, %s9060_s24 }
0x1584   :  { %5517 = vrot.lane.b32.xlu0 %v8521_v61, %s9060_s24 }
0x1586   :  { %5593 = vrot.lane.b32.xlu1 %v8519_v35, %s9061_s25 }
0x1588   :  { %5515 = vrot.lane.b32.xlu0 %v8521_v61, %s9061_s25 }
0x15eb   :  { %v5169_v59 = vpop.xlane.xlu0 %5168 }
0x15ec   :  { %v5179_v24 = vsub.f32 %v5163_v3, %v5169_v59 }
0x15ee   :  { %v5183_v25 = vmul.f32 1.442695, %v5179_v24  ;;  %v5172_v27 = vpop.xlane.xlu1 %5171 }
0x15ef   :  { %v5180_v29 = vsub.f32 %v5164_v9, %v5172_v27  ;;  %v5175_v31 = vpop.xlane.xlu0 %5174 }
0x15f0   :  { %7759 = vpow2.f32 %v5183_v25  ;;  %v5181_v32 = vsub.f32 %v5165_v10, %v5175_v31 }
0x15f1   :  { %v5185_v34 = vmul.f32 1.442695, %v5180_v29 }
0x15f2   :  { %v5187_v37 = vmul.f32 1.442695, %v5181_v32  ;;  %v5212_v39 = vpop.permute.xlu1 %5211 }
0x15f3   :  { %7761 = vpow2.f32 %v5185_v34  ;;  %v5178_v42 = vpop.xlane.xlu0 %5177  ;;  %7504 = vmatpush3.msra.mxu1 %v5212_v39 }
0x15f4   :  { %7763 = vpow2.f32 %v5187_v37  ;;  %v5182_v43 = vsub.f32 %v5166_v19, %v5178_v42  ;;  %7513 = vmatprep.subr.mxu1 %v7837_v8 }
0x15f6   :  { %v5189_v44 = vmul.f32 1.442695, %v5182_v43  ;;  %v5364_v33 = vpop.permute.xlu1 %5363 }
0x15f7   :  { %v5288_v45 = vpop.permute.xlu0 %5287 }
0x15f8   :  { %7765 = vpow2.f32 %v5189_v44  ;;  %7509 = vmatpush3.msra.mxu0 %v5288_v45 }
0x15f9   :  { %7518 = vmatprep.subr.mxu0 %v7837_v8 }
0x15fa   :  { %v5440_v63 = vpop.permute.xlu1 %5439 }
0x15fb   :  { %v5518_v36 = vpop.permute.xlu0 %5517 }
0x15fd   :  { %v7760_v46 = vpop.eup %7759 }
0x15fe   :  { %v5191_v47 = vsel %vm168_vm2, %v7760_v46, 0.0  ;;  %v5596_v2 = vpop.permute.xlu1 %5595 }
0x15ff   :  { %5192 = vadd.xlane.f32.xlu1 %v5191_v47  ;;  %v5516_v4 = vpop.permute.xlu0 %5515 }
0x1600   :  { %v7762_v48 = vpop.eup %7761 }
0x1601   :  { %v7764_v51 = vpop.eup %7763  ;;  %v5194_v52 = vsel %vm168_vm2, %v7762_v48, 0.0 }
0x1602   :  { %5195 = vadd.xlane.f32.xlu0 %v5194_v52  ;;  %v5197_v26 = vsel %vm168_vm2, %v7764_v51, 0.0  ;;  %v5594_v3 = vpop.permute.xlu1 %5593 }
0x1603   :  { %5198 = vadd.xlane.f32.xlu1 %v5197_v26 }
0x1605   :  { %v7766_v30 = vpop.eup %7765 }
0x1606   :  { %v5200_v28 = vsel %vm168_vm2, %v7766_v30, 0.0 }
0x1607   :  { %5201 = vadd.xlane.f32.xlu0 %v5200_v28 }
0x1614   :  { %5751 = vrot.lane.b32.xlu1 %v8531_v1, %s9060_s24 }
0x1618   :  { %5749 = vrot.lane.b32.xlu1 %v8531_v1, %s9061_s25 }
0x161d   :  { %5673 = vrot.lane.b32.xlu0 %v8527_v0, %s9060_s24 }
0x1621   :  { %5671 = vrot.lane.b32.xlu0 %v8527_v0, %s9061_s25 }
0x1688   :  { %v5193_v5 = vpop.xlane.xlu1 %5192 }
0x1689   :  { %7767 = vrcp.f32 %v5193_v5 }
0x168b   :  { %v5196_v38 = vpop.xlane.xlu0 %5195 }
0x168c   :  { %v5199_v41 = vpop.xlane.xlu1 %5198  ;;  %7769 = vrcp.f32 %v5196_v38 }
0x168d   :  { %7771 = vrcp.f32 %v5199_v41 }
0x1690   :  { %v5202_v12 = vpop.xlane.xlu0 %5201  ;;  %v5752_v19 = vpop.permute.xlu1 %5751 }
0x1691   :  { %7773 = vrcp.f32 %v5202_v12 }
0x1694   :  { %v5674_v16 = vpop.permute.xlu0 %5673  ;;  %v5750_v59 = vpop.permute.xlu1 %5749 }
0x1696   :  { %v7768_v7 = vpop.eup %7767 }
0x1697   :  { %v5207_v9 = vmul.f32 %v7768_v7, %v7760_v46 }
0x1698   :  { %v5672_v62 = vpop.permute.xlu0 %5671 }
0x1699   :  { %v7770_v40 = vpop.eup %7769  ;;  %7506 = vmatmul.mubr.msk.f32.vlgmr.msra.gmra.mxu1 %vm168_vm2, %v5207_v9 }
0x169a   :  { %v7772_v10 = vpop.eup %7771  ;;  %7514 = vmatpush3.msra.mxu1 %v5364_v33  ;;  %7515 = vmatprep.mubr.msk.f32.mxu1 %vm7838_vm1, %v7837_v8  ;;  %v5208_v13 = vmul.f32 %v7770_v40, %v7762_v48 }
0x169b   :  { %7523 = vmatprep.subr.mxu1 %v7837_v8  ;;  %v5209_v14 = vmul.f32 %v7772_v10, %v7764_v51 }
0x169c   :  { %7511 = vmatmul.mubr.msk.f32.vlgmr.msra.gmra.mxu0 %vm168_vm2, %v5208_v13 }
0x169d   :  { %7516 = vmatmul.mubr.msk.f32.vlgmr.msra.gmra.mxu1 %vm168_vm2, %v5209_v14  ;;  %7519 = vmatpush3.msra.mxu0 %v5440_v63 }
0x169e   :  { %v7774_v18 = vpop.eup %7773  ;;  %7524 = vmatpush3.xpose.msk.msra.mxu1 %vm168_vm2, %v5518_v36  ;;  %7520 = vmatprep.mubr.msk.f32.mxu0 %vm7838_vm1, %v7837_v8 }
0x169f   :  { %7525 = vmatprep.mubr.msk.f32.mxu1 %vm7838_vm1, %v7837_v8  ;;  %7528 = vmatprep.subr.mxu0 %v7837_v8  ;;  %v5210_v17 = vmul.f32 %v7774_v18, %v7766_v30 }
0x16a0   :  { %7533 = vmatprep.subr.mxu1 %v7837_v8 }
0x16a1   :  { %7521 = vmatmul.mubr.msk.f32.vlgmr.msra.gmra.mxu0 %vm168_vm2, %v5210_v17  ;;  %7526 = vmatmul.mubr.msk.f32.vlgmr.msra.gmra.mxu1 %vm168_vm2, %v5516_v4 }
0x16a2   :  { %7529 = vmatpush3.xpose.msk.msra.mxu0 %vm168_vm2, %v5596_v2  ;;  %7534 = vmatpush3.xpose.msk.msra.mxu1 %vm168_vm2, %v5674_v16 }
0x16a3   :  { %7530 = vmatprep.mubr.msk.f32.mxu0 %vm7838_vm1, %v7837_v8  ;;  %7535 = vmatprep.mubr.msk.f32.mxu1 %vm7838_vm1, %v7837_v8 }
0x16a4   :  { %7538 = vmatprep.subr.mxu0 %v7837_v8  ;;  %7543 = vmatprep.subr.mxu1 %v7837_v8 }
0x16a5   :  { %7531 = vmatmul.mubr.msk.f32.vlgmr.msra.gmra.mxu0 %vm168_vm2, %v5594_v3  ;;  %7536 = vmatmul.mubr.msk.f32.vlgmr.msra.gmra.mxu1 %vm168_vm2, %v5672_v62 }
0x16a6   :  { %7539 = vmatpush3.xpose.msk.msra.mxu0 %vm168_vm2, %v5752_v19  ;;  %7540 = vmatprep.mubr.msk.f32.mxu0 %vm7838_vm1, %v7837_v8 }
0x16a7   :  { %7548 = vmatprep.subr.mxu0 %v7837_v8  ;;  %7545 = vmatprep.mubr.msk.f32.mxu1 %vm7838_vm1, %v7837_v8 }
0x16a9   :  { %7541 = vmatmul.mubr.msk.f32.vlgmr.msra.gmra.mxu0 %vm168_vm2, %v5750_v59 }
0x16aa   :  { %7550 = vmatprep.mubr.msk.f32.mxu0 %vm7838_vm1, %v7837_v8 }
0x1759   :  { %v8811_v24 = vpop.f32.mrf.mxu1 }
0x175b   :  { %v7507_v25 = vpop.f32.mrf.mxu1 }
0x175c   :  { %v8813_v27 = vpop.f32.mrf.mxu0 }
0x175d   :  { %v8815_v29 = vpop.f32.mrf.mxu1 }
0x175e   :  { %v7512_v31 = vpop.f32.mrf.mxu0 }
0x175f   :  { %v7517_v32 = vpop.f32.mrf.mxu1 }
0x1761   :  { %v8817_v34 = vpop.f32.mrf.mxu0  ;;  %v5589_v37 = vpop.f32.mrf.mxu1 }
0x1762   :  { %v5827_v39 = vmul.f32 0.35355338, %v5589_v37 }
0x1763   :  { %v7522_v42 = vpop.f32.mrf.mxu0  ;;  %v7527_v43 = vpop.f32.mrf.mxu1 }
0x1764   :  { %v5831_v44 = vadd.f32 %v8562_v6, %v5827_v39  ;;  %v6890_v42 = vld [vmem:[%s9038_s4 + $0x38] sm:$0xff]  ;;  %v6889_v43 = vld [vmem:[%s9038_s4 + $0x30] sm:$0xff] }
0x1765   :  { %v5667_v45 = vpop.f32.mrf.mxu0  ;;  %v5745_v46 = vpop.f32.mrf.mxu1 }
0x1766   :  { %v5828_v47 = vmul.f32 0.35355338, %v5667_v45  ;;  %v5829_v48 = vmul.f32 0.35355338, %v5745_v46  ;;  %v5835_v51 = vsel %vm168_vm2, %v5831_v44, -inf }
0x1767   :  { %5836 = vmax.xlane.f32.xlu0 %v5835_v51  ;;  %v7532_v52 = vpop.f32.mrf.mxu0  ;;  %v7537_v26 = vpop.f32.mrf.mxu1 }
0x1768   :  { %v5832_v30 = vadd.f32 %v8569_v11, %v5828_v47  ;;  %v5833_v28 = vadd.f32 %v8576_v15, %v5829_v48 }
0x1769   :  { %v5823_v33 = vpop.f32.mrf.mxu0 }
0x176a   :  { %v5830_v63 = vmul.f32 0.35355338, %v5823_v33  ;;  %v5838_v2 = vsel %vm168_vm2, %v5832_v30, -inf  ;;  %v5841_v36 = vsel %vm168_vm2, %v5833_v28, -inf }
0x176b   :  { %5839 = vmax.xlane.f32.xlu1 %v5838_v2  ;;  %v7542_v6 = vpop.f32.mrf.mxu0  ;;  %5842 = vmax.xlane.f32.xlu0 %v5841_v36 }
0x176c   :  { %v5834_v3 = vadd.f32 %v8583_v21, %v5830_v63 }
0x176e   :  { %v5844_v4 = vsel %vm168_vm2, %v5834_v3, -inf }
0x176f   :  { %5845 = vmax.xlane.f32.xlu0 %v5844_v4 }
0x177c   :  { %5879 = vrot.lane.b32.xlu1 %v8521_v61, %s9062_s26 }
0x17f0   :  { %v5837_v11 = vpop.xlane.xlu0 %5836 }
0x17f1   :  { %v5847_v5 = vsub.f32 %v5831_v44, %v5837_v11  ;;  %v6888_v44 = vld [vmem:[%s9038_s4 + $0x28] sm:$0xff] }
0x17f3   :  { %v5851_v15 = vmul.f32 1.442695, %v5847_v5 }
0x17f4   :  { %v5840_v38 = vpop.xlane.xlu1 %5839  ;;  %v5843_v41 = vpop.xlane.xlu0 %5842 }
0x17f5   :  { %7775 = vpow2.f32 %v5851_v15  ;;  %v5848_v12 = vsub.f32 %v5832_v30, %v5840_v38  ;;  %v5849_v7 = vsub.f32 %v5833_v28, %v5843_v41 }
0x17f7   :  { %v5853_v9 = vmul.f32 1.442695, %v5848_v12  ;;  %v5855_v40 = vmul.f32 1.442695, %v5849_v7 }
0x17f8   :  { %v5880_v10 = vpop.permute.xlu1 %5879  ;;  %v5846_v13 = vpop.xlane.xlu0 %5845 }
0x17f9   :  { %7777 = vpow2.f32 %v5853_v9  ;;  %v5850_v21 = vsub.f32 %v5834_v3, %v5846_v13  ;;  %7544 = vmatpush3.msra.mxu1 %v5880_v10 }
0x17fa   :  { %7779 = vpow2.f32 %v5855_v40  ;;  %7553 = vmatprep.subr.mxu1 %v7837_v8 }
0x17fb   :  { %v5857_v14 = vmul.f32 1.442695, %v5850_v21 }
0x17fd   :  { %7781 = vpow2.f32 %v5857_v14 }
0x1802   :  { %v7776_v61 = vpop.eup %7775 }
0x1803   :  { %v5859_v18 = vsel %vm168_vm2, %v7776_v61, 0.0 }
0x1804   :  { %5860 = vadd.xlane.f32.xlu1 %v5859_v18 }
0x1806   :  { %v7778_v16 = vpop.eup %7777 }
0x1807   :  { %v7780_v17 = vpop.eup %7779  ;;  %v5862_v19 = vsel %vm168_vm2, %v7778_v16, 0.0 }
0x1808   :  { %5863 = vadd.xlane.f32.xlu0 %v5862_v19  ;;  %v5865_v62 = vsel %vm168_vm2, %v7780_v17, 0.0 }
0x1809   :  { %5866 = vadd.xlane.f32.xlu1 %v5865_v62 }
0x180a   :  { %v7782_v59 = vpop.eup %7781 }
0x180b   :  { %v5868_v25 = vsel %vm168_vm2, %v7782_v59, 0.0 }
0x180c   :  { %5869 = vadd.xlane.f32.xlu0 %v5868_v25 }
0x181a   :  { %6031 = vrot.lane.b32.xlu1 %v8527_v0, %s9062_s26 }
0x181e   :  { %6107 = vrot.lane.b32.xlu1 %v8531_v1, %s9062_s26 }
0x1822   :  { %6189 = vrot.lane.b32.xlu1 %v8733_v54, %s9063_s27  ;;  %5955 = vrot.lane.b32.xlu0 %v8519_v35, %s9062_s26 }
0x1826   :  { %6205 = vrot.lane.b32.xlu1 %v8813_v27, %s7851_s20  ;;  %6187 = vrot.lane.b32.xlu0 %v8731_v53, %s9063_s27 }
0x182a   :  { %6193 = vrot.lane.b32.xlu1 %v8737_v60, %s9063_s27  ;;  %6203 = vrot.lane.b32.xlu0 %v8811_v24, %s7851_s20 }
0x182e   :  { %6209 = vrot.lane.b32.xlu1 %v8817_v34, %s7851_s20  ;;  %6191 = vrot.lane.b32.xlu0 %v8735_v23, %s9063_s27 }
0x1832   :  { %6207 = vrot.lane.b32.xlu0 %v8815_v29, %s7851_s20 }
0x188d   :  { %v5861_v35 = vpop.xlane.xlu1 %5860 }
0x188e   :  { %7783 = vrcp.f32 %v5861_v35 }
0x1891   :  { %v5864_v0 = vpop.xlane.xlu0 %5863 }
0x1892   :  { %v5867_v1 = vpop.xlane.xlu1 %5866  ;;  %7785 = vrcp.f32 %v5864_v0 }
0x1893   :  { %7787 = vrcp.f32 %v5867_v1 }
0x1895   :  { %v5870_v53 = vpop.xlane.xlu0 %5869 }
0x1896   :  { %7789 = vrcp.f32 %v5870_v53  ;;  %v6032_v24 = vpop.permute.xlu1 %6031 }
0x1899   :  { %v5956_v54 = vpop.permute.xlu0 %5955 }
0x189a   :  { %7549 = vmatpush3.msra.mxu0 %v5956_v54  ;;  %v6108_v34 = vpop.permute.xlu1 %6107 }
0x189b   :  { %v7784_v60 = vpop.eup %7783  ;;  %7558 = vmatprep.subr.mxu0 %v7837_v8 }
0x189c   :  { %v5875_v27 = vmul.f32 %v7784_v60, %v7776_v61  ;;  %v6892_v61 = vld [vmem:[%s9039_s5 + $0x1] ss:$0 sm:$0xff] }
0x189d   :  { %v6188_v28 = vpop.permute.xlu0 %6187 }
0x189e   :  { %7546 = vmatmul.mubr.msk.f32.vlgmr.msra.gmra.mxu1 %vm168_vm2, %v5875_v27  ;;  %v6190_v33 = vpop.permute.xlu1 %6189  ;;  %v6231_v4 = vsel %vm168_vm2, %v8651_v58, %v6188_v28  ;;  %v6901_v28 = vld [vmem:[%s9042_s8 + $0x20] sm:$0xff] }
0x189f   :  { %v7786_v23 = vpop.eup %7785  ;;  %7554 = vmatpush3.msra.mxu1 %v6032_v24  ;;  %7555 = vmatprep.mubr.msk.f32.mxu1 %vm7838_vm1, %v7837_v8  ;;  %v6232_v41 = vsel %vm168_vm2, %v8653_v56, %v6190_v33  ;;  %v6926_v33 = vld [vmem:[%s9044_s10 + $0xf8] sm:$0xff] }
0x18a0   :  { %v7788_v29 = vpop.eup %7787  ;;  %v5876_v31 = vmul.f32 %v7786_v23, %v7778_v16  ;;  %7563 = vmatprep.subr.mxu1 %v6890_v42 }
0x18a1   :  { %v5877_v32 = vmul.f32 %v7788_v29, %v7780_v17  ;;  %v6204_v63 = vpop.permute.xlu0 %6203 }
0x18a2   :  { %7551 = vmatmul.mubr.msk.f32.vlgmr.msra.gmra.mxu0 %vm168_vm2, %v5876_v31  ;;  %v6206_v2 = vpop.permute.xlu1 %6205  ;;  %v6235_v11 = vsel %vm2910_vm3, %v6231_v4, %v6204_v63  ;;  %v6925_v63 = vld [vmem:[%s9044_s10 + $0xf0] sm:$0xff]  ;;  %v6920_v4 = vld [vmem:[%s9044_s10 + $0xc8] sm:$0xff] }
0x18a3   :  { %v7790_v37 = vpop.eup %7789  ;;  %7556 = vmatmul.mubr.msk.f32.vlgmr.msra.gmra.mxu1 %vm168_vm2, %v5877_v32  ;;  %7559 = vmatpush3.msra.mxu0 %v6108_v34  ;;  %v6236_v12 = vsel %vm2910_vm3, %v6232_v41, %v6206_v2  ;;  %v6924_v2 = vld [vmem:[%s9044_s10 + $0xe8] sm:$0xff]  ;;  %v6915_v41 = vld [vmem:[%s9044_s10 + $0xa0] sm:$0xff] }
0x18a4   :  { %7560 = vmatprep.mubr.msk.f32.mxu0 %vm7838_vm1, %v7837_v8  ;;  %v5878_v39 = vmul.f32 %v7790_v37, %v7782_v59  ;;  %7564 = vmatpush3.msra.mxu1 %v6890_v42  ;;  %v6887_v8 = vld [vmem:[%s9038_s4 + $0x20] sm:$0xff] }
0x18a5   :  { %7565 = vmatprep.subr.mxu1 %v6889_v43  ;;  %v6192_v36 = vpop.permute.xlu0 %6191 }
0x18a6   :  { %7561 = vmatmul.mubr.msk.f32.vlgmr.msra.gmra.mxu0 %vm168_vm2, %v5878_v39  ;;  %7566 = vmatpush3.msra.mxu1 %v6889_v43  ;;  %v6194_v6 = vpop.permute.xlu1 %6193  ;;  %v6233_v7 = vsel %vm168_vm2, %v8655_v20, %v6192_v36  ;;  %v6923_v36 = vld [vmem:[%s9044_s10 + $0xe0] sm:$0xff] }
0x18a7   :  { %7567 = vmatprep.subr.mxu1 %v6888_v44  ;;  %v6234_v21 = vsel %vm168_vm2, %v8657_v22, %v6194_v6  ;;  %v6922_v6 = vld [vmem:[%s9044_s10 + $0xd8] sm:$0xff] }
0x18a8   :  { %7568 = vmatpush3.msra.mxu1 %v6888_v44 }
0x18a9   :  { %7569 = vmatprep.subr.mxu1 %v6887_v8  ;;  %v6208_v3 = vpop.permute.xlu0 %6207 }
0x18aa   :  { %7570 = vmatpush3.msra.mxu1 %v6887_v8  ;;  %v6210_v5 = vpop.permute.xlu1 %6209  ;;  %v6237_v40 = vsel %vm2910_vm3, %v6233_v7, %v6208_v3  ;;  %v6921_v3 = vld [vmem:[%s9044_s10 + $0xd0] sm:$0xff] }
0x18ab   :  { %v6238_v56 = vsel %vm2910_vm3, %v6234_v21, %v6210_v5  ;;  %7591 = vmatprep.subr.mxu1 %v6926_v33  ;;  %v6918_v5 = vld [vmem:[%s9044_s10 + $0xb8] sm:$0xff] }
0x195e   :  { %v5951_v45 = vpop.f32.mrf.mxu1 }
0x195f   :  { %6219 = vrot.lane.b32.xlu0 %v5951_v45, %s7852_s21 }
0x1960   :  { %v7547_v46 = vpop.f32.mrf.mxu1 }
0x1962   :  { %v6027_v47 = vpop.f32.mrf.mxu0 }
0x1963   :  { %v6103_v48 = vpop.f32.mrf.mxu1  ;;  %6221 = vrot.lane.b32.xlu1 %v6027_v47, %s7852_s21 }
0x1964   :  { %6223 = vrot.lane.b32.xlu0 %v6103_v48, %s7852_s21  ;;  %v7552_v51 = vpop.f32.mrf.mxu0 }
0x1965   :  { %v7557_v52 = vpop.f32.mrf.mxu1 }
0x1966   :  { %v6179_v26 = vpop.f32.mrf.mxu0  ;;  %v6904_v52 = vld [vmem:[%s9042_s8 + $0x38] sm:$0xff] }
0x1967   :  { %6225 = vrot.lane.b32.xlu1 %v6179_v26, %s7852_s21  ;;  %v6903_v26 = vld [vmem:[%s9042_s8 + $0x30] sm:$0xff]  ;;  %7577 = vmatprep.subr.mxu0 %v6904_v52 }
0x1968   :  { %v7562_v30 = vpop.f32.mrf.mxu0  ;;  %7578 = vmatpush3.msra.mxu0 %v6904_v52 }
0x1969   :  { %v6902_v30 = vld [vmem:[%s9042_s8 + $0x28] sm:$0xff]  ;;  %7579 = vmatprep.subr.mxu0 %v6903_v26 }
0x196a   :  { %7580 = vmatpush3.msra.mxu0 %v6903_v26 }
0x196b   :  { %7581 = vmatprep.subr.mxu0 %v6902_v30 }
0x196c   :  { %7582 = vmatpush3.msra.mxu0 %v6902_v30 }
0x196d   :  { %7583 = vmatprep.subr.mxu0 %v6901_v28 }
0x196e   :  { %7584 = vmatpush3.msra.mxu0 %v6901_v28 }
0x19d1   :  { %v6220_v15 = vpop.permute.xlu0 %6219 }
0x19d2   :  { %v6239_v38 = vsel %vm2915_vm4, %v6235_v11, %v6220_v15  ;;  %v6919_v11 = vld [vmem:[%s9044_s10 + $0xc0] sm:$0xff]  ;;  %v6917_v15 = vld [vmem:[%s9044_s10 + $0xb0] sm:$0xff] }
0x19d3   :  { %7571 = vmatprep.mubr.msk.f32.mxu1 %vm67_vm0, %v6239_v38  ;;  %v6916_v38 = vld [vmem:[%s9044_s10 + $0xa8] sm:$0xff] }
0x19d5   :  { %v6222_v9 = vpop.permute.xlu1 %6221 }
0x19d6   :  { %v6240_v58 = vsel %vm2915_vm4, %v6236_v12, %v6222_v9  ;;  %v6224_v10 = vpop.permute.xlu0 %6223 }
0x19d7   :  { %v6241_v13 = vsel %vm2915_vm4, %v6237_v40, %v6224_v10  ;;  %7572 = vmatmul.mubr.msk.f32.vlgmr.msra.gmra.mxu1 %vm67_vm0, %v6240_v58 }
0x19d8   :  { %7574 = vmatprep.mubr.msk.f32.mxu1 %vm67_vm0, %v6241_v13  ;;  %7592 = vmatpush3.msra.mxu1 %v6926_v33 }
0x19d9   :  { %v6226_v14 = vpop.permute.xlu1 %6225  ;;  %7593 = vmatprep.subr.mxu1 %v6925_v63 }
0x19da   :  { %v6242_v20 = vsel %vm2915_vm4, %v6238_v56, %v6226_v14  ;;  %7594 = vmatpush3.msra.mxu1 %v6925_v63 }
0x19db   :  { %7575 = vmatmul.mubr.msk.f32.gmra.mxu1 %vm67_vm0, %v6242_v20  ;;  %7595 = vmatprep.subr.mxu1 %v6924_v2 }
0x19dc   :  { %7596 = vmatpush3.msra.mxu1 %v6924_v2 }
0x19dd   :  { %7597 = vmatprep.subr.mxu1 %v6923_v36 }
0x19de   :  { %7598 = vmatpush3.msra.mxu1 %v6923_v36 }
0x19df   :  { %7599 = vmatprep.subr.mxu1 %v6922_v6 }
0x19e0   :  { %7600 = vmatpush3.msra.mxu1 %v6922_v6 }
0x19e1   :  { %7601 = vmatprep.subr.mxu1 %v6921_v3 }
0x19e2   :  { %7602 = vmatpush3.msra.mxu1 %v6921_v3 }
0x19e3   :  { %7603 = vmatprep.subr.mxu1 %v6920_v4 }
0x19e4   :  { %7604 = vmatpush3.msra.mxu1 %v6920_v4 }
0x19e5   :  { %7605 = vmatprep.subr.mxu1 %v6919_v11 }
0x19e6   :  { %7606 = vmatpush3.msra.mxu1 %v6919_v11 }
0x19e7   :  { %7607 = vmatprep.subr.mxu1 %v6918_v5 }
0x19e8   :  { %7608 = vmatpush3.msra.mxu1 %v6918_v5 }
0x19e9   :  { %7609 = vmatprep.subr.mxu1 %v6917_v15 }
0x19ea   :  { %7610 = vmatpush3.msra.mxu1 %v6917_v15 }
0x19eb   :  { %7611 = vmatprep.subr.mxu1 %v6916_v38 }
0x19ec   :  { %7612 = vmatpush3.msra.mxu1 %v6916_v38 }
0x19ed   :  { %7613 = vmatprep.subr.mxu1 %v6915_v41 }
0x19ee   :  { %7614 = vmatpush3.msra.mxu1 %v6915_v41 }
0x1a97   :  { %v7573_v18 = vpop.f32.mrf.mxu1 }
0x1a98   :  { %v6340_v16 = vadd.f32 %v7573_v18, %v6892_v61 }
0x1a99   :  { %v6334_v17 = vpop.f32.mrf.mxu1 }
0x1a9a   :  { %v6354_v19 = vadd.f32 %v6340_v16, %v8500_v50  ;;  %v6335_v62 = vadd.f32 %v6892_v61, %v6334_v17  ;;  %v6898_v17 = vld [vmem:[%s9040_s6 + $0x1] ss:$0 sm:$0xff] }
0x1a9b   :  { %v7576_v22 = vpop.f32.mrf.mxu1 }
0x1a9c   :  { %v6353_v59 = vadd.f32 %v6335_v62, %v8498_v49  ;;  %v6360_v25 = vsel %vm67_vm0, %v6354_v19, 0.0  ;;  %v6350_v0 = vadd.f32 %v7576_v22, %v6892_v61 }
0x1a9d   :  { %6361 = vadd.xlane.f32.xlu1 %v6360_v25  ;;  %v6344_v35 = vpop.f32.mrf.mxu1  ;;  %v6900_v25 = vld [vmem:[%s9041_s7 + $0x1] ss:$0 sm:$0xff] }
0x1a9e   :  { %v6345_v1 = vadd.f32 %v6892_v61, %v6344_v35  ;;  %v6357_v53 = vsel %vm67_vm0, %v6353_v59, 0.0  ;;  %v6356_v60 = vadd.f32 %v6350_v0, %v8508_v57 }
0x1a9f   :  { %6358 = vadd.xlane.f32.xlu0 %v6357_v53 }
0x1aa0   :  { %v6355_v54 = vadd.f32 %v6345_v1, %v8506_v55  ;;  %v6366_v50 = vsel %vm67_vm0, %v6356_v60, 0.0 }
0x1aa2   :  { %v6363_v24 = vsel %vm67_vm0, %v6355_v54, 0.0 }
0x1aa3   :  { %6364 = vadd.xlane.f32.xlu0 %v6363_v24 }
0x1aa7   :  { %6367 = vadd.xlane.f32.xlu0 %v6366_v50 }
0x1b26   :  { %v6362_v49 = vpop.xlane.xlu1 %6361 }
0x1b27   :  { %v6370_v27 = vmul.f32 0.03125, %v6362_v49 }
0x1b28   :  { %v6359_v23 = vpop.xlane.xlu0 %6358 }
0x1b29   :  { %v8912_v29 = vsub.f32 %v6354_v19, %v6370_v27  ;;  %v6369_v31 = vmul.f32 0.03125, %v6359_v23  ;;  %v6914_v23 = vld [vmem:[%s9044_s10 + $0x98] sm:$0xff] }
0x1b2a   :  { %7615 = vmatprep.subr.mxu1 %v6914_v23 }
0x1b2b   :  { %v8914_v32 = vsub.f32 %v6353_v59, %v6369_v31  ;;  %v6378_v34 = vmul.f32 %v8912_v29, %v8912_v29  ;;  %7616 = vmatpush3.msra.mxu1 %v6914_v23  ;;  %v6912_v31 = vld [vmem:[%s9044_s10 + $0x88] sm:$0xff] }
0x1b2c   :  { %v6365_v55 = vpop.xlane.xlu0 %6364 }
0x1b2d   :  { %v6371_v37 = vmul.f32 0.03125, %v6365_v55  ;;  %v6384_v57 = vsel %vm67_vm0, %v6378_v34, 0.0  ;;  %v6377_v39 = vmul.f32 %v8914_v32, %v8914_v32  ;;  %v6906_v34 = vld [vmem:[%s9043_s9 + $0x1] ss:$0 sm:$0xff] }
0x1b2e   :  { %6385 = vadd.xlane.f32.xlu0 %v6384_v57 }
0x1b2f   :  { %v8921_v42 = vsub.f32 %v6355_v54, %v6371_v37  ;;  %v6381_v43 = vsel %vm67_vm0, %v6377_v39, 0.0 }
0x1b30   :  { %6382 = vadd.xlane.f32.xlu1 %v6381_v43  ;;  %v6368_v44 = vpop.xlane.xlu0 %6367 }
0x1b31   :  { %v6372_v8 = vmul.f32 0.03125, %v6368_v44  ;;  %v6379_v45 = vmul.f32 %v8921_v42, %v8921_v42 }
0x1b33   :  { %v8926_v46 = vsub.f32 %v6356_v60, %v6372_v8  ;;  %v6387_v47 = vsel %vm67_vm0, %v6379_v45, 0.0 }
0x1b34   :  { %6388 = vadd.xlane.f32.xlu1 %v6387_v47 }
0x1b35   :  { %v6380_v48 = vmul.f32 %v8926_v46, %v8926_v46 }
0x1b37   :  { %v6390_v51 = vsel %vm67_vm0, %v6380_v48, 0.0 }
0x1b38   :  { %6391 = vadd.xlane.f32.xlu0 %v6390_v51  ;;  %v6928_v51 = vld [vmem:[%s9045_s11 + $0x1] ss:$0 sm:$0xff] }
0x1bb7   :  { %v6386_v12 = vpop.xlane.xlu0 %6385 }
0x1bb8   :  { %v6394_v7 = vmul.f32 0.03125, %v6386_v12 }
0x1bb9   :  { %v6383_v9 = vpop.xlane.xlu1 %6382 }
0x1bba   :  { %v6398_v40 = vadd.f32 1e-05, %v6394_v7  ;;  %v6393_v58 = vmul.f32 0.03125, %v6383_v9 }
0x1bbc   :  { %7791 = vrsqrt.f32 %v6398_v40  ;;  %v6397_v10 = vadd.f32 1e-05, %v6393_v58 }
0x1bbd   :  { %v6389_v13 = vpop.xlane.xlu1 %6388 }
0x1bbe   :  { %7793 = vrsqrt.f32 %v6397_v10  ;;  %v6395_v21 = vmul.f32 0.03125, %v6389_v13 }
0x1bc0   :  { %v6399_v56 = vadd.f32 1e-05, %v6395_v21 }
0x1bc1   :  { %v6392_v14 = vpop.xlane.xlu0 %6391 }
0x1bc2   :  { %7795 = vrsqrt.f32 %v6399_v56  ;;  %v6396_v20 = vmul.f32 0.03125, %v6392_v14 }
0x1bc4   :  { %v6400_v61 = vadd.f32 1e-05, %v6396_v20 }
0x1bc6   :  { %7797 = vrsqrt.f32 %v6400_v61 }
0x1bc9   :  { %v7792_v18 = vpop.eup %7791 }
0x1bca   :  { %v6406_v16 = vmul.f32 %v7792_v18, %v8912_v29  ;;  %v6913_v29 = vld [vmem:[%s9044_s10 + $0x90] sm:$0xff] }
0x1bcb   :  { %v7794_v19 = vpop.eup %7793  ;;  %7617 = vmatprep.subr.mxu1 %v6913_v29 }
0x1bcc   :  { %v6405_v62 = vmul.f32 %v7794_v19, %v8914_v32  ;;  %v6418_v22 = vmul.f32 %v6898_v17, %v6406_v16  ;;  %7618 = vmatpush3.msra.mxu1 %v6913_v29  ;;  %v6911_v32 = vld [vmem:[%s9044_s10 + $0x80] sm:$0xff] }
0x1bcd   :  { %7619 = vmatprep.subr.mxu1 %v6912_v31 }
0x1bce   :  { %v6417_v59 = vmul.f32 %v6898_v17, %v6405_v62  ;;  %v6430_v53 = vadd.f32 %v6900_v25, %v6418_v22  ;;  %7620 = vmatpush3.msra.mxu1 %v6912_v31 }
0x1bcf   :  { %v7796_v35 = vpop.eup %7795  ;;  %7621 = vmatprep.subr.mxu1 %v6911_v32 }
0x1bd0   :  { %v6429_v0 = vadd.f32 %v6900_v25, %v6417_v59  ;;  %v6407_v1 = vmul.f32 %v7796_v35, %v8921_v42  ;;  %7622 = vmatpush3.msra.mxu1 %v6911_v32  ;;  %v6930_v32 = vld [vmem:[%s9046_s12 + $0x1] ss:$0 sm:$0xff]  ;;  %s7853_s12 = smov [#allocation2]  }
0x1bd1   :  { %s6746_s17 = sshll.u32 %s7853_s12, 4  ;;  %s6747_s17 = int_to_ptr.vmem [resolvable:$true] %s6746_s17 }
0x1bd2   :  { %7585 = vmatprep.mubr.msk.f32.mxu0 %vm67_vm0, %v6429_v0  ;;  %v6419_v54 = vmul.f32 %v6898_v17, %v6407_v1  ;;  %p7820_p1 = scmp.lt.s32.totalorder %s6747_s17, %s6747_s17 }
0x1bd3   :  { %v7798_v60 = vpop.eup %7797  ;;  %7586 = vmatmul.mubr.msk.f32.vlgmr.msra.gmra.mxu0 %vm67_vm0, %v6430_v53 }
0x1bd4   :  { %v6431_v24 = vadd.f32 %v6900_v25, %v6419_v54  ;;  %v6408_v50 = vmul.f32 %v7798_v60, %v8926_v46 }
0x1bd6   :  { %7588 = vmatprep.mubr.msk.f32.mxu0 %vm67_vm0, %v6431_v24  ;;  %v6420_v49 = vmul.f32 %v6898_v17, %v6408_v50 }
0x1bd8   :  { %v6432_v27 = vadd.f32 %v6900_v25, %v6420_v49 }
0x1bda   :  { %7589 = vmatmul.mubr.msk.f32.gmra.mxu0 %vm67_vm0, %v6432_v27 }
0x1c93   :  { %v7587_v55 = vpop.f32.mrf.mxu0 }
0x1c94   :  { %v6530_v37 = vadd.f32 %v7587_v55, %v6906_v34 }
0x1c95   :  { %v6524_v57 = vpop.f32.mrf.mxu0 }
0x1c96   :  { %v6525_v39 = vadd.f32 %v6906_v34, %v6524_v57  ;;  %v6544_v43 = vmax.f32 %v6530_v37, 0.0  ;;  %v6932_v37 = vld [vmem:[%s9047_s13 + $0x1] ss:$0 sm:$0xff]  ;;  %s7815_s13 = scalar_lea.vmem %s6747_s17, 512 }
0x1c97   :  { %p7816_p0 = scmp.ne.s32.totalorder %s6747_s17, %s7815_s13  ;;  %p7821_p2 = scmp.lt.s32.totalorder %s7815_s13, %s7815_s13 }
0x1c98   :  { %v6543_v42 = vmax.f32 %v6525_v39, 0.0 }
0x1c99   :  { %p7822_p3 = por %p7821_p2, %p7820_p1 }
0x1c9a   :  { %v7590_v44 = vpop.f32.mrf.mxu0  ;;  %7623 = vmatprep.mubr.f32.mxu1 %v6543_v42 }
0x1c9b   :  { %7624 = vmatmul.mubr.f32.vlgmr.msra.gmra.mxu1 %v6544_v43  ;;  %v6540_v8 = vadd.f32 %v7590_v44, %v6906_v34  ;;  %p7823_p4 = pnand %p7822_p3, %p7816_p0 }
0x1c9c   :  { %v6534_v45 = vpop.f32.mrf.mxu0 }
0x1c9d   :  { %v6535_v46 = vadd.f32 %v6906_v34, %v6534_v45  ;;  %v6546_v48 = vmax.f32 %v6540_v8, 0.0 }
0x1c9f   :  { %v6545_v47 = vmax.f32 %v6535_v46, 0.0 }
0x1ca1   :  { %7626 = vmatprep.mubr.f32.mxu1 %v6545_v47 }
0x1ca2   :  { %7627 = vmatmul.mubr.f32.gmra.mxu1 %v6546_v48 }
0x1d5b   :  { %v7625_v52 = vpop.f32.mrf.mxu1 }
0x1d5c   :  { %v6644_v26 = vadd.f32 %v7625_v52, %v6928_v51 }
0x1d5d   :  { %v6638_v30 = vpop.f32.mrf.mxu1 }
0x1d5e   :  { %v6658_v28 = vadd.f32 %v6644_v26, %v6430_v53  ;;  %v6639_v33 = vadd.f32 %v6928_v51, %v6638_v30 }
0x1d60   :  { %v6657_v63 = vadd.f32 %v6639_v33, %v6429_v0  ;;  %v6664_v2 = vsel %vm67_vm0, %v6658_v28, 0.0 }
0x1d61   :  { %6665 = vadd.xlane.f32.xlu0 %v6664_v2 }
0x1d62   :  { %v7628_v36 = vpop.f32.mrf.mxu1  ;;  %v6661_v6 = vsel %vm67_vm0, %v6657_v63, 0.0 }
0x1d63   :  { %v6654_v3 = vadd.f32 %v7628_v36, %v6928_v51  ;;  %6662 = vadd.xlane.f32.xlu1 %v6661_v6 }
0x1d64   :  { %v6648_v4 = vpop.f32.mrf.mxu1 }
0x1d65   :  { %v6660_v11 = vadd.f32 %v6654_v3, %v6432_v27  ;;  %v6649_v5 = vadd.f32 %v6928_v51, %v6648_v4 }
0x1d67   :  { %v6659_v15 = vadd.f32 %v6649_v5, %v6431_v24  ;;  %v6670_v38 = vsel %vm67_vm0, %v6660_v11, 0.0 }
0x1d68   :  { %6671 = vadd.xlane.f32.xlu0 %v6670_v38 }
0x1d69   :  { %v6667_v41 = vsel %vm67_vm0, %v6659_v15, 0.0 }
0x1d6a   :  { %6668 = vadd.xlane.f32.xlu1 %v6667_v41 }
0x1dea   :  { %v6666_v12 = vpop.xlane.xlu0 %6665 }
0x1deb   :  { %v6674_v7 = vmul.f32 0.03125, %v6666_v12 }
0x1dec   :  { %v6663_v9 = vpop.xlane.xlu1 %6662 }
0x1ded   :  { %v6678_v40 = vsub.f32 %v6658_v28, %v6674_v7  ;;  %v6673_v58 = vmul.f32 0.03125, %v6663_v9 }
0x1def   :  { %v6677_v10 = vsub.f32 %v6657_v63, %v6673_v58  ;;  %v6682_v13 = vmul.f32 %v6678_v40, %v6678_v40 }
0x1df1   :  { %v6672_v21 = vpop.xlane.xlu0 %6671  ;;  %v6688_v56 = vsel %vm67_vm0, %v6682_v13, 0.0  ;;  %v6681_v14 = vmul.f32 %v6677_v10, %v6677_v10 }
0x1df2   :  { %v6676_v20 = vmul.f32 0.03125, %v6672_v21  ;;  %6689 = vadd.xlane.f32.xlu0 %v6688_v56 }
0x1df3   :  { %v6669_v61 = vpop.xlane.xlu1 %6668  ;;  %v6685_v18 = vsel %vm67_vm0, %v6681_v14, 0.0 }
0x1df4   :  { %v6680_v16 = vsub.f32 %v6660_v11, %v6676_v20  ;;  %v6675_v17 = vmul.f32 0.03125, %v6669_v61  ;;  %6686 = vadd.xlane.f32.xlu1 %v6685_v18 }
0x1df6   :  { %v6679_v19 = vsub.f32 %v6659_v15, %v6675_v17  ;;  %v6684_v62 = vmul.f32 %v6680_v16, %v6680_v16 }
0x1df8   :  { %v6694_v22 = vsel %vm67_vm0, %v6684_v62, 0.0  ;;  %v6683_v59 = vmul.f32 %v6679_v19, %v6679_v19 }
0x1df9   :  { %6695 = vadd.xlane.f32.xlu0 %v6694_v22 }
0x1dfa   :  { %v6691_v25 = vsel %vm67_vm0, %v6683_v59, 0.0 }
0x1dfb   :  { %6692 = vadd.xlane.f32.xlu1 %v6691_v25 }
0x1e7b   :  { %v6690_v35 = vpop.xlane.xlu0 %6689 }
0x1e7c   :  { %v6698_v0 = vmul.f32 0.03125, %v6690_v35 }
0x1e7d   :  { %v6687_v1 = vpop.xlane.xlu1 %6686 }
0x1e7e   :  { %v6702_v53 = vadd.f32 1e-05, %v6698_v0  ;;  %v6697_v54 = vmul.f32 0.03125, %v6687_v1 }
0x1e80   :  { %7799 = vrsqrt.f32 %v6702_v53  ;;  %v6701_v60 = vadd.f32 1e-05, %v6697_v54 }
0x1e82   :  { %7801 = vrsqrt.f32 %v6701_v60  ;;  %v6696_v24 = vpop.xlane.xlu0 %6695 }
0x1e83   :  { %v6700_v50 = vmul.f32 0.03125, %v6696_v24 }
0x1e84   :  { %v6693_v49 = vpop.xlane.xlu1 %6692 }
0x1e85   :  { %v6704_v27 = vadd.f32 1e-05, %v6700_v50  ;;  %v6699_v23 = vmul.f32 0.03125, %v6693_v49 }
0x1e87   :  { %7803 = vrsqrt.f32 %v6704_v27  ;;  %v6703_v29 = vadd.f32 1e-05, %v6699_v23 }
0x1e89   :  { %7805 = vrsqrt.f32 %v6703_v29 }
0x1e8d   :  { %v7800_v31 = vpop.eup %7799 }
0x1e8e   :  { %v6710_v34 = vmul.f32 %v7800_v31, %v6678_v40 }
0x1e8f   :  { %v7802_v55 = vpop.eup %7801 }
0x1e90   :  { %v6722_v57 = vmul.f32 %v6930_v32, %v6710_v34  ;;  %v6709_v39 = vmul.f32 %v7802_v55, %v6677_v10 }
0x1e92   :  { %v6721_v42 = vmul.f32 %v6930_v32, %v6709_v39  ;;  %v6734_v43 = vadd.f32 %v6932_v37, %v6722_v57 }
0x1e94   :  { %v7804_v44 = vpop.eup %7803  ;;  %v6733_v8 = vadd.f32 %v6932_v37, %v6721_v42  ;;  %6738 = vst.msk [vmem:[#allocation2 + $0x8] sm:$0xff] %vm67_vm0, %v6734_v43 }
0x1e95   :  { %v6712_v45 = vmul.f32 %v7804_v44, %v6680_v16 }
0x1e96   :  { %v7806_v46 = vpop.eup %7805  ;;  %6737 = vst.msk [vmem:[#allocation2] sm:$0xff] %vm67_vm0, %v6733_v8 }
0x1e97   :  { %v6724_v47 = vmul.f32 %v6930_v32, %v6712_v45  ;;  %v6711_v48 = vmul.f32 %v7806_v46, %v6679_v19 }
0x1e99   :  { %v6723_v51 = vmul.f32 %v6930_v32, %v6711_v48  ;;  %v6736_v52 = vadd.f32 %v6932_v37, %v6724_v47 }
0x1e9b   :  { %v6735_v26 = vadd.f32 %v6932_v37, %v6723_v51  ;;  %6740 = vst.msk [vmem:[#allocation2 + $0x18] sm:$0xff] %vm67_vm0, %v6736_v52 }
0x1e9d   :  { %6739 = vst.msk [vmem:[#allocation2 + $0x10] sm:$0xff] %vm67_vm0, %v6735_v26 }
0x1e9e   :  { %7826 = shalt.err (!%p7823_p4)
}
0x1e9f   :  { %s7854_s2 = smov 128  }
0x1ea0   :  { %6752 = dma.vmem_to_hbm [thread:$0]  %s6747_s17, 512, %s9048_s14, [#allocation3], %s7854_s2, %s7854_s2, %s9063_s27  }
0x1ea1   :  { %7835 = dma.done.wait [#allocation3], 512  }
0x1ea2   :  { %7836 = vsyncadd [#allocation3], 4294966784 }
0x1ea3   :  { %6756 = vsyncpa [#allocation3], 1 }

</bundles_post_ra>
